<compile_context>
chip_gen: v7x
topology: tpu7x:2x2x1
jax: 0.10.0
libtpu: 0.0.40
codegen_flags: <defaults>
</compile_context>

<pallas_src>
import numpy as np
import jax
import jax.numpy as jnp
from jax.experimental import pallas as pl
from jax.experimental.pallas import tpu as pltpu

# TODO(synk): PyTorch picks shift_direction = +/-1 at random in __init__;
# fixed deterministically to +1 here (the kernel handles either value).
SHIFT = 1

_PAD = 32            # leading zero-guard columns in the padded scratch
_W = 256             # scratch width (2 lane tiles): guards + 14*14 image
_WIDE = 224          # 196 + 2*14: one masked patch covering kh = 0,1,2


def _tpu_flavor():
    """(two_tensorcores, bf16_vpu) — detection errors only affect perf."""
    kind = ""
    try:
        d = jax.devices()[0]
        if d.platform == "tpu":
            kind = d.device_kind.lower()
    except Exception:
        pass
    two_cores = ("v7" in kind) or ("7x" in kind)
    bf16_vpu = ("v6" in kind) or two_cores
    return two_cores, bf16_vpu


def _plan_taps(shift):
    """Statically decompose (W-roll + W-pad + W-unfold) into flat lane shifts
    plus 0/1 masks over the output column p = r % 14 (kh-invariant)."""
    masks, plan = [], []
    for j in range(3):                            # j == kw
        d = j - 1 - shift
        groups = {}
        for p in range(14):
            if not 0 <= p + j - 1 < 14:           # zero padding of the W unfold
                continue
            q = (p + d) % 14                      # W-roll source column
            groups.setdefault(q - p, []).append(p)
        entries = []
        for delta in sorted(groups):
            pset = groups[delta]
            if len(pset) == 14:
                midx = None                       # all columns valid -> no mask
            else:
                m = np.zeros((14,), np.float32)
                m[np.array(pset)] = 1.0
                midx = next((i for i, prev in enumerate(masks)
                             if np.array_equal(prev, m)), None)
                if midx is None:
                    masks.append(m)
                    midx = len(masks) - 1
            entries.append((delta, midx))
        plan.append(entries)
    if not masks:
        masks.append(np.ones((14,), np.float32))
    return plan, np.stack(masks, axis=0)          # (n_masks, 14)


def _make_kernel(shift):
    plan, _ = _plan_taps(shift)
    t = (14 * shift) % 196          # flat lane roll implementing the H-roll
    base = _PAD - 14                # wide patch covers kh-1 .. kh+1 rows
    for entries in plan:            # all wide-window reads stay in the scratch
        for delta, _ in entries:
            assert 0 <= base + delta and base + delta + _WIDE <= _W

    def kernel(x_ref, mask_ref, w_ref, out_ref, xp_ref, col_ref):
        cdt = xp_ref.dtype

        # --- zero only the guard columns, then materialise the H-roll ------
        xp_ref[:, :_PAD] = jnp.zeros((128, _PAD), cdt)
        xp_ref[:, _PAD + 196:] = jnp.zeros((128, _W - _PAD - 196), cdt)
        if t == 0:
            xp_ref[:, _PAD:_PAD + 196] = x_ref[...]
        else:
            xp_ref[:, _PAD + t:_PAD + 196] = x_ref[:, :196 - t]
            xp_ref[:, _PAD:_PAD + t] = x_ref[:, 196 - t:]

        # --- build the (1152, 196) bf16 im2col ------------------------------
        # One masked "wide" (128, 224) patch per kw (plan/masks are
        # kh-invariant), cast once, sliced three ways for kh = 0,1,2.
        # Masks have disjoint supports, so the "+" below is an exact select.
        for kw in range(3):
            wide = None
            for delta, midx in plan[kw]:
                sl = xp_ref[:, base + delta: base + delta + _WIDE]   # (128,224)
                if midx is not None:
                    sl = sl * mask_ref[midx:midx + 1, :]
                wide = sl if wide is None else wide + sl
            wide = wide.astype(jnp.bfloat16)
            for kh in range(3):
                tap = 3 * kh + kw
                col_ref[tap * 128:(tap + 1) * 128, :] = \
                    wide[:, 14 * kh:14 * kh + 196]

        # --- one K=1152 MXU contraction per 128 output channels -------------
        # (single store of the f32 result; no accumulator read-modify-write)
        for mb in range(w_ref.shape[0] // 128):
            out_ref[mb * 128:(mb + 1) * 128, :] = jnp.dot(
                w_ref[mb * 128:(mb + 1) * 128, :], col_ref[...],
                preferred_element_type=jnp.float32)

    return kernel


def fold_weights(w1, w2):
    """Fold w2 into w1 once, directly in the (out_ch, K) MXU layout with
    K = (3*kh + kw)*128 + in_ch.  For repeated inference, call this once and
    reuse the packed bf16 tensor with forward_packed()."""
    w2r = w2.reshape(32, 4, 3, 4)                        # (g, b, kh, m)
    wt = jnp.einsum('ighwm,gbhm->ihwgb', w1, w2r)        # (256, 3, 3, 32, 4)
    return wt.reshape(256, 9 * 128).astype(jnp.bfloat16)


def forward_packed(x, wt, shift=SHIFT):
    s = int(shift)
    two_cores, bf16_vpu = _tpu_flavor()
    oc_blk = 128 if two_cores else 256          # 2-way TC split only on v7x
    cdtype = jnp.bfloat16 if bf16_vpu else jnp.float32   # f32 VPU math on v5e

    _, mask14 = _plan_taps(s)
    n_masks = mask14.shape[0]
    masks = jnp.asarray(np.tile(mask14, (1, _WIDE // 14)), dtype=cdtype)

    x2 = x.reshape(128, 196).astype(cdtype)     # NCHW channel-major, free
    kernel = _make_kernel(s)

    csize = 2 if bf16_vpu else 4
    y = pl.pallas_call(
        kernel,
        out_shape=jax.ShapeDtypeStruct((256, 196), jnp.float32),
        grid=(256 // oc_blk,),
        in_specs=[
            pl.BlockSpec((128, 196), lambda g: (0, 0)),
            pl.BlockSpec((n_masks, _WIDE), lambda g: (0, 0)),
            pl.BlockSpec((oc_blk, 1152), lambda g: (g, 0)),
        ],
        out_specs=pl.BlockSpec((oc_blk, 196), lambda g: (g, 0)),
        scratch_shapes=[pltpu.VMEM((128, _W), cdtype),           # rolled+padded x
                        pltpu.VMEM((1152, 196), jnp.bfloat16)],  # im2col
        compiler_params=pltpu.CompilerParams(
            dimension_semantics=("parallel",)),
        cost_estimate=pl.CostEstimate(
            flops=2 * 256 * 196 * 1152,
            transcendentals=0,
            bytes_accessed=(128 * 196 * csize + n_masks * _WIDE * csize
                            + 256 * 1152 * 2 + 256 * 196 * 4)),
    )(x2, masks, wt)

    return y.reshape(1, 256, 14, 14)


def kernel_generated_3_forward(x, w1, w2, shift=SHIFT):
    return forward_packed(x, fold_weights(w1, w2), shift=shift)


# --------------------------- pure-JAX reference -----------------------------

def _unfold_3x1_pad1(x):
    n, c, h, w = x.shape
    xp = jnp.pad(x, ((0, 0), (0, 0), (1, 1), (0, 0)))
    cols = jnp.stack([xp[:, :, k:k + h, :] for k in range(3)], axis=2)
    return cols.reshape(n, c * 3, h * w)


def reference_forward(x, w1, w2, shift=SHIFT):
    t3 = jnp.roll(x, shift, axis=2).reshape(1, 128, 14, 14)
    t3 = _unfold_3x1_pad1(t3).reshape(1, 128, 3, 14, 14)
    t4 = jnp.einsum('ljkmn,jki->ljkmni', t3, w2)
    t5 = t4.reshape(1, 32, 4, 3, 14, 14, 4).sum(axis=2)
    t6 = jnp.roll(t5, shift, axis=4).reshape(1, 1344, 14, 4)
    t6 = _unfold_3x1_pad1(t6).reshape(1, 32, 3, 14, 3, 14, 4)
    return jnp.einsum('nlkojpm,ilkjm->niop', t6, w1)


if __name__ == "__main__":
    key = jax.random.PRNGKey(0)
    kx, k1, k2 = jax.random.split(key, 3)
    # shapes implied by the module's hard-coded reshapes / parameter shapes
    x = jax.random.normal(kx, (1, 128, 14, 14), dtype=jnp.float32)
    w1 = jax.random.normal(k1, (256, 32, 3, 3, 4), dtype=jnp.float32)
    w2 = jax.random.normal(k2, (128, 3, 4), dtype=jnp.float32)

    y = jax.jit(kernel_generated_3_forward)(x, w1, w2)
    y = jax.block_until_ready(y)

    assert y.shape == (1, 256, 14, 14) and y.dtype == jnp.float32

    y_ref = reference_forward(x, w1, w2)
    err = float(jnp.max(jnp.abs(y - y_ref)))
    scale = float(jnp.max(jnp.abs(y_ref)))
    if err <= 1e-2 * scale:
        print("KERNEL_OK")
    else:
        print(f"MISMATCH max_abs_err={err} scale={scale}")
</pallas_src>

<mosaic_0001>
module attributes {stable_mosaic.version = 11 : i64} {
  func.func @kernel(%arg0: i32, %arg1: memref<128x196xf32, #tpu.memory_space<vmem>>, %arg2: memref<5x224xf32, #tpu.memory_space<vmem>>, %arg3: memref<256x1152xbf16, #tpu.memory_space<vmem>>, %arg4: memref<256x196xf32, #tpu.memory_space<vmem>>, %arg5: memref<128x256xf32, #tpu.memory_space<vmem>>, %arg6: memref<1152x196xbf16, #tpu.memory_space<vmem>>) attributes {dimension_semantics = [#tpu.dimension_semantics<parallel>], iteration_bounds = array<i64: 1>, scalar_prefetch = 0 : i64, scratch_operands = 2 : i64, tpu.core_type = #tpu.core_type<tc>, window_params = [{pipeline_mode = #tpu.pipeline_mode<synchronous>, transform_indices = @transform_0, window_bounds = array<i64: 128, 196>}, {pipeline_mode = #tpu.pipeline_mode<synchronous>, transform_indices = @transform_1, window_bounds = array<i64: 5, 224>}, {transform_indices = @transform_2, window_bounds = array<i64: 256, 1152>}, {transform_indices = @transform_3, window_bounds = array<i64: 256, 196>}]} {
    %cst = arith.constant 0.000000e+00 : f32
    %0 = vector.broadcast %cst : f32 to vector<128x32xf32>
    %c0 = arith.constant 0 : index
    %c0_0 = arith.constant 0 : index
    %1 = vector.load %arg5[%c0, %c0_0] : memref<128x256xf32, #tpu.memory_space<vmem>>, vector<128x32xf32>
    tpu.vector_store %arg5[%c0, %c0_0], %0 {strides = array<i32>} : memref<128x256xf32, #tpu.memory_space<vmem>>, vector<128x32xf32>,
    %cst_1 = arith.constant 0.000000e+00 : f32
    %2 = vector.broadcast %cst_1 : f32 to vector<128x28xf32>
    %c0_2 = arith.constant 0 : index
    %c228 = arith.constant 228 : index
    %3 = vector.load %arg5[%c0_2, %c228] : memref<128x256xf32, #tpu.memory_space<vmem>>, vector<128x28xf32>
    tpu.vector_store %arg5[%c0_2, %c228], %2 {strides = array<i32>} : memref<128x256xf32, #tpu.memory_space<vmem>>, vector<128x28xf32>,
    %c0_3 = arith.constant 0 : index
    %c0_4 = arith.constant 0 : index
    %4 = vector.load %arg1[%c0_3, %c0_4] : memref<128x196xf32, #tpu.memory_space<vmem>>, vector<128x182xf32>
    %c0_5 = arith.constant 0 : index
    %c46 = arith.constant 46 : index
    %5 = vector.load %arg5[%c0_5, %c46] : memref<128x256xf32, #tpu.memory_space<vmem>>, vector<128x182xf32>
    tpu.vector_store %arg5[%c0_5, %c46], %4 {strides = array<i32>} : memref<128x256xf32, #tpu.memory_space<vmem>>, vector<128x182xf32>,
    %c0_6 = arith.constant 0 : index
    %c182 = arith.constant 182 : index
    %6 = vector.load %arg1[%c0_6, %c182] : memref<128x196xf32, #tpu.memory_space<vmem>>, vector<128x14xf32>
    %c0_7 = arith.constant 0 : index
    %c32 = arith.constant 32 : index
    %7 = vector.load %arg5[%c0_7, %c32] : memref<128x256xf32, #tpu.memory_space<vmem>>, vector<128x14xf32>
    tpu.vector_store %arg5[%c0_7, %c32], %6 {strides = array<i32>} : memref<128x256xf32, #tpu.memory_space<vmem>>, vector<128x14xf32>,
    %c0_8 = arith.constant 0 : index
    %c16 = arith.constant 16 : index
    %8 = vector.load %arg5[%c0_8, %c16] : memref<128x256xf32, #tpu.memory_space<vmem>>, vector<128x224xf32>
    %c0_9 = arith.constant 0 : index
    %c0_10 = arith.constant 0 : index
    %9 = vector.load %arg2[%c0_9, %c0_10] : memref<5x224xf32, #tpu.memory_space<vmem>>, vector<1x224xf32>
    %10 = vector.broadcast %9 : vector<1x224xf32> to vector<128x224xf32>
    %11 = arith.mulf %8, %10 : vector<128x224xf32>
    %c0_11 = arith.constant 0 : index
    %c30 = arith.constant 30 : index
    %12 = vector.load %arg5[%c0_11, %c30] : memref<128x256xf32, #tpu.memory_space<vmem>>, vector<128x224xf32>
    %c1 = arith.constant 1 : index
    %c0_12 = arith.constant 0 : index
    %13 = vector.load %arg2[%c1, %c0_12] : memref<5x224xf32, #tpu.memory_space<vmem>>, vector<1x224xf32>
    %14 = vector.broadcast %13 : vector<1x224xf32> to vector<128x224xf32>
    %15 = arith.mulf %12, %14 : vector<128x224xf32>
    %16 = arith.addf %11, %15 : vector<128x224xf32>
    %17 = arith.truncf %16 : vector<128x224xf32> to vector<128x224xbf16>
    %18 = vector.extract_strided_slice %17 {offsets = [0, 0], sizes = [128, 196], strides = [1, 1]} : vector<128x224xbf16> to vector<128x196xbf16>
    %c0_13 = arith.constant 0 : index
    %c0_14 = arith.constant 0 : index
    %19 = vector.load %arg6[%c0_13, %c0_14] : memref<1152x196xbf16, #tpu.memory_space<vmem>>, vector<128x196xbf16>
    tpu.vector_store %arg6[%c0_13, %c0_14], %18 {strides = array<i32>} : memref<1152x196xbf16, #tpu.memory_space<vmem>>, vector<128x196xbf16>,
    %20 = vector.extract_strided_slice %17 {offsets = [0, 14], sizes = [128, 196], strides = [1, 1]} : vector<128x224xbf16> to vector<128x196xbf16>
    %c384 = arith.constant 384 : index
    %c0_15 = arith.constant 0 : index
    %21 = vector.load %arg6[%c384, %c0_15] : memref<1152x196xbf16, #tpu.memory_space<vmem>>, vector<128x196xbf16>
    tpu.vector_store %arg6[%c384, %c0_15], %20 {strides = array<i32>} : memref<1152x196xbf16, #tpu.memory_space<vmem>>, vector<128x196xbf16>,
    %22 = vector.extract_strided_slice %17 {offsets = [0, 28], sizes = [128, 196], strides = [1, 1]} : vector<128x224xbf16> to vector<128x196xbf16>
    %c768 = arith.constant 768 : index
    %c0_16 = arith.constant 0 : index
    %23 = vector.load %arg6[%c768, %c0_16] : memref<1152x196xbf16, #tpu.memory_space<vmem>>, vector<128x196xbf16>
    tpu.vector_store %arg6[%c768, %c0_16], %22 {strides = array<i32>} : memref<1152x196xbf16, #tpu.memory_space<vmem>>, vector<128x196xbf16>,
    %c0_17 = arith.constant 0 : index
    %c17 = arith.constant 17 : index
    %24 = vector.load %arg5[%c0_17, %c17] : memref<128x256xf32, #tpu.memory_space<vmem>>, vector<128x224xf32>
    %c2 = arith.constant 2 : index
    %c0_18 = arith.constant 0 : index
    %25 = vector.load %arg2[%c2, %c0_18] : memref<5x224xf32, #tpu.memory_space<vmem>>, vector<1x224xf32>
    %26 = vector.broadcast %25 : vector<1x224xf32> to vector<128x224xf32>
    %27 = arith.mulf %24, %26 : vector<128x224xf32>
    %c0_19 = arith.constant 0 : index
    %c31 = arith.constant 31 : index
    %28 = vector.load %arg5[%c0_19, %c31] : memref<128x256xf32, #tpu.memory_space<vmem>>, vector<128x224xf32>
    %c3 = arith.constant 3 : index
    %c0_20 = arith.constant 0 : index
    %29 = vector.load %arg2[%c3, %c0_20] : memref<5x224xf32, #tpu.memory_space<vmem>>, vector<1x224xf32>
    %30 = vector.broadcast %29 : vector<1x224xf32> to vector<128x224xf32>
    %31 = arith.mulf %28, %30 : vector<128x224xf32>
    %32 = arith.addf %27, %31 : vector<128x224xf32>
    %33 = arith.truncf %32 : vector<128x224xf32> to vector<128x224xbf16>
    %34 = vector.extract_strided_slice %33 {offsets = [0, 0], sizes = [128, 196], strides = [1, 1]} : vector<128x224xbf16> to vector<128x196xbf16>
    %c128 = arith.constant 128 : index
    %c0_21 = arith.constant 0 : index
    %35 = vector.load %arg6[%c128, %c0_21] : memref<1152x196xbf16, #tpu.memory_space<vmem>>, vector<128x196xbf16>
    tpu.vector_store %arg6[%c128, %c0_21], %34 {strides = array<i32>} : memref<1152x196xbf16, #tpu.memory_space<vmem>>, vector<128x196xbf16>,
    %36 = vector.extract_strided_slice %33 {offsets = [0, 14], sizes = [128, 196], strides = [1, 1]} : vector<128x224xbf16> to vector<128x196xbf16>
    %c512 = arith.constant 512 : index
    %c0_22 = arith.constant 0 : index
    %37 = vector.load %arg6[%c512, %c0_22] : memref<1152x196xbf16, #tpu.memory_space<vmem>>, vector<128x196xbf16>
    tpu.vector_store %arg6[%c512, %c0_22], %36 {strides = array<i32>} : memref<1152x196xbf16, #tpu.memory_space<vmem>>, vector<128x196xbf16>,
    %38 = vector.extract_strided_slice %33 {offsets = [0, 28], sizes = [128, 196], strides = [1, 1]} : vector<128x224xbf16> to vector<128x196xbf16>
    %c896 = arith.constant 896 : index
    %c0_23 = arith.constant 0 : index
    %39 = vector.load %arg6[%c896, %c0_23] : memref<1152x196xbf16, #tpu.memory_space<vmem>>, vector<128x196xbf16>
    tpu.vector_store %arg6[%c896, %c0_23], %38 {strides = array<i32>} : memref<1152x196xbf16, #tpu.memory_space<vmem>>, vector<128x196xbf16>,
    %c0_24 = arith.constant 0 : index
    %c18 = arith.constant 18 : index
    %40 = vector.load %arg5[%c0_24, %c18] : memref<128x256xf32, #tpu.memory_space<vmem>>, vector<128x224xf32>
    %c4 = arith.constant 4 : index
    %c0_25 = arith.constant 0 : index
    %41 = vector.load %arg2[%c4, %c0_25] : memref<5x224xf32, #tpu.memory_space<vmem>>, vector<1x224xf32>
    %42 = vector.broadcast %41 : vector<1x224xf32> to vector<128x224xf32>
    %43 = arith.mulf %40, %42 : vector<128x224xf32>
    %44 = arith.truncf %43 : vector<128x224xf32> to vector<128x224xbf16>
    %45 = vector.extract_strided_slice %44 {offsets = [0, 0], sizes = [128, 196], strides = [1, 1]} : vector<128x224xbf16> to vector<128x196xbf16>
    %c256 = arith.constant 256 : index
    %c0_26 = arith.constant 0 : index
    %46 = vector.load %arg6[%c256, %c0_26] : memref<1152x196xbf16, #tpu.memory_space<vmem>>, vector<128x196xbf16>
    tpu.vector_store %arg6[%c256, %c0_26], %45 {strides = array<i32>} : memref<1152x196xbf16, #tpu.memory_space<vmem>>, vector<128x196xbf16>,
    %47 = vector.extract_strided_slice %44 {offsets = [0, 14], sizes = [128, 196], strides = [1, 1]} : vector<128x224xbf16> to vector<128x196xbf16>
    %c640 = arith.constant 640 : index
    %c0_27 = arith.constant 0 : index
    %48 = vector.load %arg6[%c640, %c0_27] : memref<1152x196xbf16, #tpu.memory_space<vmem>>, vector<128x196xbf16>
    tpu.vector_store %arg6[%c640, %c0_27], %47 {strides = array<i32>} : memref<1152x196xbf16, #tpu.memory_space<vmem>>, vector<128x196xbf16>,
    %49 = vector.extract_strided_slice %44 {offsets = [0, 28], sizes = [128, 196], strides = [1, 1]} : vector<128x224xbf16> to vector<128x196xbf16>
    %c1024 = arith.constant 1024 : index
    %c0_28 = arith.constant 0 : index
    %50 = vector.load %arg6[%c1024, %c0_28] : memref<1152x196xbf16, #tpu.memory_space<vmem>>, vector<128x196xbf16>
    tpu.vector_store %arg6[%c1024, %c0_28], %49 {strides = array<i32>} : memref<1152x196xbf16, #tpu.memory_space<vmem>>, vector<128x196xbf16>,
    %c0_29 = arith.constant 0 : index
    %c0_30 = arith.constant 0 : index
    %51 = vector.load %arg3[%c0_29, %c0_30] : memref<256x1152xbf16, #tpu.memory_space<vmem>>, vector<128x1152xbf16>
    %c0_31 = arith.constant 0 : index
    %c0_32 = arith.constant 0 : index
    %52 = vector.load %arg6[%c0_31, %c0_32] : memref<1152x196xbf16, #tpu.memory_space<vmem>>, vector<1152x196xbf16>
    %cst_33 = arith.constant dense<0.000000e+00> : vector<128x196xf32>
    %53 = tpu.matmul %51, %52, %cst_33 {dimension_numbers = #tpu.dot_dimension_numbers<[1], [0], [0], [1], [0, 0, 1, 1], [], []>} : vector<128x1152xbf16>, vector<1152x196xbf16>, vector<128x196xf32> -> vector<128x196xf32>
    %c0_34 = arith.constant 0 : index
    %c0_35 = arith.constant 0 : index
    %54 = vector.load %arg4[%c0_34, %c0_35] : memref<256x196xf32, #tpu.memory_space<vmem>>, vector<128x196xf32>
    tpu.vector_store %arg4[%c0_34, %c0_35], %53 {strides = array<i32>} : memref<256x196xf32, #tpu.memory_space<vmem>>, vector<128x196xf32>,
    %c128_36 = arith.constant 128 : index
    %c0_37 = arith.constant 0 : index
    %55 = vector.load %arg3[%c128_36, %c0_37] : memref<256x1152xbf16, #tpu.memory_space<vmem>>, vector<128x1152xbf16>
    %c0_38 = arith.constant 0 : index
    %c0_39 = arith.constant 0 : index
    %56 = vector.load %arg6[%c0_38, %c0_39] : memref<1152x196xbf16, #tpu.memory_space<vmem>>, vector<1152x196xbf16>
    %cst_40 = arith.constant dense<0.000000e+00> : vector<128x196xf32>
    %57 = tpu.matmul %55, %56, %cst_40 {dimension_numbers = #tpu.dot_dimension_numbers<[1], [0], [0], [1], [0, 0, 1, 1], [], []>} : vector<128x1152xbf16>, vector<1152x196xbf16>, vector<128x196xf32> -> vector<128x196xf32>
    %c128_41 = arith.constant 128 : index
    %c0_42 = arith.constant 0 : index
    %58 = vector.load %arg4[%c128_41, %c0_42] : memref<256x196xf32, #tpu.memory_space<vmem>>, vector<128x196xf32>
    tpu.vector_store %arg4[%c128_41, %c0_42], %57 {strides = array<i32>} : memref<256x196xf32, #tpu.memory_space<vmem>>, vector<128x196xf32>,
    return
  }
  func.func @transform_0(%arg0: i32) -> (i32, i32) {
    %c0_i32 = arith.constant 0 : i32
    %c0_i32_0 = arith.constant 0 : i32
    %c0_i32_1 = arith.constant 0 : i32
    return %c0_i32, %c0_i32_0 : i32, i32
  }
  func.func @transform_1(%arg0: i32) -> (i32, i32) {
    %c0_i32 = arith.constant 0 : i32
    %c0_i32_0 = arith.constant 0 : i32
    %c0_i32_1 = arith.constant 0 : i32
    return %c0_i32, %c0_i32_0 : i32, i32
  }
  func.func @transform_2(%arg0: i32) -> (i32, i32) {
    %c0_i32 = arith.constant 0 : i32
    %c0_i32_0 = arith.constant 0 : i32
    return %arg0, %c0_i32 : i32, i32
  }
  func.func @transform_3(%arg0: i32) -> (i32, i32) {
    %c0_i32 = arith.constant 0 : i32
    %c0_i32_0 = arith.constant 0 : i32
    return %arg0, %c0_i32 : i32, i32
  }
}

</mosaic_0001>

<bundles_post_ra>
// kernel: kernel_generated_3_forward.1
= control target key start
LH: loop header
LB: loop body
LE: loop exit
PB: predicated region body
PF: predicated region fallthrough
CT: control target
= control target key end

     0   :  { %vm15_vm0 = vcmask 261120   ;;  %v4827_v2 = vmov 0.0   ;;  %vm32_vm1 = vcmask 1048352   ;;  %s4828_s16 = smov 46   ;;  %s4829_s21 = smov 106   ;;  %v391_v9 = vlaneseq  ;;  %s6813_s0 = inlined_call_operand.vmem [shape: f32[128,196], index: 0, kind: input, shape index: {}]   ;;  %s6814_s1 = inlined_call_operand.vmem [shape: f32[5,224], index: 1, kind: input, shape index: {}]   ;;  %s6815_s2 = inlined_call_operand.vmem [shape: bf16[256,1152], index: 2, kind: input, shape index: {}]   ;;  %s6816_s3 = inlined_call_operand.vmem [shape: f32[256,196], index: 3, kind: output, shape index: {}]  }
   0x1   :  { %v51_v0 = vld [vmem:[%s6813_s0 + $0x10] sm:$0xff]  ;;  %v49_v1 = vld [vmem:[%s6813_s0] sm:$0xff]  ;;  %17 = vst.msk [vmem:[#allocation2 + $0x10] sm:$0xff] %vm15_vm0, %v4827_v2  ;;  %16 = vst.msk [vmem:[#allocation2] sm:$0xff] %vm15_vm0, %v4827_v2  ;;  %s4830_s13 = smov 30   ;;  %vm226_vm2 = vcmask 1047920  }
   0x2   :  { %18 = vst.msk [vmem:[#allocation2 + $0x20] sm:$0xff] %vm15_vm0, %v4827_v2  ;;  %19 = vst.msk [vmem:[#allocation2 + $0x30] sm:$0xff] %vm15_vm0, %v4827_v2  ;;  %117 = vrot.lane.b32.xlu1 %v51_v0, %s4828_s16  ;;  %113 = vrot.lane.b32.xlu0 %v49_v1, %s4828_s16  ;;  %v52_v3 = vld [vmem:[%s6813_s0 + $0x18] sm:$0xff]  ;;  %v50_v4 = vld [vmem:[%s6813_s0 + $0x8] sm:$0xff]  ;;  %v392_v10 = vshrl.u32 %v391_v9, 7  ;;  %vm177_vm3 = vcmask 375808  }
   0x3   :  { %20 = vst.msk [vmem:[#allocation2 + $0x40] sm:$0xff] %vm15_vm0, %v4827_v2  ;;  %21 = vst.msk [vmem:[#allocation2 + $0x50] sm:$0xff] %vm15_vm0, %v4827_v2  ;;  %v54_v5 = vld [vmem:[%s6813_s0 + $0x28] sm:$0xff]  ;;  %v53_v6 = vld [vmem:[%s6813_s0 + $0x20] sm:$0xff]  ;;  %vm228_vm4 = vcmask 818176   ;;  %vm340_vm5 = vcmask 376064  }
   0x4   :  { %22 = vst.msk [vmem:[#allocation2 + $0x60] sm:$0xff] %vm15_vm0, %v4827_v2  ;;  %23 = vst.msk [vmem:[#allocation2 + $0x70] sm:$0xff] %vm15_vm0, %v4827_v2  ;;  %v56_v7 = vld [vmem:[%s6813_s0 + $0x38] sm:$0xff]  ;;  %v55_v8 = vld [vmem:[%s6813_s0 + $0x30] sm:$0xff]  ;;  %v4942_v13 = vsub.s32 1, %v392_v10  ;;  %v4944_v14 = vsub.s32 0, %v392_v10 }
   0x5   :  { %24 = vst.msk [vmem:[#allocation2 + $0x80] sm:$0xff] %vm15_vm0, %v4827_v2  ;;  %25 = vst.msk [vmem:[#allocation2 + $0x90] sm:$0xff] %vm15_vm0, %v4827_v2  ;;  %v58_v11 = vld [vmem:[%s6813_s0 + $0x48] sm:$0xff]  ;;  %v57_v12 = vld [vmem:[%s6813_s0 + $0x40] sm:$0xff]  ;;  %vm454_vm6 = vcmask 244736   ;;  %vm1017_vm7 = vcmask 252928  }
   0x6   :  { %26 = vst.msk [vmem:[#allocation2 + $0xa0] sm:$0xff] %vm15_vm0, %v4827_v2  ;;  %27 = vst.msk [vmem:[#allocation2 + $0xb0] sm:$0xff] %vm15_vm0, %v4827_v2  ;;  %119 = vrot.lane.b32.xlu1 %v52_v3, %s4828_s16  ;;  %115 = vrot.lane.b32.xlu0 %v50_v4, %s4828_s16  ;;  %v60_v15 = vld [vmem:[%s6813_s0 + $0x58] sm:$0xff]  ;;  %v59_v16 = vld [vmem:[%s6813_s0 + $0x50] sm:$0xff]  ;;  %s4834_s10 = smov 17   ;;  %vm403_vm8 = vcmask 130048  }
   0x7   :  { %28 = vst.msk [vmem:[#allocation2 + $0xc0] sm:$0xff] %vm15_vm0, %v4827_v2  ;;  %29 = vst.msk [vmem:[#allocation2 + $0xd0] sm:$0xff] %vm15_vm0, %v4827_v2  ;;  %v4196_v17 = vld [vmem:[%s6814_s1 + $0x1] ss:$8 sm:$0x3]  ;;  %v64_v22 = vld [vmem:[%s6813_s0 + $0x78] sm:$0xff] }
   0x8   :  { %30 = vst.msk [vmem:[#allocation2 + $0xe0] sm:$0xff] %vm15_vm0, %v4827_v2  ;;  %31 = vst.msk [vmem:[#allocation2 + $0xf0] sm:$0xff] %vm15_vm0, %v4827_v2  ;;  %v449_v18 = vrot.slane %v4196_v17, %v4942_v13  ;;  %v445_v19 = vrot.slane %v4196_v17, %v4944_v14  ;;  %v62_v20 = vld [vmem:[%s6813_s0 + $0x68] sm:$0xff]  ;;  %v61_v21 = vld [vmem:[%s6813_s0 + $0x60] sm:$0xff]  ;;  %vm586_vm9 = vcmask 932864   ;;  %vm966_vm10 = vcmask 138240  }
   0x9   :  { %34 = vst.msk [vmem:[#allocation2 + $0x18] sm:$0xff] %vm32_vm1, %v4827_v2  ;;  %33 = vst.msk [vmem:[#allocation2 + $0x8] sm:$0xff] %vm32_vm1, %v4827_v2  ;;  %v63_v23 = vld [vmem:[%s6813_s0 + $0x70] sm:$0xff]  ;;  %v66_v24 = vld [vmem:[%s6813_s0 + $0x88] sm:$0xff]  ;;  %s4837_s14 = smov 111   ;;  %vm757_vm11 = vcmask 556032  }
   0xa   :  { %35 = vst.msk [vmem:[#allocation2 + $0x28] sm:$0xff] %vm32_vm1, %v4827_v2  ;;  %36 = vst.msk [vmem:[#allocation2 + $0x38] sm:$0xff] %vm32_vm1, %v4827_v2  ;;  %294 = vrot.lane.b32.xlu1 %v52_v3, %s4829_s21  ;;  %292 = vrot.lane.b32.xlu0 %v50_v4, %s4829_s21  ;;  %v65_v25 = vld [vmem:[%s6813_s0 + $0x80] sm:$0xff]  ;;  %v68_v26 = vld [vmem:[%s6813_s0 + $0x98] sm:$0xff]  ;;  %vm1527_vm12 = vcmask 146432   ;;  %vm731_vm13 = vcmask 916480  }
   0xb   :  { %37 = vst.msk [vmem:[#allocation2 + $0x48] sm:$0xff] %vm32_vm1, %v4827_v2  ;;  %38 = vst.msk [vmem:[#allocation2 + $0x58] sm:$0xff] %vm32_vm1, %v4827_v2  ;;  %v67_v27 = vld [vmem:[%s6813_s0 + $0x90] sm:$0xff]  ;;  %v70_v28 = vld [vmem:[%s6813_s0 + $0xa8] sm:$0xff]  ;;  %s4838_s20 = smov 110   ;;  %s4839_s22 = smov 98  }
   0xc   :  { %39 = vst.msk [vmem:[#allocation2 + $0x68] sm:$0xff] %vm32_vm1, %v4827_v2  ;;  %40 = vst.msk [vmem:[#allocation2 + $0x78] sm:$0xff] %vm32_vm1, %v4827_v2  ;;  %v69_v29 = vld [vmem:[%s6813_s0 + $0xa0] sm:$0xff]  ;;  %v72_v30 = vld [vmem:[%s6813_s0 + $0xb8] sm:$0xff]  ;;  %vm1293_vm14 = vcmask 908288   ;;  %s4840_s23 = smov 97  }
   0xd   :  { %41 = vst.msk [vmem:[#allocation2 + $0x88] sm:$0xff] %vm32_vm1, %v4827_v2  ;;  %42 = vst.msk [vmem:[#allocation2 + $0x98] sm:$0xff] %vm32_vm1, %v4827_v2  ;;  %v71_v31 = vld [vmem:[%s6813_s0 + $0xb0] sm:$0xff]  ;;  %v74_v32 = vld [vmem:[%s6813_s0 + $0xc8] sm:$0xff]  ;;  %s4841_s24 = smov 96   ;;  %vm1627_vm15 = vcmask 900096  }
   0xe   :  { %43 = vst.msk [vmem:[#allocation2 + $0xa8] sm:$0xff] %vm32_vm1, %v4827_v2  ;;  %44 = vst.msk [vmem:[#allocation2 + $0xb8] sm:$0xff] %vm32_vm1, %v4827_v2  ;;  %123 = vrot.lane.b32.xlu1 %v54_v5, %s4828_s16  ;;  %121 = vrot.lane.b32.xlu0 %v53_v6, %s4828_s16  ;;  %v73_v33 = vld [vmem:[%s6813_s0 + $0xc0] sm:$0xff]  ;;  %v76_v34 = vld [vmem:[%s6813_s0 + $0xd8] sm:$0xff]  ;;  %vm805_vm0 = vcmask 801792   ;;  %s4844_s15 = smov 82  }
   0xf   :  { %45 = vst.msk [vmem:[#allocation2 + $0xc8] sm:$0xff] %vm32_vm1, %v4827_v2  ;;  %46 = vst.msk [vmem:[#allocation2 + $0xd8] sm:$0xff] %vm32_vm1, %v4827_v2  ;;  %v75_v35 = vld [vmem:[%s6813_s0 + $0xd0] sm:$0xff]  ;;  %v78_v36 = vld [vmem:[%s6813_s0 + $0xe8] sm:$0xff] }
  0x10   :  { %47 = vst.msk [vmem:[#allocation2 + $0xe8] sm:$0xff] %vm32_vm1, %v4827_v2  ;;  %48 = vst.msk [vmem:[#allocation2 + $0xf8] sm:$0xff] %vm32_vm1, %v4827_v2  ;;  %v77_v37 = vld [vmem:[%s6813_s0 + $0xe0] sm:$0xff]  ;;  %v80_v38 = vld [vmem:[%s6813_s0 + $0xf8] sm:$0xff]  ;;  %vm1366_vm1 = vcmask 793600  }
  0x11   :  { %v79_v39 = vld [vmem:[%s6813_s0 + $0xf0] sm:$0xff]  ;;  %v4198_v40 = vld [vmem:[%s6814_s1 + $0x3] ss:$8 sm:$0x3]  ;;  %s4831_s0 = smov 31  }
  0x12   :  { %127 = vrot.lane.b32.xlu1 %v56_v7, %s4828_s16  ;;  %125 = vrot.lane.b32.xlu0 %v55_v8, %s4828_s16  ;;  %v1012_v41 = vrot.slane %v4198_v40, %v4942_v13  ;;  %v1008_v42 = vrot.slane %v4198_v40, %v4944_v14  ;;  %v389_v43 = vld [vmem:[%s6814_s1] ss:$8 sm:$0x3] }
  0x13   :  { %v398_v44 = vrot.slane %v389_v43, %v4942_v13  ;;  %v394_v45 = vrot.slane %v389_v43, %v4944_v14 }
  0x16   :  { %298 = vrot.lane.b32.xlu1 %v56_v7, %s4829_s21  ;;  %296 = vrot.lane.b32.xlu0 %v54_v5, %s4829_s21 }
  0x1a   :  { %131 = vrot.lane.b32.xlu1 %v58_v11, %s4828_s16  ;;  %129 = vrot.lane.b32.xlu0 %v57_v12, %s4828_s16 }
  0x1e   :  { %135 = vrot.lane.b32.xlu1 %v60_v15, %s4828_s16  ;;  %133 = vrot.lane.b32.xlu0 %v59_v16, %s4828_s16 }
  0x22   :  { %452 = vrot.lane.b32.xlu1 %v449_v18, %s4830_s13  ;;  %450 = vrot.lane.b32.xlu0 %v445_v19, %s4830_s13  ;;  %s4836_s13 = smov 112  }
  0x26   :  { %302 = vrot.lane.b32.xlu1 %v60_v15, %s4829_s21  ;;  %300 = vrot.lane.b32.xlu0 %v58_v11, %s4829_s21 }
  0x2a   :  { %139 = vrot.lane.b32.xlu1 %v62_v20, %s4828_s16  ;;  %137 = vrot.lane.b32.xlu0 %v61_v21, %s4828_s16 }
  0x2e   :  { %143 = vrot.lane.b32.xlu1 %v64_v22, %s4828_s16  ;;  %141 = vrot.lane.b32.xlu0 %v63_v23, %s4828_s16 }
  0x32   :  { %306 = vrot.lane.b32.xlu1 %v64_v22, %s4829_s21  ;;  %304 = vrot.lane.b32.xlu0 %v62_v20, %s4829_s21 }
  0x36   :  { %147 = vrot.lane.b32.xlu1 %v66_v24, %s4828_s16  ;;  %145 = vrot.lane.b32.xlu0 %v65_v25, %s4828_s16 }
  0x3a   :  { %151 = vrot.lane.b32.xlu1 %v68_v26, %s4828_s16  ;;  %149 = vrot.lane.b32.xlu0 %v67_v27, %s4828_s16 }
  0x3e   :  { %310 = vrot.lane.b32.xlu1 %v68_v26, %s4829_s21  ;;  %308 = vrot.lane.b32.xlu0 %v66_v24, %s4829_s21 }
  0x42   :  { %155 = vrot.lane.b32.xlu1 %v70_v28, %s4828_s16  ;;  %153 = vrot.lane.b32.xlu0 %v69_v29, %s4828_s16 }
  0x46   :  { %159 = vrot.lane.b32.xlu1 %v72_v30, %s4828_s16  ;;  %157 = vrot.lane.b32.xlu0 %v71_v31, %s4828_s16 }
  0x4a   :  { %314 = vrot.lane.b32.xlu1 %v72_v30, %s4829_s21  ;;  %312 = vrot.lane.b32.xlu0 %v70_v28, %s4829_s21 }
  0x4e   :  { %163 = vrot.lane.b32.xlu1 %v74_v32, %s4828_s16  ;;  %161 = vrot.lane.b32.xlu0 %v73_v33, %s4828_s16 }
  0x52   :  { %167 = vrot.lane.b32.xlu1 %v76_v34, %s4828_s16  ;;  %165 = vrot.lane.b32.xlu0 %v75_v35, %s4828_s16 }
  0x56   :  { %318 = vrot.lane.b32.xlu1 %v76_v34, %s4829_s21  ;;  %316 = vrot.lane.b32.xlu0 %v74_v32, %s4829_s21 }
  0x5a   :  { %171 = vrot.lane.b32.xlu1 %v78_v36, %s4828_s16  ;;  %169 = vrot.lane.b32.xlu0 %v77_v37, %s4828_s16 }
  0x5e   :  { %175 = vrot.lane.b32.xlu1 %v80_v38, %s4828_s16  ;;  %173 = vrot.lane.b32.xlu0 %v79_v39, %s4828_s16  ;;  %s4832_s16 = smov 16  }
  0x62   :  { %322 = vrot.lane.b32.xlu1 %v80_v38, %s4829_s21  ;;  %320 = vrot.lane.b32.xlu0 %v78_v36, %s4829_s21  ;;  %s4833_s21 = smov 114  }
  0x66   :  { %1015 = vrot.lane.b32.xlu1 %v1012_v41, %s4831_s0  ;;  %1013 = vrot.lane.b32.xlu0 %v1008_v42, %s4831_s0 }
  0x6a   :  { %401 = vrot.lane.b32.xlu1 %v398_v44, %s4832_s16  ;;  %399 = vrot.lane.b32.xlu0 %v394_v45, %s4832_s16 }
  0x74   :  { %v118_v46 = vpop.permute.xlu1 %117  ;;  %v114_v47 = vpop.permute.xlu0 %113 }
  0x75   :  { %230 = vst.msk [vmem:[#allocation2 + $0x10] sm:$0xff] %vm226_vm2, %v118_v46  ;;  %227 = vst.msk [vmem:[#allocation2] sm:$0xff] %vm226_vm2, %v114_v47 }
  0x78   :  { %v120_v48 = vpop.permute.xlu1 %119  ;;  %v116_v49 = vpop.permute.xlu0 %115 }
  0x79   :  { %v179_v50 = vsel %vm177_vm3, %v118_v46, %v120_v48  ;;  %v178_v51 = vsel %vm177_vm3, %v114_v47, %v116_v49 }
  0x7a   :  { %231 = vst.msk [vmem:[#allocation2 + $0x18] sm:$0xff] %vm228_vm4, %v179_v50  ;;  %229 = vst.msk [vmem:[#allocation2 + $0x8] sm:$0xff] %vm228_vm4, %v178_v51 }
  0x7c   :  { %v295_v52 = vpop.permute.xlu1 %294  ;;  %v293_v53 = vpop.permute.xlu0 %292 }
  0x7d   :  { %342 = vst.msk [vmem:[#allocation2 + $0x10] sm:$0xff] %vm340_vm5, %v295_v52  ;;  %341 = vst.msk [vmem:[#allocation2] sm:$0xff] %vm340_vm5, %v293_v53 }
  0x80   :  { %v124_v54 = vpop.permute.xlu1 %123  ;;  %v122_v55 = vpop.permute.xlu0 %121 }
  0x81   :  { %v180_v56 = vsel %vm177_vm3, %v122_v55, %v124_v54  ;;  %232 = vst.msk [vmem:[#allocation2 + $0x20] sm:$0xff] %vm226_vm2, %v122_v55  ;;  %v5089_v8 = vld [vmem:[#allocation2 + $0x8] sm:$0xff]  ;;  %v5104_v17 = vld [vmem:[#allocation2 + $0x18] sm:$0xff] }
  0x82   :  { %233 = vst.msk [vmem:[#allocation2 + $0x28] sm:$0xff] %vm228_vm4, %v180_v56 }
  0x84   :  { %v128_v57 = vpop.permute.xlu1 %127  ;;  %v126_v58 = vpop.permute.xlu0 %125  ;;  %v5085_v6 = vld [vmem:[#allocation2] sm:$0xff]  ;;  %v5098_v15 = vld [vmem:[#allocation2 + $0x10] sm:$0xff] }
  0x85   :  { %v181_v59 = vsel %vm177_vm3, %v126_v58, %v128_v57  ;;  %234 = vst.msk [vmem:[#allocation2 + $0x30] sm:$0xff] %vm226_vm2, %v126_v58 }
  0x86   :  { %235 = vst.msk [vmem:[#allocation2 + $0x38] sm:$0xff] %vm228_vm4, %v181_v59 }
  0x88   :  { %v299_v60 = vpop.permute.xlu1 %298  ;;  %v297_v61 = vpop.permute.xlu0 %296 }
  0x89   :  { %344 = vst.msk [vmem:[#allocation2 + $0x30] sm:$0xff] %vm340_vm5, %v299_v60  ;;  %343 = vst.msk [vmem:[#allocation2 + $0x20] sm:$0xff] %vm340_vm5, %v297_v61  ;;  %v5116_v24 = vld [vmem:[#allocation2 + $0x28] sm:$0xff] }
  0x8c   :  { %v132_v62 = vpop.permute.xlu1 %131  ;;  %v130_v63 = vpop.permute.xlu0 %129 }
  0x8d   :  { %v182_v0 = vsel %vm177_vm3, %v130_v63, %v132_v62  ;;  %236 = vst.msk [vmem:[#allocation2 + $0x40] sm:$0xff] %vm226_vm2, %v130_v63  ;;  %v5129_v31 = vld [vmem:[#allocation2 + $0x38] sm:$0xff] }
  0x8e   :  { %237 = vst.msk [vmem:[#allocation2 + $0x48] sm:$0xff] %vm228_vm4, %v182_v0 }
  0x90   :  { %v136_v1 = vpop.permute.xlu1 %135  ;;  %v134_v2 = vpop.permute.xlu0 %133  ;;  %v5110_v21 = vld [vmem:[#allocation2 + $0x20] sm:$0xff]  ;;  %v5121_v26 = vld [vmem:[#allocation2 + $0x30] sm:$0xff] }
  0x91   :  { %v183_v3 = vsel %vm177_vm3, %v134_v2, %v136_v1  ;;  %238 = vst.msk [vmem:[#allocation2 + $0x50] sm:$0xff] %vm226_vm2, %v134_v2 }
  0x92   :  { %239 = vst.msk [vmem:[#allocation2 + $0x58] sm:$0xff] %vm228_vm4, %v183_v3 }
  0x94   :  { %v453_v4 = vpop.permute.xlu1 %452  ;;  %v5083_v5 = vpop.permute.xlu0 %450 }
  0x95   :  { %v458_v7 = vmul.f32 %v5083_v5, %v5085_v6  ;;  %v5092_v9 = vsel %vm454_vm6, %v5083_v5, %v453_v4  ;;  %v460_v16 = vmul.f32 %v5083_v5, %v5098_v15  ;;  %v462_v23 = vmul.f32 %v5083_v5, %v5110_v21  ;;  %v5137_v34 = vld [vmem:[#allocation2 + $0x48] sm:$0xff] }
  0x96   :  { %v459_v10 = vmul.f32 %v5092_v9, %v5089_v8  ;;  %v461_v18 = vmul.f32 %v5092_v9, %v5104_v17  ;;  %v463_v25 = vmul.f32 %v5092_v9, %v5116_v24  ;;  %v464_v30 = vmul.f32 %v5083_v5, %v5121_v26 }
  0x97   :  { %522 = vrot.lane.b32.xlu0 %v458_v7, %s4833_s21  ;;  %v465_v32 = vmul.f32 %v5092_v9, %v5129_v31  ;;  %v467_v38 = vmul.f32 %v5092_v9, %v5137_v34 }
  0x98   :  { %v303_v11 = vpop.permute.xlu1 %302  ;;  %524 = vrot.lane.b32.xlu1 %v459_v10, %s4833_s21  ;;  %v301_v12 = vpop.permute.xlu0 %300 }
  0x99   :  { %346 = vst.msk [vmem:[#allocation2 + $0x50] sm:$0xff] %vm340_vm5, %v303_v11  ;;  %345 = vst.msk [vmem:[#allocation2 + $0x40] sm:$0xff] %vm340_vm5, %v301_v12  ;;  %v5149_v40 = vld [vmem:[#allocation2 + $0x58] sm:$0xff] }
  0x9a   :  { %v469_v45 = vmul.f32 %v5092_v9, %v5149_v40 }
  0x9b   :  { %526 = vrot.lane.b32.xlu0 %v460_v16, %s4833_s21 }
  0x9c   :  { %v140_v19 = vpop.permute.xlu1 %139  ;;  %528 = vrot.lane.b32.xlu1 %v461_v18, %s4833_s21  ;;  %v138_v20 = vpop.permute.xlu0 %137 }
  0x9d   :  { %v184_v22 = vsel %vm177_vm3, %v138_v20, %v140_v19  ;;  %240 = vst.msk [vmem:[#allocation2 + $0x60] sm:$0xff] %vm226_vm2, %v138_v20 }
  0x9e   :  { %241 = vst.msk [vmem:[#allocation2 + $0x68] sm:$0xff] %vm228_vm4, %v184_v22 }
  0x9f   :  { %530 = vrot.lane.b32.xlu0 %v462_v23, %s4833_s21 }
  0xa0   :  { %v144_v27 = vpop.permute.xlu1 %143  ;;  %532 = vrot.lane.b32.xlu1 %v463_v25, %s4833_s21  ;;  %v142_v28 = vpop.permute.xlu0 %141  ;;  %v5134_v33 = vld [vmem:[#allocation2 + $0x40] sm:$0xff]  ;;  %v5146_v39 = vld [vmem:[#allocation2 + $0x50] sm:$0xff] }
  0xa1   :  { %v185_v29 = vsel %vm177_vm3, %v142_v28, %v144_v27  ;;  %242 = vst.msk [vmem:[#allocation2 + $0x70] sm:$0xff] %vm226_vm2, %v142_v28  ;;  %v466_v37 = vmul.f32 %v5083_v5, %v5134_v33  ;;  %v468_v44 = vmul.f32 %v5083_v5, %v5146_v39 }
  0xa2   :  { %243 = vst.msk [vmem:[#allocation2 + $0x78] sm:$0xff] %vm228_vm4, %v185_v29 }
  0xa3   :  { %534 = vrot.lane.b32.xlu0 %v464_v30, %s4833_s21 }
  0xa4   :  { %v307_v35 = vpop.permute.xlu1 %306  ;;  %536 = vrot.lane.b32.xlu1 %v465_v32, %s4833_s21  ;;  %v305_v36 = vpop.permute.xlu0 %304 }
  0xa5   :  { %348 = vst.msk [vmem:[#allocation2 + $0x70] sm:$0xff] %vm340_vm5, %v307_v35  ;;  %347 = vst.msk [vmem:[#allocation2 + $0x60] sm:$0xff] %vm340_vm5, %v305_v36  ;;  %v5160_v46 = vld [vmem:[#allocation2 + $0x68] sm:$0xff] }
  0xa6   :  { %v471_v52 = vmul.f32 %v5092_v9, %v5160_v46 }
  0xa7   :  { %538 = vrot.lane.b32.xlu0 %v466_v37, %s4833_s21 }
  0xa8   :  { %v148_v41 = vpop.permute.xlu1 %147  ;;  %540 = vrot.lane.b32.xlu1 %v467_v38, %s4833_s21  ;;  %v146_v42 = vpop.permute.xlu0 %145 }
  0xa9   :  { %v186_v43 = vsel %vm177_vm3, %v146_v42, %v148_v41  ;;  %244 = vst.msk [vmem:[#allocation2 + $0x80] sm:$0xff] %vm226_vm2, %v146_v42  ;;  %v5175_v54 = vld [vmem:[#allocation2 + $0x78] sm:$0xff] }
  0xaa   :  { %245 = vst.msk [vmem:[#allocation2 + $0x88] sm:$0xff] %vm228_vm4, %v186_v43  ;;  %v473_v58 = vmul.f32 %v5092_v9, %v5175_v54 }
  0xab   :  { %542 = vrot.lane.b32.xlu0 %v468_v44, %s4833_s21 }
  0xac   :  { %v152_v47 = vpop.permute.xlu1 %151  ;;  %544 = vrot.lane.b32.xlu1 %v469_v45, %s4833_s21  ;;  %v150_v48 = vpop.permute.xlu0 %149  ;;  %v5163_v49 = vld [vmem:[#allocation2 + $0x60] sm:$0xff]  ;;  %v5172_v53 = vld [vmem:[#allocation2 + $0x70] sm:$0xff] }
  0xad   :  { %v187_v50 = vsel %vm177_vm3, %v150_v48, %v152_v47  ;;  %246 = vst.msk [vmem:[#allocation2 + $0x90] sm:$0xff] %vm226_vm2, %v150_v48  ;;  %v470_v51 = vmul.f32 %v5083_v5, %v5163_v49  ;;  %v472_v57 = vmul.f32 %v5083_v5, %v5172_v53 }
  0xae   :  { %247 = vst.msk [vmem:[#allocation2 + $0x98] sm:$0xff] %vm228_vm4, %v187_v50 }
  0xaf   :  { %546 = vrot.lane.b32.xlu0 %v470_v51, %s4833_s21 }
  0xb0   :  { %v311_v55 = vpop.permute.xlu1 %310  ;;  %548 = vrot.lane.b32.xlu1 %v471_v52, %s4833_s21  ;;  %v309_v56 = vpop.permute.xlu0 %308 }
  0xb1   :  { %350 = vst.msk [vmem:[#allocation2 + $0x90] sm:$0xff] %vm340_vm5, %v311_v55  ;;  %349 = vst.msk [vmem:[#allocation2 + $0x80] sm:$0xff] %vm340_vm5, %v309_v56  ;;  %v5185_v59 = vld [vmem:[#allocation2 + $0x88] sm:$0xff] }
  0xb2   :  { %v475_v63 = vmul.f32 %v5092_v9, %v5185_v59 }
  0xb3   :  { %550 = vrot.lane.b32.xlu0 %v472_v57, %s4833_s21 }
  0xb4   :  { %v156_v60 = vpop.permute.xlu1 %155  ;;  %552 = vrot.lane.b32.xlu1 %v473_v58, %s4833_s21  ;;  %v154_v61 = vpop.permute.xlu0 %153 }
  0xb5   :  { %v188_v62 = vsel %vm177_vm3, %v154_v61, %v156_v60  ;;  %248 = vst.msk [vmem:[#allocation2 + $0xa0] sm:$0xff] %vm226_vm2, %v154_v61  ;;  %v5193_v0 = vld [vmem:[#allocation2 + $0x98] sm:$0xff] }
  0xb6   :  { %249 = vst.msk [vmem:[#allocation2 + $0xa8] sm:$0xff] %vm228_vm4, %v188_v62  ;;  %v477_v10 = vmul.f32 %v5092_v9, %v5193_v0 }
  0xb8   :  { %v160_v1 = vpop.permute.xlu1 %159  ;;  %556 = vrot.lane.b32.xlu1 %v475_v63, %s4833_s21  ;;  %v158_v2 = vpop.permute.xlu0 %157  ;;  %v5196_v3 = vld [vmem:[#allocation2 + $0x80] sm:$0xff]  ;;  %v5205_v11 = vld [vmem:[#allocation2 + $0x90] sm:$0xff] }
  0xb9   :  { %v189_v4 = vsel %vm177_vm3, %v158_v2, %v160_v1  ;;  %250 = vst.msk [vmem:[#allocation2 + $0xb0] sm:$0xff] %vm226_vm2, %v158_v2  ;;  %v474_v7 = vmul.f32 %v5083_v5, %v5196_v3  ;;  %v476_v18 = vmul.f32 %v5083_v5, %v5205_v11 }
  0xba   :  { %251 = vst.msk [vmem:[#allocation2 + $0xb8] sm:$0xff] %vm228_vm4, %v189_v4 }
  0xbb   :  { %554 = vrot.lane.b32.xlu0 %v474_v7, %s4833_s21  ;;  %v4197_v7 = vld [vmem:[%s6814_s1 + $0x2] ss:$8 sm:$0x3] }
  0xbc   :  { %v315_v12 = vpop.permute.xlu1 %314  ;;  %560 = vrot.lane.b32.xlu1 %v477_v10, %s4833_s21  ;;  %v313_v16 = vpop.permute.xlu0 %312 }
  0xbd   :  { %352 = vst.msk [vmem:[#allocation2 + $0xb0] sm:$0xff] %vm340_vm5, %v315_v12  ;;  %351 = vst.msk [vmem:[#allocation2 + $0xa0] sm:$0xff] %vm340_vm5, %v313_v16  ;;  %v5213_v19 = vld [vmem:[#allocation2 + $0xa8] sm:$0xff] }
  0xbe   :  { %v479_v20 = vmul.f32 %v5092_v9, %v5213_v19 }
  0xbf   :  { %558 = vrot.lane.b32.xlu0 %v476_v18, %s4833_s21 }
  0xc0   :  { %v164_v22 = vpop.permute.xlu1 %163  ;;  %564 = vrot.lane.b32.xlu1 %v479_v20, %s4833_s21  ;;  %v162_v23 = vpop.permute.xlu0 %161  ;;  %v961_v20 = vrot.slane %v4197_v7, %v4942_v13 }
  0xc1   :  { %v190_v25 = vsel %vm177_vm3, %v162_v23, %v164_v22  ;;  %252 = vst.msk [vmem:[#allocation2 + $0xc0] sm:$0xff] %vm226_vm2, %v162_v23  ;;  %v5221_v27 = vld [vmem:[#allocation2 + $0xb8] sm:$0xff] }
  0xc2   :  { %253 = vst.msk [vmem:[#allocation2 + $0xc8] sm:$0xff] %vm228_vm4, %v190_v25  ;;  %v481_v28 = vmul.f32 %v5092_v9, %v5221_v27 }
  0xc4   :  { %v168_v29 = vpop.permute.xlu1 %167  ;;  %568 = vrot.lane.b32.xlu1 %v481_v28, %s4833_s21  ;;  %v166_v30 = vpop.permute.xlu0 %165  ;;  %v5227_v32 = vld [vmem:[#allocation2 + $0xa0] sm:$0xff]  ;;  %v5234_v37 = vld [vmem:[#allocation2 + $0xb0] sm:$0xff] }
  0xc5   :  { %v191_v35 = vsel %vm177_vm3, %v166_v30, %v168_v29  ;;  %254 = vst.msk [vmem:[#allocation2 + $0xd0] sm:$0xff] %vm226_vm2, %v166_v30  ;;  %v478_v36 = vmul.f32 %v5083_v5, %v5227_v32  ;;  %v480_v42 = vmul.f32 %v5083_v5, %v5234_v37  ;;  %v957_v29 = vrot.slane %v4197_v7, %v4944_v14 }
  0xc6   :  { %255 = vst.msk [vmem:[#allocation2 + $0xd8] sm:$0xff] %vm228_vm4, %v191_v35 }
  0xc7   :  { %562 = vrot.lane.b32.xlu0 %v478_v36, %s4833_s21 }
  0xc8   :  { %v319_v38 = vpop.permute.xlu1 %318  ;;  %v317_v41 = vpop.permute.xlu0 %316 }
  0xc9   :  { %354 = vst.msk [vmem:[#allocation2 + $0xd0] sm:$0xff] %vm340_vm5, %v319_v38  ;;  %353 = vst.msk [vmem:[#allocation2 + $0xc0] sm:$0xff] %vm340_vm5, %v317_v41  ;;  %v5241_v43 = vld [vmem:[#allocation2 + $0xc8] sm:$0xff] }
  0xca   :  { %v483_v44 = vmul.f32 %v5092_v9, %v5241_v43 }
  0xcb   :  { %566 = vrot.lane.b32.xlu0 %v480_v42, %s4833_s21 }
  0xcc   :  { %v172_v45 = vpop.permute.xlu1 %171  ;;  %572 = vrot.lane.b32.xlu1 %v483_v44, %s4833_s21  ;;  %v170_v47 = vpop.permute.xlu0 %169 }
  0xcd   :  { %v192_v48 = vsel %vm177_vm3, %v170_v47, %v172_v45  ;;  %256 = vst.msk [vmem:[#allocation2 + $0xe0] sm:$0xff] %vm226_vm2, %v170_v47  ;;  %v5249_v50 = vld [vmem:[#allocation2 + $0xd8] sm:$0xff] }
  0xce   :  { %257 = vst.msk [vmem:[#allocation2 + $0xe8] sm:$0xff] %vm228_vm4, %v192_v48  ;;  %v485_v51 = vmul.f32 %v5092_v9, %v5249_v50 }
  0xd0   :  { %v176_v52 = vpop.permute.xlu1 %175  ;;  %576 = vrot.lane.b32.xlu1 %v485_v51, %s4833_s21  ;;  %v174_v55 = vpop.permute.xlu0 %173  ;;  %v5255_v56 = vld [vmem:[#allocation2 + $0xc0] sm:$0xff]  ;;  %v5262_v60 = vld [vmem:[#allocation2 + $0xd0] sm:$0xff] }
  0xd1   :  { %v193_v57 = vsel %vm177_vm3, %v174_v55, %v176_v52  ;;  %258 = vst.msk [vmem:[#allocation2 + $0xf0] sm:$0xff] %vm226_vm2, %v174_v55  ;;  %v482_v58 = vmul.f32 %v5083_v5, %v5255_v56  ;;  %v484_v63 = vmul.f32 %v5083_v5, %v5262_v60  ;;  %vm1700_vm2 = vcmask 785408  }
  0xd2   :  { %259 = vst.msk [vmem:[#allocation2 + $0xf8] sm:$0xff] %vm228_vm4, %v193_v57  ;;  %vm878_vm3 = vcmask 687104   ;;  %vm1439_vm4 = vcmask 678912  }
  0xd3   :  { %570 = vrot.lane.b32.xlu0 %v482_v58, %s4833_s21 }
  0xd4   :  { %v323_v61 = vpop.permute.xlu1 %322  ;;  %v321_v62 = vpop.permute.xlu0 %320 }
  0xd5   :  { %356 = vst.msk [vmem:[#allocation2 + $0xf0] sm:$0xff] %vm340_vm5, %v323_v61  ;;  %355 = vst.msk [vmem:[#allocation2 + $0xe0] sm:$0xff] %vm340_vm5, %v321_v62  ;;  %v5269_v1 = vld [vmem:[#allocation2 + $0xe8] sm:$0xff]  ;;  %vm1773_vm5 = vcmask 670720  }
  0xd6   :  { %v487_v2 = vmul.f32 %v5092_v9, %v5269_v1 }
  0xd7   :  { %574 = vrot.lane.b32.xlu0 %v484_v63, %s4833_s21 }
  0xd8   :  { %580 = vrot.lane.b32.xlu1 %v487_v2, %s4833_s21  ;;  %v1016_v12 = vpop.permute.xlu1 %1015  ;;  %v5282_v16 = vpop.permute.xlu0 %1013 }
  0xd9   :  { %v5275_v4 = vld [vmem:[#allocation2 + $0xf8] sm:$0xff]  ;;  %v5294_v25 = vsel %vm1017_vm7, %v5282_v16, %v1016_v12  ;;  %v1021_v35 = vmul.f32 %v5282_v16, %v5085_v6  ;;  %v1023_v36 = vmul.f32 %v5282_v16, %v5098_v15  ;;  %v1025_v41 = vmul.f32 %v5282_v16, %v5110_v21 }
  0xda   :  { %v489_v10 = vmul.f32 %v5092_v9, %v5275_v4  ;;  %v1022_v28 = vmul.f32 %v5294_v25, %v5089_v8  ;;  %v1024_v30 = vmul.f32 %v5294_v25, %v5104_v17  ;;  %v1028_v38 = vmul.f32 %v5294_v25, %v5129_v31 }
  0xdb   :  { %v1030_v42 = vmul.f32 %v5294_v25, %v5137_v34  ;;  %v1027_v44 = vmul.f32 %v5282_v16, %v5121_v26  ;;  %v1032_v45 = vmul.f32 %v5294_v25, %v5149_v40  ;;  %v1029_v47 = vmul.f32 %v5282_v16, %v5134_v33 }
  0xdc   :  { %584 = vrot.lane.b32.xlu1 %v489_v10, %s4833_s21  ;;  %v5285_v18 = vld [vmem:[#allocation2 + $0xe0] sm:$0xff]  ;;  %v5290_v23 = vld [vmem:[#allocation2 + $0xf0] sm:$0xff]  ;;  %v1034_v48 = vmul.f32 %v5294_v25, %v5160_v46  ;;  %v1031_v51 = vmul.f32 %v5282_v16, %v5146_v39  ;;  %v1036_v52 = vmul.f32 %v5294_v25, %v5175_v54  ;;  %v1033_v55 = vmul.f32 %v5282_v16, %v5163_v49  ;;  %v5348_v58 = vpop.permute.xlu0 %399  ;;  %v402_v62 = vpop.permute.xlu1 %401 }
  0xdd   :  { %v486_v22 = vmul.f32 %v5083_v5, %v5285_v18  ;;  %v488_v9 = vmul.f32 %v5083_v5, %v5290_v23  ;;  %v1026_v5 = vmul.f32 %v5294_v25, %v5116_v24  ;;  %v1038_v57 = vmul.f32 %v5294_v25, %v5185_v59 }
  0xde   :  { %v1035_v61 = vmul.f32 %v5282_v16, %v5172_v53  ;;  %v1040_v63 = vmul.f32 %v5294_v25, %v5193_v0  ;;  %v1037_v7 = vmul.f32 %v5282_v16, %v5196_v3  ;;  %v1042_v12 = vmul.f32 %v5294_v25, %v5213_v19 }
  0xdf   :  { %578 = vrot.lane.b32.xlu0 %v486_v22, %s4833_s21  ;;  %v1039_v22 = vmul.f32 %v5282_v16, %v5205_v11 }
  0xe0   :  { %964 = vrot.lane.b32.xlu1 %v961_v20, %s4834_s10 }
  0xe3   :  { %582 = vrot.lane.b32.xlu0 %v488_v9, %s4833_s21 }
  0xe4   :  { %1087 = vrot.lane.b32.xlu1 %v1022_v28, %s4833_s21  ;;  %v1044_v28 = vmul.f32 %v5294_v25, %v5221_v27 }
  0xe7   :  { %962 = vrot.lane.b32.xlu0 %v957_v29, %s4834_s10 }
  0xe8   :  { %1091 = vrot.lane.b32.xlu1 %v1024_v30, %s4833_s21  ;;  %v1041_v30 = vmul.f32 %v5282_v16, %v5227_v32 }
  0xeb   :  { %1085 = vrot.lane.b32.xlu0 %v1021_v35, %s4833_s21 }
  0xec   :  { %1095 = vrot.lane.b32.xlu1 %v1026_v5, %s4833_s21  ;;  %v1046_v5 = vmul.f32 %v5294_v25, %v5241_v43 }
  0xef   :  { %1089 = vrot.lane.b32.xlu0 %v1023_v36, %s4833_s21 }
  0xf0   :  { %1099 = vrot.lane.b32.xlu1 %v1028_v38, %s4833_s21  ;;  %v1043_v38 = vmul.f32 %v5282_v16, %v5234_v37 }
  0xf3   :  { %1093 = vrot.lane.b32.xlu0 %v1025_v41, %s4833_s21 }
  0xf4   :  { %1103 = vrot.lane.b32.xlu1 %v1030_v42, %s4833_s21  ;;  %v1048_v42 = vmul.f32 %v5294_v25, %v5249_v50 }
  0xf7   :  { %1097 = vrot.lane.b32.xlu0 %v1027_v44, %s4833_s21 }
  0xf8   :  { %1107 = vrot.lane.b32.xlu1 %v1032_v45, %s4833_s21  ;;  %v1045_v45 = vmul.f32 %v5282_v16, %v5255_v56 }
  0xfb   :  { %1101 = vrot.lane.b32.xlu0 %v1029_v47, %s4833_s21 }
  0xfc   :  { %1111 = vrot.lane.b32.xlu1 %v1034_v48, %s4833_s21  ;;  %v1050_v48 = vmul.f32 %v5294_v25, %v5269_v1 }
  0xff   :  { %1105 = vrot.lane.b32.xlu0 %v1031_v51, %s4833_s21  ;;  %v5395_v51 = vsel %vm403_vm8, %v5348_v58, %v402_v62 }
 0x100   :  { %1115 = vrot.lane.b32.xlu1 %v1036_v52, %s4833_s21 }
 0x103   :  { %1109 = vrot.lane.b32.xlu0 %v1033_v55, %s4833_s21  ;;  %v1047_v55 = vmul.f32 %v5282_v16, %v5262_v60 }
 0x104   :  { %1119 = vrot.lane.b32.xlu1 %v1038_v57, %s4833_s21  ;;  %v4199_v57 = vld [vmem:[%s6814_s1 + $0x4] ss:$8 sm:$0x3]  ;;  %s4835_s1 = smov 18  }
 0x105   :  { %v1522_v62 = vrot.slane %v4199_v57, %v4942_v13  ;;  %v1051_v13 = vmul.f32 %v5282_v16, %v5290_v23 }
 0x107   :  { %1113 = vrot.lane.b32.xlu0 %v1035_v61, %s4833_s21 }
 0x108   :  { %1123 = vrot.lane.b32.xlu1 %v1040_v63, %s4833_s21  ;;  %v1052_v63 = vmul.f32 %v5294_v25, %v5275_v4 }
 0x109   :  { %v523_v2 = vpop.permute.xlu0 %522 }
 0x10a   :  { %v525_v10 = vpop.permute.xlu1 %524 }
 0x10b   :  { %1117 = vrot.lane.b32.xlu0 %v1037_v7, %s4833_s21  ;;  %v410_v7 = vmul.f32 %v5395_v51, %v5104_v17 }
 0x10c   :  { %1127 = vrot.lane.b32.xlu1 %v1042_v12, %s4833_s21  ;;  %v1049_v12 = vmul.f32 %v5282_v16, %v5285_v18 }
 0x10d   :  { %v527_v20 = vpop.permute.xlu0 %526 }
 0x10e   :  { %v529_v9 = vpop.permute.xlu1 %528 }
 0x10f   :  { %1121 = vrot.lane.b32.xlu0 %v1039_v22, %s4833_s21  ;;  %v408_v22 = vmul.f32 %v5395_v51, %v5089_v8 }
 0x110   :  { %1131 = vrot.lane.b32.xlu1 %v1044_v28, %s4833_s21  ;;  %v638_v28 = vadd.f32 %v529_v9, %v410_v7  ;;  %v409_v7 = vmul.f32 %v5348_v58, %v5098_v15 }
 0x111   :  { %v5368_v29 = vpop.permute.xlu0 %530  ;;  %v636_v25 = vadd.f32 %v525_v10, %v408_v22 }
 0x112   :  { %v5372_v35 = vpop.permute.xlu1 %532 }
 0x113   :  { %1125 = vrot.lane.b32.xlu0 %v1041_v30, %s4833_s21 }
 0x114   :  { %1135 = vrot.lane.b32.xlu1 %v1046_v5, %s4833_s21 }
 0x115   :  { %v535_v36 = vpop.permute.xlu0 %534 }
 0x116   :  { %v537_v41 = vpop.permute.xlu1 %536 }
 0x117   :  { %1129 = vrot.lane.b32.xlu0 %v1043_v38, %s4833_s21  ;;  %v414_v38 = vmul.f32 %v5395_v51, %v5129_v31 }
 0x118   :  { %1139 = vrot.lane.b32.xlu1 %v1048_v42, %s4833_s21  ;;  %v588_v42 = vsel %vm586_vm9, %v527_v20, %v529_v9  ;;  %v418_v20 = vmul.f32 %v5395_v51, %v5149_v40  ;;  %v407_v9 = vmul.f32 %v5348_v58, %v5085_v6 }
 0x119   :  { %v5384_v44 = vpop.permute.xlu0 %538  ;;  %v637_v22 = vadd.f32 %v588_v42, %v409_v7 }
 0x11a   :  { %v5388_v47 = vpop.permute.xlu1 %540 }
 0x11b   :  { %1133 = vrot.lane.b32.xlu0 %v1045_v45, %s4833_s21  ;;  %v5423_v45 = vpack.c.bf16 %v638_v28, %v636_v25  ;;  %v590_v25 = vsel %vm586_vm9, %v535_v36, %v537_v41  ;;  %v422_v36 = vmul.f32 %v5395_v51, %v5175_v54 }
 0x11c   :  { %1143 = vrot.lane.b32.xlu1 %v1050_v48, %s4833_s21  ;;  %v412_v48 = vmul.f32 %v5395_v51, %v5116_v24 }
 0x11d   :  { %v543_v52 = vpop.permute.xlu0 %542 }
 0x11e   :  { %v545_v61 = vpop.permute.xlu1 %544  ;;  %v640_v16 = vadd.f32 %v5372_v35, %v412_v48  ;;  %v589_v48 = vsel %vm586_vm9, %v5368_v29, %v5372_v35  ;;  %v420_v29 = vmul.f32 %v5395_v51, %v5160_v46 }
 0x11f   :  { %1137 = vrot.lane.b32.xlu0 %v1047_v55, %s4833_s21  ;;  %v642_v55 = vadd.f32 %v537_v41, %v414_v38 }
 0x120   :  { %1147 = vrot.lane.b32.xlu1 %v1052_v63, %s4833_s21 }
 0x121   :  { %v5415_v5 = vpop.permute.xlu0 %546  ;;  %v5440_v38 = vpack.c.bf16 %v642_v55, %v640_v16  ;;  %v411_v55 = vmul.f32 %v5348_v58, %v5110_v21 }
 0x122   :  { %v5413_v30 = vpop.permute.xlu1 %548 }
 0x123   :  { %1141 = vrot.lane.b32.xlu0 %v1049_v12, %s4833_s21  ;;  %v587_v12 = vsel %vm586_vm9, %v523_v2, %v525_v10  ;;  %v646_v2 = vadd.f32 %v545_v61, %v418_v20 }
 0x124   :  { %1525 = vrot.lane.b32.xlu1 %v1522_v62, %s4835_s1  ;;  %v1518_v62 = vrot.slane %v4199_v57, %v4944_v14  ;;  %v416_v14 = vmul.f32 %v5395_v51, %v5137_v34  ;;  %v635_v57 = vadd.f32 %v587_v12, %v407_v9  ;;  %v639_v9 = vadd.f32 %v589_v48, %v411_v55 }
 0x125   :  { %v551_v28 = vpop.permute.xlu0 %550  ;;  %v421_v55 = vmul.f32 %v5348_v58, %v5172_v53 }
 0x126   :  { %v553_v63 = vpop.permute.xlu1 %552  ;;  %v644_v42 = vadd.f32 %v5388_v47, %v416_v14  ;;  %v5454_v41 = vpack.c.bf16 %v637_v22, %v635_v57  ;;  %v417_v14 = vmul.f32 %v5348_v58, %v5146_v39  ;;  %v591_v22 = vsel %vm586_vm9, %v5384_v44, %v5388_v47 }
 0x127   :  { %1145 = vrot.lane.b32.xlu0 %v1051_v13, %s4833_s21  ;;  %v413_v13 = vmul.f32 %v5348_v58, %v5121_v26  ;;  %v650_v35 = vadd.f32 %v553_v63, %v422_v36  ;;  %v424_v44 = vmul.f32 %v5395_v51, %v5185_v59 }
 0x128   :  { %701 = vrot.lane.b32.xlu1 %v5423_v45, %s4836_s13  ;;  %v5459_v16 = vpack.c.bf16 %v646_v2, %v644_v42  ;;  %v415_v2 = vmul.f32 %v5348_v58, %v5134_v33 }
 0x129   :  { %v641_v7 = vadd.f32 %v590_v25, %v413_v13  ;;  %v594_v13 = vsel %vm586_vm9, %v551_v28, %v553_v63  ;;  %v593_v63 = vsel %vm586_vm9, %v5415_v5, %v5413_v30 }
 0x12a   :  { %v557_v10 = vpop.permute.xlu1 %556  ;;  %v643_v36 = vadd.f32 %v591_v22, %v415_v2 }
 0x12b   :  { %1523 = vrot.lane.b32.xlu0 %v1518_v62, %s4835_s1  ;;  %v592_v62 = vsel %vm586_vm9, %v543_v52, %v545_v61  ;;  %v648_v52 = vadd.f32 %v5413_v30, %v420_v29  ;;  %v426_v61 = vmul.f32 %v5395_v51, %v5193_v0  ;;  %v5475_v25 = vpack.c.bf16 %v641_v7, %v639_v9 }
 0x12c   :  { %705 = vrot.lane.b32.xlu1 %v5440_v38, %s4836_s13  ;;  %v645_v57 = vadd.f32 %v592_v62, %v417_v14  ;;  %v419_v7 = vmul.f32 %v5348_v58, %v5163_v49  ;;  %v652_v28 = vadd.f32 %v557_v10, %v424_v44  ;;  %v428_v9 = vmul.f32 %v5395_v51, %v5213_v19 }
 0x12d   :  { %v555_v12 = vpop.permute.xlu0 %554  ;;  %v5480_v48 = vpack.c.bf16 %v650_v35, %v648_v52  ;;  %v649_v35 = vadd.f32 %v594_v13, %v421_v55  ;;  %v430_v14 = vmul.f32 %v5395_v51, %v5221_v27  ;;  %v425_v30 = vmul.f32 %v5348_v58, %v5205_v11 }
 0x12e   :  { %v561_v20 = vpop.permute.xlu1 %560  ;;  %v5495_v62 = vpack.c.bf16 %v645_v57, %v643_v36  ;;  %v647_v2 = vadd.f32 %v593_v63, %v419_v7  ;;  %v595_v57 = vsel %vm586_vm9, %v555_v12, %v557_v10  ;;  %v427_v12 = vmul.f32 %v5348_v58, %v5227_v32 }
 0x12f   :  { %699 = vrot.lane.b32.xlu0 %v5454_v41, %s4836_s13  ;;  %v654_v47 = vadd.f32 %v561_v20, %v426_v61  ;;  %v429_v63 = vmul.f32 %v5348_v58, %v5234_v37 }
 0x130   :  { %709 = vrot.lane.b32.xlu1 %v5459_v16, %s4836_s13  ;;  %v5511_v13 = vpack.c.bf16 %v649_v35, %v647_v2  ;;  %v432_v2 = vmul.f32 %v5395_v51, %v5241_v43 }
 0x131   :  { %v559_v29 = vpop.permute.xlu0 %558  ;;  %v5501_v22 = vpack.c.bf16 %v654_v47, %v652_v28 }
 0x132   :  { %v565_v42 = vpop.permute.xlu1 %564  ;;  %v596_v52 = vsel %vm586_vm9, %v559_v29, %v561_v20  ;;  %v423_v20 = vmul.f32 %v5348_v58, %v5196_v3 }
 0x133   :  { %703 = vrot.lane.b32.xlu0 %v5475_v25, %s4836_s13  ;;  %v656_v5 = vadd.f32 %v565_v42, %v428_v9  ;;  %v653_v47 = vadd.f32 %v596_v52, %v425_v30  ;;  %v434_v30 = vmul.f32 %v5395_v51, %v5249_v50 }
 0x134   :  { %713 = vrot.lane.b32.xlu1 %v5480_v48, %s4836_s13  ;;  %v651_v29 = vadd.f32 %v595_v57, %v423_v20 }
 0x136   :  { %v569_v61 = vpop.permute.xlu1 %568  ;;  %v5522_v10 = vpack.c.bf16 %v653_v47, %v651_v29  ;;  %v433_v29 = vmul.f32 %v5348_v58, %v5262_v60 }
 0x137   :  { %v658_v44 = vadd.f32 %v569_v61, %v430_v14  ;;  %707 = vrot.lane.b32.xlu0 %v5495_v62, %s4836_s13 }
 0x138   :  { %717 = vrot.lane.b32.xlu1 %v5501_v22, %s4836_s13 }
 0x139   :  { %v5515_v36 = vpack.c.bf16 %v658_v44, %v656_v5  ;;  %v563_v55 = vpop.permute.xlu0 %562 }
 0x13a   :  { %v597_v7 = vsel %vm586_vm9, %v563_v55, %v565_v42  ;;  %v431_v55 = vmul.f32 %v5348_v58, %v5255_v56 }
 0x13b   :  { %711 = vrot.lane.b32.xlu0 %v5511_v13, %s4836_s13  ;;  %v655_v14 = vadd.f32 %v597_v7, %v427_v12 }
 0x13c   :  { %721 = vrot.lane.b32.xlu1 %v5515_v36, %s4836_s13 }
 0x13d   :  { %v567_v28 = vpop.permute.xlu0 %566 }
 0x13e   :  { %v598_v35 = vsel %vm586_vm9, %v567_v28, %v569_v61  ;;  %v573_v9 = vpop.permute.xlu1 %572 }
 0x13f   :  { %v657_v52 = vadd.f32 %v598_v35, %v429_v63  ;;  %715 = vrot.lane.b32.xlu0 %v5522_v10, %s4836_s13  ;;  %v660_v44 = vadd.f32 %v573_v9, %v432_v2 }
 0x141   :  { %v5531_v42 = vpack.c.bf16 %v657_v52, %v655_v14  ;;  %v436_v52 = vmul.f32 %v5395_v51, %v5269_v1 }
 0x142   :  { %v577_v5 = vpop.permute.xlu1 %576 }
 0x143   :  { %v662_v57 = vadd.f32 %v577_v5, %v434_v30  ;;  %719 = vrot.lane.b32.xlu0 %v5531_v42, %s4836_s13 }
 0x145   :  { %v5539_v61 = vpack.c.bf16 %v662_v57, %v660_v44  ;;  %v571_v20 = vpop.permute.xlu0 %570 }
 0x146   :  { %v599_v47 = vsel %vm586_vm9, %v571_v20, %v573_v9  ;;  %v438_v9 = vmul.f32 %v5395_v51, %v5275_v4  ;;  %v437_v51 = vmul.f32 %v5348_v58, %v5290_v23 }
 0x147   :  { %725 = vrot.lane.b32.xlu1 %v5539_v61, %s4836_s13  ;;  %v659_v28 = vadd.f32 %v599_v47, %v431_v55  ;;  %v435_v55 = vmul.f32 %v5348_v58, %v5285_v18 }
 0x149   :  { %v575_v7 = vpop.permute.xlu0 %574 }
 0x14a   :  { %v600_v12 = vsel %vm586_vm9, %v575_v7, %v577_v5  ;;  %v581_v63 = vpop.permute.xlu1 %580 }
 0x14b   :  { %v661_v35 = vadd.f32 %v600_v12, %v433_v29  ;;  %v664_v30 = vadd.f32 %v581_v63, %v436_v52 }
 0x14d   :  { %v5549_v14 = vpack.c.bf16 %v661_v35, %v659_v28 }
 0x14e   :  { %v585_v2 = vpop.permute.xlu1 %584 }
 0x14f   :  { %v666_v44 = vadd.f32 %v585_v2, %v438_v9  ;;  %723 = vrot.lane.b32.xlu0 %v5549_v14, %s4836_s13 }
 0x151   :  { %v5557_v57 = vpack.c.bf16 %v666_v44, %v664_v30  ;;  %v579_v5 = vpop.permute.xlu0 %578 }
 0x152   :  { %v965_v20 = vpop.permute.xlu1 %964  ;;  %v601_v47 = vsel %vm586_vm9, %v579_v5, %v581_v63 }
 0x153   :  { %729 = vrot.lane.b32.xlu1 %v5557_v57, %s4836_s13  ;;  %v663_v28 = vadd.f32 %v601_v47, %v435_v55 }
 0x155   :  { %v583_v29 = vpop.permute.xlu0 %582 }
 0x156   :  { %v602_v7 = vsel %vm586_vm9, %v583_v29, %v585_v2  ;;  %v1088_v12 = vpop.permute.xlu1 %1087 }
 0x157   :  { %v665_v35 = vadd.f32 %v602_v7, %v437_v51 }
 0x159   :  { %v5567_v52 = vpack.c.bf16 %v665_v35, %v663_v28  ;;  %v5569_v9 = vpop.permute.xlu0 %962 }
 0x15a   :  { %v1092_v30 = vpop.permute.xlu1 %1091  ;;  %v5572_v63 = vsel %vm966_vm10, %v5569_v9, %v965_v20  ;;  %v970_v20 = vmul.f32 %v5569_v9, %v5085_v6 }
 0x15b   :  { %v971_v44 = vmul.f32 %v5572_v63, %v5089_v8  ;;  %v973_v58 = vmul.f32 %v5572_v63, %v5104_v17  ;;  %727 = vrot.lane.b32.xlu0 %v5567_v52, %s4836_s13  ;;  %v975_v8 = vmul.f32 %v5572_v63, %v5116_v24  ;;  %v972_v17 = vmul.f32 %v5569_v9, %v5098_v15 }
 0x15c   :  { %v977_v28 = vmul.f32 %v5572_v63, %v5129_v31  ;;  %v974_v31 = vmul.f32 %v5569_v9, %v5110_v21 }
 0x15d   :  { %v1198_v2 = vadd.f32 %v1088_v12, %v971_v44  ;;  %v1200_v5 = vadd.f32 %v1092_v30, %v973_v58  ;;  %v1086_v47 = vpop.permute.xlu0 %1085 }
 0x15e   :  { %v1096_v55 = vpop.permute.xlu1 %1095  ;;  %v1149_v29 = vsel %vm586_vm9, %v1086_v47, %v1088_v12 }
 0x15f   :  { %v5580_v51 = vpack.c.bf16 %v1200_v5, %v1198_v2  ;;  %v1197_v44 = vadd.f32 %v1149_v29, %v970_v20  ;;  %v1202_v58 = vadd.f32 %v1096_v55, %v975_v8  ;;  %v976_v29 = vmul.f32 %v5569_v9, %v5121_v26 }
 0x160   :  { %v981_v8 = vmul.f32 %v5572_v63, %v5149_v40  ;;  %v978_v40 = vmul.f32 %v5569_v9, %v5134_v33 }
 0x161   :  { %6819 = vst [vmem:[#allocation4_spill] sm:$0xff] %v5580_v51  ;;  %1263 = vrot.lane.b32.xlu1 %v5580_v51, %s4837_s14  ;;  %v1090_v7 = vpop.permute.xlu0 %1089 }
 0x162   :  { %v1150_v35 = vsel %vm586_vm9, %v1090_v7, %v1092_v30  ;;  %v1100_v12 = vpop.permute.xlu1 %1099  ;;  %v979_v30 = vmul.f32 %v5572_v63, %v5137_v34 }
 0x163   :  { %v1199_v6 = vadd.f32 %v1150_v35, %v972_v17  ;;  %v1204_v2 = vadd.f32 %v1100_v12, %v977_v28 }
 0x165   :  { %v5594_v5 = vpack.c.bf16 %v1199_v6, %v1197_v44  ;;  %v5596_v24 = vpack.c.bf16 %v1204_v2, %v1202_v58  ;;  %v1094_v47 = vpop.permute.xlu0 %1093  ;;  %v980_v2 = vmul.f32 %v5569_v9, %v5146_v39 }
 0x166   :  { %v1104_v51 = vpop.permute.xlu1 %1103  ;;  %v1151_v15 = vsel %vm586_vm9, %v1094_v47, %v1096_v55 }
 0x167   :  { %1267 = vrot.lane.b32.xlu1 %v5596_v24, %s4837_s14  ;;  %1261 = vrot.lane.b32.xlu0 %v5594_v5, %s4837_s14  ;;  %v1201_v28 = vadd.f32 %v1151_v15, %v974_v31  ;;  %v1206_v35 = vadd.f32 %v1104_v51, %v979_v30  ;;  %v985_v15 = vmul.f32 %v5572_v63, %v5175_v54 }
 0x168   :  { %v982_v54 = vmul.f32 %v5569_v9, %v5163_v49 }
 0x169   :  { %v1098_v20 = vpop.permute.xlu0 %1097 }
 0x16a   :  { %v1152_v17 = vsel %vm586_vm9, %v1098_v20, %v1100_v12  ;;  %v1108_v7 = vpop.permute.xlu1 %1107  ;;  %v983_v12 = vmul.f32 %v5572_v63, %v5160_v46 }
 0x16b   :  { %v1203_v44 = vadd.f32 %v1152_v17, %v976_v29  ;;  %v1208_v55 = vadd.f32 %v1108_v7, %v981_v8 }
 0x16d   :  { %v5612_v58 = vpack.c.bf16 %v1203_v44, %v1201_v28  ;;  %v5614_v21 = vpack.c.bf16 %v1208_v55, %v1206_v35  ;;  %v1102_v6 = vpop.permute.xlu0 %1101  ;;  %v984_v35 = vmul.f32 %v5569_v9, %v5172_v53  ;;  %v989_v55 = vmul.f32 %v5572_v63, %v5193_v0 }
 0x16e   :  { %v1112_v34 = vpop.permute.xlu1 %1111  ;;  %v1153_v26 = vsel %vm586_vm9, %v1102_v6, %v1104_v51  ;;  %v986_v0 = vmul.f32 %v5569_v9, %v5196_v3 }
 0x16f   :  { %1271 = vrot.lane.b32.xlu1 %v5614_v21, %s4837_s14  ;;  %1265 = vrot.lane.b32.xlu0 %v5612_v58, %s4837_s14  ;;  %v1205_v29 = vadd.f32 %v1153_v26, %v978_v40  ;;  %v1210_v20 = vadd.f32 %v1112_v34, %v983_v12 }
 0x171   :  { %v1106_v47 = vpop.permute.xlu0 %1105 }
 0x172   :  { %v1154_v31 = vsel %vm586_vm9, %v1106_v47, %v1108_v7  ;;  %v1116_v30 = vpop.permute.xlu1 %1115  ;;  %v987_v7 = vmul.f32 %v5572_v63, %v5185_v59 }
 0x173   :  { %v1207_v8 = vadd.f32 %v1154_v31, %v980_v2  ;;  %v1212_v51 = vadd.f32 %v1116_v30, %v985_v15  ;;  %v991_v31 = vmul.f32 %v5572_v63, %v5213_v19 }
 0x175   :  { %v5630_v17 = vpack.c.bf16 %v1207_v8, %v1205_v29  ;;  %v5632_v33 = vpack.c.bf16 %v1212_v51, %v1210_v20  ;;  %v1110_v28 = vpop.permute.xlu0 %1109  ;;  %v993_v20 = vmul.f32 %v5572_v63, %v5221_v27  ;;  %v990_v27 = vmul.f32 %v5569_v9, %v5227_v32 }
 0x176   :  { %v1120_v46 = vpop.permute.xlu1 %1119  ;;  %v1155_v39 = vsel %vm586_vm9, %v1110_v28, %v1112_v34 }
 0x177   :  { %1275 = vrot.lane.b32.xlu1 %v5632_v33, %s4837_s14  ;;  %1269 = vrot.lane.b32.xlu0 %v5630_v17, %s4837_s14  ;;  %v1209_v40 = vadd.f32 %v1155_v39, %v982_v54  ;;  %v1214_v12 = vadd.f32 %v1120_v46, %v987_v7 }
 0x179   :  { %v1114_v44 = vpop.permute.xlu0 %1113 }
 0x17a   :  { %v1156_v6 = vsel %vm586_vm9, %v1114_v44, %v1116_v30  ;;  %v1124_v26 = vpop.permute.xlu1 %1123  ;;  %v988_v30 = vmul.f32 %v5569_v9, %v5205_v11  ;;  %v995_v44 = vmul.f32 %v5572_v63, %v5241_v43 }
 0x17b   :  { %v1211_v2 = vadd.f32 %v1156_v6, %v984_v35  ;;  %v1216_v34 = vadd.f32 %v1124_v26, %v989_v55  ;;  %v992_v55 = vmul.f32 %v5569_v9, %v5234_v37 }
 0x17d   :  { %v5648_v47 = vpack.c.bf16 %v1211_v2, %v1209_v40  ;;  %v5650_v49 = vpack.c.bf16 %v1216_v34, %v1214_v12  ;;  %v1118_v15 = vpop.permute.xlu0 %1117 }
 0x17e   :  { %v1128_v59 = vpop.permute.xlu1 %1127  ;;  %v1157_v53 = vsel %vm586_vm9, %v1118_v15, %v1120_v46 }
 0x17f   :  { %1279 = vrot.lane.b32.xlu1 %v5650_v49, %s4837_s14  ;;  %1273 = vrot.lane.b32.xlu0 %v5648_v47, %s4837_s14  ;;  %v1213_v28 = vadd.f32 %v1157_v53, %v986_v0  ;;  %v1218_v39 = vadd.f32 %v1128_v59, %v991_v31  ;;  %v999_v31 = vmul.f32 %v5572_v63, %v5269_v1 }
 0x181   :  { %v1122_v29 = vpop.permute.xlu0 %1121 }
 0x182   :  { %v1158_v8 = vsel %vm586_vm9, %v1122_v29, %v1124_v26  ;;  %v1132_v51 = vpop.permute.xlu1 %1131  ;;  %v997_v26 = vmul.f32 %v5572_v63, %v5249_v50  ;;  %v994_v50 = vmul.f32 %v5569_v9, %v5255_v56 }
 0x183   :  { %v1215_v54 = vadd.f32 %v1158_v8, %v988_v30  ;;  %v1220_v46 = vadd.f32 %v1132_v51, %v993_v20  ;;  %v996_v30 = vmul.f32 %v5569_v9, %v5262_v60  ;;  %v1001_v20 = vmul.f32 %v5572_v63, %v5275_v4 }
 0x184   :  { %v998_v4 = vmul.f32 %v5569_v9, %v5285_v18  ;;  %v1000_v63 = vmul.f32 %v5569_v9, %v5290_v23  ;;  %v1482_v18 = vld [vmem:[#allocation2 + $0x10] sm:$0xff] }
 0x185   :  { %v5666_v7 = vpack.c.bf16 %v1215_v54, %v1213_v28  ;;  %v5668_v3 = vpack.c.bf16 %v1220_v46, %v1218_v39  ;;  %v1126_v35 = vpop.permute.xlu0 %1125 }
 0x186   :  { %v1136_v19 = vpop.permute.xlu1 %1135  ;;  %v1159_v11 = vsel %vm586_vm9, %v1126_v35, %v1128_v59 }
 0x187   :  { %1283 = vrot.lane.b32.xlu1 %v5668_v3, %s4837_s14  ;;  %1277 = vrot.lane.b32.xlu0 %v5666_v7, %s4837_s14  ;;  %v1217_v2 = vadd.f32 %v1159_v11, %v990_v27  ;;  %v1222_v34 = vadd.f32 %v1136_v19, %v995_v44 }
 0x189   :  { %v1130_v6 = vpop.permute.xlu0 %1129 }
 0x18a   :  { %v1160_v40 = vsel %vm586_vm9, %v1130_v6, %v1132_v51  ;;  %v1140_v12 = vpop.permute.xlu1 %1139 }
 0x18b   :  { %v1219_v15 = vadd.f32 %v1160_v40, %v992_v55  ;;  %v1224_v59 = vadd.f32 %v1140_v12, %v997_v26  ;;  %v1480_v26 = vld [vmem:[#allocation2] sm:$0xff]  ;;  %v1481_v40 = vld [vmem:[#allocation2 + $0x8] sm:$0xff] }
 0x18d   :  { %v5684_v53 = vpack.c.bf16 %v1219_v15, %v1217_v2  ;;  %v5686_v32 = vpack.c.bf16 %v1224_v59, %v1222_v34  ;;  %v1134_v0 = vpop.permute.xlu0 %1133 }
 0x18e   :  { %v1144_v43 = vpop.permute.xlu1 %1143  ;;  %v1161_v37 = vsel %vm586_vm9, %v1134_v0, %v1136_v19  ;;  %v1484_v0 = vld [vmem:[#allocation2 + $0x20] sm:$0xff] }
 0x18f   :  { %1287 = vrot.lane.b32.xlu1 %v5686_v32, %s4837_s14  ;;  %1281 = vrot.lane.b32.xlu0 %v5684_v53, %s4837_s14  ;;  %v1221_v28 = vadd.f32 %v1161_v37, %v994_v50  ;;  %v1226_v39 = vadd.f32 %v1144_v43, %v999_v31  ;;  %v1486_v31 = vld [vmem:[#allocation2 + $0x30] sm:$0xff] }
 0x191   :  { %v1138_v29 = vpop.permute.xlu0 %1137 }
 0x192   :  { %v1162_v8 = vsel %vm586_vm9, %v1138_v29, %v1140_v12  ;;  %v1148_v51 = vpop.permute.xlu1 %1147  ;;  %v1483_v12 = vld [vmem:[#allocation2 + $0x18] sm:$0xff] }
 0x193   :  { %v1223_v54 = vadd.f32 %v1162_v8, %v996_v30  ;;  %v1228_v46 = vadd.f32 %v1148_v51, %v1001_v20  ;;  %v1485_v30 = vld [vmem:[#allocation2 + $0x28] sm:$0xff]  ;;  %v1487_v29 = vld [vmem:[#allocation2 + $0x38] sm:$0xff] }
 0x194   :  { %v4624_v20 = vld [vmem:[%s6815_s2 + $0x244] ss:$36 sps:$4 sm:$0xff]  }
 0x195   :  { %v5702_v35 = vpack.c.bf16 %v1223_v54, %v1221_v28  ;;  %v5704_v56 = vpack.c.bf16 %v1228_v46, %v1226_v39  ;;  %v1142_v19 = vpop.permute.xlu0 %1141  ;;  %3627 = vmatprep.mubr.bf16.mxu1 %v4624_v20 }
 0x196   :  { %v1526_v1 = vpop.permute.xlu1 %1525  ;;  %v1163_v60 = vsel %vm586_vm9, %v1142_v19, %v1144_v43  ;;  %v4621_v43 = vld [vmem:[%s6815_s2 + $0x4] ss:$36 sps:$4 sm:$0xff]  }
 0x197   :  { %1291 = vrot.lane.b32.xlu1 %v5704_v56, %s4837_s14  ;;  %1285 = vrot.lane.b32.xlu0 %v5702_v35, %s4837_s14  ;;  %v1225_v55 = vadd.f32 %v1163_v60, %v998_v4 }
 0x198   :  { %2438 = vmatprep.mubr.bf16.mxu0 %v4621_v43 }
 0x199   :  { %v1146_v11 = vpop.permute.xlu0 %1145 }
 0x19a   :  { %v1164_v27 = vsel %vm586_vm9, %v1146_v11, %v1148_v51  ;;  %v702_v44 = vpop.permute.xlu1 %701  ;;  %v1489_v11 = vld [vmem:[#allocation2 + $0x48] sm:$0xff] }
 0x19b   :  { %v1227_v6 = vadd.f32 %v1164_v27, %v1000_v63  ;;  %758 = vst.msk [vmem:[#allocation3 + $0x8] sm:$0xff] %vm757_vm11, %v702_v44  ;;  %v1488_v63 = vld [vmem:[#allocation2 + $0x40] sm:$0xff]  ;;  %v1491_v27 = vld [vmem:[#allocation2 + $0x58] sm:$0xff] }
 0x19d   :  { %v5717_v2 = vpack.c.bf16 %v1227_v6, %v1225_v55  ;;  %v5719_v34 = vpop.permute.xlu0 %1523 }
 0x19e   :  { %v706_v15 = vpop.permute.xlu1 %705  ;;  %v1531_v23 = vmul.f32 %v5719_v34, %v1480_v26  ;;  %v1533_v9 = vmul.f32 %v5719_v34, %v1482_v18  ;;  %v5724_v59 = vsel %vm1527_vm12, %v5719_v34, %v1526_v1  ;;  %v1535_v39 = vmul.f32 %v5719_v34, %v1484_v0 }
 0x19f   :  { %760 = vst.msk [vmem:[#allocation3 + $0x18] sm:$0xff] %vm757_vm11, %v706_v15  ;;  %1289 = vrot.lane.b32.xlu0 %v5717_v2, %s4837_s14  ;;  %v1532_v37 = vmul.f32 %v5724_v59, %v1481_v40  ;;  %v1534_v50 = vmul.f32 %v5724_v59, %v1483_v12  ;;  %v1537_v54 = vmul.f32 %v5719_v34, %v1486_v31  ;;  %v1495_v31 = vld [vmem:[#allocation2 + $0x78] sm:$0xff]  ;;  %s4842_s14 = smov 84  }
 0x1a0   :  { %v5737_v8 = vpack.c.bf16 %v1533_v9, %v1531_v23  ;;  %v1536_v60 = vmul.f32 %v5724_v59, %v1485_v30  ;;  %v1538_v4 = vmul.f32 %v5724_v59, %v1487_v29  ;;  %v1539_v26 = vmul.f32 %v5719_v34, %v1488_v63  ;;  %v1496_v63 = vld [vmem:[#allocation2 + $0x80] sm:$0xff] }
 0x1a1   :  { %v700_v51 = vpop.permute.xlu0 %699  ;;  %v5739_v28 = vpack.c.bf16 %v1534_v50, %v1532_v37  ;;  %v5751_v6 = vpack.c.bf16 %v1537_v54, %v1535_v39  ;;  %v1540_v9 = vmul.f32 %v5724_v59, %v1489_v11  ;;  %v1542_v0 = vmul.f32 %v5724_v59, %v1491_v27  ;;  %v1493_v37 = vld [vmem:[#allocation2 + $0x68] sm:$0xff]  ;;  %v1494_v50 = vld [vmem:[#allocation2 + $0x70] sm:$0xff]  ;;  %v1499_v27 = vld [vmem:[#allocation2 + $0x98] sm:$0xff] }
 0x1a2   :  { %v732_v46 = vsel %vm731_vm13, %v700_v51, %v702_v44  ;;  %v710_v19 = vpop.permute.xlu1 %709  ;;  %v1895_v1 = vld [vmem:[#allocation3 + $0x8] sm:$0xff]  ;;  %v1490_v44 = vld [vmem:[#allocation2 + $0x50] sm:$0xff]  ;;  %v5756_v23 = vpack.c.bf16 %v1538_v4, %v1536_v60  ;;  %v1545_v51 = vmul.f32 %v5719_v34, %v1494_v50  ;;  %v1546_v60 = vmul.f32 %v5724_v59, %v1495_v31 }
 0x1a3   :  { %762 = vst.msk [vmem:[#allocation3 + $0x28] sm:$0xff] %vm757_vm11, %v710_v19  ;;  %2406 = vmatprep.subr.bf16.mxu0 %v1895_v1  ;;  %3595 = vmatprep.subr.bf16.mxu1 %v1895_v1  ;;  %v1541_v40 = vmul.f32 %v5719_v34, %v1490_v44  ;;  %v1544_v1 = vmul.f32 %v5724_v59, %v1493_v37  ;;  %v1497_v11 = vld [vmem:[#allocation2 + $0x88] sm:$0xff]  ;;  %v1502_v31 = vld [vmem:[#allocation2 + $0xb0] sm:$0xff] }
 0x1a4   :  { %1595 = vrot.lane.b32.xlu0 %v5737_v8, %s4838_s20  ;;  %1597 = vrot.lane.b32.xlu1 %v5739_v28, %s4838_s20  ;;  %v1550_v37 = vmul.f32 %v5724_v59, %v1499_v27  ;;  %v1501_v50 = vld [vmem:[#allocation2 + $0xa8] sm:$0xff] }
 0x1a5   :  { %v704_v55 = vpop.permute.xlu0 %703  ;;  %2407 = vmatpush1.bf16.msra.mxu0 %v732_v46  ;;  %3596 = vmatpush1.bf16.msra.mxu1 %v732_v46  ;;  %v5765_v29 = vpack.c.bf16 %v1541_v40, %v1539_v26  ;;  %v5770_v46 = vpack.c.bf16 %v1542_v0, %v1540_v9  ;;  %v1547_v26 = vmul.f32 %v5719_v34, %v1496_v63 }
 0x1a6   :  { %v733_v12 = vsel %vm731_vm13, %v704_v55, %v706_v15  ;;  %v714_v18 = vpop.permute.xlu1 %713  ;;  %v1897_v43 = vld [vmem:[#allocation3 + $0x18] sm:$0xff]  ;;  %v1492_v15 = vld [vmem:[#allocation2 + $0x60] sm:$0xff]  ;;  %v5784_v0 = vpack.c.bf16 %v1546_v60, %v1544_v1  ;;  %v1553_v1 = vmul.f32 %v5719_v34, %v1502_v31  ;;  %v1552_v63 = vmul.f32 %v5724_v59, %v1501_v50 }
 0x1a7   :  { %764 = vst.msk [vmem:[#allocation3 + $0x38] sm:$0xff] %vm757_vm11, %v714_v18  ;;  %2408 = vmatprep.subr.bf16.mxu0 %v1897_v43  ;;  %3597 = vmatprep.subr.bf16.mxu1 %v1897_v43  ;;  %v1543_v20 = vmul.f32 %v5719_v34, %v1492_v15  ;;  %v1548_v43 = vmul.f32 %v5724_v59, %v1497_v11 }
 0x1a8   :  { %1599 = vrot.lane.b32.xlu0 %v5751_v6, %s4838_s20  ;;  %1601 = vrot.lane.b32.xlu1 %v5756_v23, %s4838_s20 }
 0x1a9   :  { %v708_v30 = vpop.permute.xlu0 %707  ;;  %2409 = vmatpush1.bf16.msra.mxu0 %v733_v12  ;;  %3598 = vmatpush1.bf16.msra.mxu1 %v733_v12  ;;  %v5779_v55 = vpack.c.bf16 %v1545_v51, %v1543_v20 }
 0x1aa   :  { %v734_v39 = vsel %vm731_vm13, %v708_v30, %v710_v19  ;;  %v718_v54 = vpop.permute.xlu1 %717  ;;  %v1899_v4 = vld [vmem:[#allocation3 + $0x28] sm:$0xff]  ;;  %v1498_v19 = vld [vmem:[#allocation2 + $0x90] sm:$0xff]  ;;  %v1503_v30 = vld [vmem:[#allocation2 + $0xb8] sm:$0xff] }
 0x1ab   :  { %766 = vst.msk [vmem:[#allocation3 + $0x48] sm:$0xff] %vm757_vm11, %v718_v54  ;;  %2410 = vmatprep.subr.bf16.mxu0 %v1899_v4  ;;  %3599 = vmatprep.subr.bf16.mxu1 %v1899_v4  ;;  %v1549_v40 = vmul.f32 %v5719_v34, %v1498_v19  ;;  %v5798_v4 = vpack.c.bf16 %v1550_v37, %v1548_v43  ;;  %v1504_v19 = vld [vmem:[#allocation2 + $0xc0] sm:$0xff] }
 0x1ac   :  { %1603 = vrot.lane.b32.xlu0 %v5765_v29, %s4838_s20  ;;  %1605 = vrot.lane.b32.xlu1 %v5770_v46, %s4838_s20  ;;  %v1554_v11 = vmul.f32 %v5724_v59, %v1503_v30  ;;  %v1555_v43 = vmul.f32 %v5719_v34, %v1504_v19 }
 0x1ad   :  { %v712_v44 = vpop.permute.xlu0 %711  ;;  %2411 = vmatpush1.bf16.msra.mxu0 %v734_v39  ;;  %3600 = vmatpush1.bf16.msra.mxu1 %v734_v39  ;;  %v5793_v51 = vpack.c.bf16 %v1549_v40, %v1547_v26  ;;  %v1507_v26 = vld [vmem:[#allocation2 + $0xd8] sm:$0xff]  ;;  %v1506_v40 = vld [vmem:[#allocation2 + $0xd0] sm:$0xff] }
 0x1ae   :  { %v735_v12 = vsel %vm731_vm13, %v712_v44, %v714_v18  ;;  %v722_v9 = vpop.permute.xlu1 %721  ;;  %v1901_v15 = vld [vmem:[#allocation3 + $0x38] sm:$0xff]  ;;  %v1500_v18 = vld [vmem:[#allocation2 + $0xa0] sm:$0xff]  ;;  %v1505_v44 = vld [vmem:[#allocation2 + $0xc8] sm:$0xff]  ;;  %v1557_v37 = vmul.f32 %v5719_v34, %v1506_v40  ;;  %v5811_v50 = vpack.c.bf16 %v1554_v11, %v1552_v63  ;;  %v1558_v31 = vmul.f32 %v5724_v59, %v1507_v26 }
 0x1af   :  { %768 = vst.msk [vmem:[#allocation3 + $0x58] sm:$0xff] %vm757_vm11, %v722_v9  ;;  %2412 = vmatprep.subr.bf16.mxu0 %v1901_v15  ;;  %3601 = vmatprep.subr.bf16.mxu1 %v1901_v15  ;;  %v1551_v39 = vmul.f32 %v5719_v34, %v1500_v18  ;;  %v1556_v18 = vmul.f32 %v5724_v59, %v1505_v44 }
 0x1b0   :  { %1607 = vrot.lane.b32.xlu0 %v5779_v55, %s4838_s20  ;;  %1609 = vrot.lane.b32.xlu1 %v5784_v0, %s4838_s20  ;;  %v5819_v63 = vpack.c.bf16 %v1557_v37, %v1555_v43 }
 0x1b1   :  { %v716_v20 = vpop.permute.xlu0 %715  ;;  %2413 = vmatpush1.bf16.msra.mxu0 %v735_v12  ;;  %3602 = vmatpush1.bf16.msra.mxu1 %v735_v12  ;;  %v5806_v12 = vpack.c.bf16 %v1553_v1, %v1551_v39  ;;  %v1508_v39 = vld [vmem:[#allocation2 + $0xe0] sm:$0xff]  ;;  %v1510_v1 = vld [vmem:[#allocation2 + $0xf0] sm:$0xff] }
 0x1b2   :  { %v736_v60 = vsel %vm731_vm13, %v716_v20, %v718_v54  ;;  %v1903_v27 = vld [vmem:[#allocation3 + $0x48] sm:$0xff]  ;;  %v1559_v11 = vmul.f32 %v5719_v34, %v1508_v39  ;;  %v1561_v19 = vmul.f32 %v5719_v34, %v1510_v1 }
 0x1b3   :  { %2414 = vmatprep.subr.bf16.mxu0 %v1903_v27  ;;  %3603 = vmatprep.subr.bf16.mxu1 %v1903_v27  ;;  %v1509_v20 = vld [vmem:[#allocation2 + $0xe8] sm:$0xff]  ;;  %v5823_v27 = vpack.c.bf16 %v1558_v31, %v1556_v18 }
 0x1b4   :  { %1611 = vrot.lane.b32.xlu0 %v5793_v51, %s4838_s20  ;;  %1613 = vrot.lane.b32.xlu1 %v5798_v4, %s4838_s20  ;;  %v1560_v44 = vmul.f32 %v5724_v59, %v1509_v20  ;;  %v5832_v40 = vpack.c.bf16 %v1561_v19, %v1559_v11 }
 0x1b5   :  { %v720_v54 = vpop.permute.xlu0 %719  ;;  %2415 = vmatpush1.bf16.msra.mxu0 %v736_v60  ;;  %3604 = vmatpush1.bf16.msra.mxu1 %v736_v60  ;;  %v1511_v60 = vld [vmem:[#allocation2 + $0xf8] sm:$0xff] }
 0x1b6   :  { %v737_v15 = vsel %vm731_vm13, %v720_v54, %v722_v9  ;;  %v1905_v30 = vld [vmem:[#allocation3 + $0x58] sm:$0xff]  ;;  %v1562_v26 = vmul.f32 %v5724_v59, %v1511_v60 }
 0x1b7   :  { %2416 = vmatprep.subr.bf16.mxu0 %v1905_v30  ;;  %3605 = vmatprep.subr.bf16.mxu1 %v1905_v30 }
 0x1b8   :  { %1615 = vrot.lane.b32.xlu0 %v5806_v12, %s4838_s20  ;;  %1617 = vrot.lane.b32.xlu1 %v5811_v50, %s4838_s20  ;;  %v5834_v54 = vpack.c.bf16 %v1562_v26, %v1560_v44  ;;  %v6820_v26 = vld [vmem:[#allocation4_spill] sm:$0xff] }
 0x1b9   :  { %v726_v9 = vpop.permute.xlu1 %725  ;;  %2417 = vmatpush1.bf16.msra.mxu0 %v737_v15  ;;  %3606 = vmatpush1.bf16.msra.mxu1 %v737_v15 }
 0x1ba   :  { %770 = vst.msk [vmem:[#allocation3 + $0x68] sm:$0xff] %vm757_vm11, %v726_v9 }
 0x1bc   :  { %1619 = vrot.lane.b32.xlu0 %v5819_v63, %s4838_s20  ;;  %1621 = vrot.lane.b32.xlu1 %v5823_v27, %s4838_s20 }
 0x1c0   :  { %1623 = vrot.lane.b32.xlu0 %v5832_v40, %s4838_s20  ;;  %1625 = vrot.lane.b32.xlu1 %v5834_v54, %s4838_s20 }
 0x1c1   :  { %v724_v34 = vpop.permute.xlu0 %723  ;;  %v1907_v43 = vld [vmem:[#allocation3 + $0x68] sm:$0xff] }
 0x1c2   :  { %v738_v59 = vsel %vm731_vm13, %v724_v34, %v726_v9  ;;  %2418 = vmatprep.subr.bf16.mxu0 %v1907_v43  ;;  %3607 = vmatprep.subr.bf16.mxu1 %v1907_v43 }
 0x1c3   :  { %2419 = vmatpush1.bf16.msra.mxu0 %v738_v59  ;;  %3608 = vmatpush1.bf16.msra.mxu1 %v738_v59 }
 0x1c4   :  { %773 = vrot.lane.b32.xlu0 %v5454_v41, %s4839_s22  ;;  %775 = vrot.lane.b32.xlu1 %v5423_v45, %s4839_s22 }
 0x1c5   :  { %v730_v37 = vpop.permute.xlu1 %729 }
 0x1c6   :  { %772 = vst.msk [vmem:[#allocation3 + $0x78] sm:$0xff] %vm757_vm11, %v730_v37 }
 0x1c8   :  { %777 = vrot.lane.b32.xlu0 %v5475_v25, %s4839_s22  ;;  %779 = vrot.lane.b32.xlu1 %v5440_v38, %s4839_s22 }
 0x1cc   :  { %781 = vrot.lane.b32.xlu0 %v5495_v62, %s4839_s22  ;;  %783 = vrot.lane.b32.xlu1 %v5459_v16, %s4839_s22 }
 0x1cd   :  { %v728_v15 = vpop.permute.xlu0 %727  ;;  %v1909_v18 = vld [vmem:[#allocation3 + $0x78] sm:$0xff] }
 0x1ce   :  { %v739_v31 = vsel %vm731_vm13, %v728_v15, %v730_v37  ;;  %2420 = vmatprep.subr.bf16.mxu0 %v1909_v18  ;;  %3609 = vmatprep.subr.bf16.mxu1 %v1909_v18 }
 0x1cf   :  { %2421 = vmatpush1.bf16.msra.mxu0 %v739_v31  ;;  %3610 = vmatpush1.bf16.msra.mxu1 %v739_v31 }
 0x1d0   :  { %785 = vrot.lane.b32.xlu0 %v5511_v13, %s4839_s22  ;;  %787 = vrot.lane.b32.xlu1 %v5480_v48, %s4839_s22 }
 0x1d3   :  { %v1264_v30 = vpop.permute.xlu1 %1263 }
 0x1d4   :  { %1319 = vst.msk [vmem:[#allocation3 + $0x88] sm:$0xff] %vm757_vm11, %v1264_v30  ;;  %789 = vrot.lane.b32.xlu0 %v5522_v10, %s4839_s22  ;;  %791 = vrot.lane.b32.xlu1 %v5501_v22, %s4839_s22 }
 0x1d8   :  { %793 = vrot.lane.b32.xlu0 %v5531_v42, %s4839_s22  ;;  %795 = vrot.lane.b32.xlu1 %v5515_v36, %s4839_s22 }
 0x1d9   :  { %v1268_v20 = vpop.permute.xlu1 %1267  ;;  %v1262_v39 = vpop.permute.xlu0 %1261 }
 0x1da   :  { %1321 = vst.msk [vmem:[#allocation3 + $0x98] sm:$0xff] %vm757_vm11, %v1268_v20  ;;  %v1294_v1 = vsel %vm1293_vm14, %v1262_v39, %v1264_v30 }
 0x1db   :  { %v1911_v60 = vld [vmem:[#allocation3 + $0x88] sm:$0xff] }
 0x1dc   :  { %797 = vrot.lane.b32.xlu0 %v5549_v14, %s4839_s22  ;;  %799 = vrot.lane.b32.xlu1 %v5539_v61, %s4839_s22 }
 0x1dd   :  { %2422 = vmatprep.subr.bf16.mxu0 %v1911_v60  ;;  %3611 = vmatprep.subr.bf16.mxu1 %v1911_v60 }
 0x1de   :  { %2423 = vmatpush1.bf16.msra.mxu0 %v1294_v1  ;;  %3612 = vmatpush1.bf16.msra.mxu1 %v1294_v1 }
 0x1e0   :  { %801 = vrot.lane.b32.xlu0 %v5567_v52, %s4839_s22  ;;  %803 = vrot.lane.b32.xlu1 %v5557_v57, %s4839_s22 }
 0x1e1   :  { %v1272_v9 = vpop.permute.xlu1 %1271  ;;  %v1266_v11 = vpop.permute.xlu0 %1265  ;;  %v1913_v19 = vld [vmem:[#allocation3 + $0x98] sm:$0xff] }
 0x1e2   :  { %1323 = vst.msk [vmem:[#allocation3 + $0xa8] sm:$0xff] %vm757_vm11, %v1272_v9  ;;  %v1295_v44 = vsel %vm1293_vm14, %v1266_v11, %v1268_v20  ;;  %2424 = vmatprep.subr.bf16.mxu0 %v1913_v19  ;;  %3613 = vmatprep.subr.bf16.mxu1 %v1913_v19 }
 0x1e3   :  { %2425 = vmatpush1.bf16.msra.mxu0 %v1295_v44  ;;  %3614 = vmatpush1.bf16.msra.mxu1 %v1295_v44 }
 0x1e4   :  { %1334 = vrot.lane.b32.xlu0 %v5594_v5, %s4840_s23  ;;  %1336 = vrot.lane.b32.xlu1 %v6820_v26, %s4840_s23 }
 0x1e8   :  { %1338 = vrot.lane.b32.xlu0 %v5612_v58, %s4840_s23  ;;  %1340 = vrot.lane.b32.xlu1 %v5596_v24, %s4840_s23 }
 0x1e9   :  { %v1276_v34 = vpop.permute.xlu1 %1275  ;;  %v1270_v43 = vpop.permute.xlu0 %1269  ;;  %v1915_v59 = vld [vmem:[#allocation3 + $0xa8] sm:$0xff] }
 0x1ea   :  { %1325 = vst.msk [vmem:[#allocation3 + $0xb8] sm:$0xff] %vm757_vm11, %v1276_v34  ;;  %v1296_v37 = vsel %vm1293_vm14, %v1270_v43, %v1272_v9  ;;  %2426 = vmatprep.subr.bf16.mxu0 %v1915_v59  ;;  %3615 = vmatprep.subr.bf16.mxu1 %v1915_v59 }
 0x1eb   :  { %2427 = vmatpush1.bf16.msra.mxu0 %v1296_v37  ;;  %3616 = vmatpush1.bf16.msra.mxu1 %v1296_v37 }
 0x1ec   :  { %1342 = vrot.lane.b32.xlu0 %v5630_v17, %s4840_s23  ;;  %1344 = vrot.lane.b32.xlu1 %v5614_v21, %s4840_s23 }
 0x1f0   :  { %1346 = vrot.lane.b32.xlu0 %v5648_v47, %s4840_s23  ;;  %1348 = vrot.lane.b32.xlu1 %v5632_v33, %s4840_s23 }
 0x1f1   :  { %v1280_v15 = vpop.permute.xlu1 %1279  ;;  %v1274_v18 = vpop.permute.xlu0 %1273  ;;  %v1917_v31 = vld [vmem:[#allocation3 + $0xb8] sm:$0xff] }
 0x1f2   :  { %1327 = vst.msk [vmem:[#allocation3 + $0xc8] sm:$0xff] %vm757_vm11, %v1280_v15  ;;  %v1297_v30 = vsel %vm1293_vm14, %v1274_v18, %v1276_v34  ;;  %2428 = vmatprep.subr.bf16.mxu0 %v1917_v31  ;;  %3617 = vmatprep.subr.bf16.mxu1 %v1917_v31 }
 0x1f3   :  { %2429 = vmatpush1.bf16.msra.mxu0 %v1297_v30  ;;  %3618 = vmatpush1.bf16.msra.mxu1 %v1297_v30  ;;  %v4619_v30 = vld [vmem:[%s6815_s2] ss:$36 sps:$4 sm:$0xff]  }
 0x1f4   :  { %1350 = vrot.lane.b32.xlu0 %v5666_v7, %s4840_s23  ;;  %1352 = vrot.lane.b32.xlu1 %v5650_v49, %s4840_s23 }
 0x1f8   :  { %1354 = vrot.lane.b32.xlu0 %v5684_v53, %s4840_s23  ;;  %1356 = vrot.lane.b32.xlu1 %v5668_v3, %s4840_s23 }
 0x1f9   :  { %v1284_v20 = vpop.permute.xlu1 %1283  ;;  %v1278_v39 = vpop.permute.xlu0 %1277  ;;  %v1919_v1 = vld [vmem:[#allocation3 + $0xc8] sm:$0xff] }
 0x1fa   :  { %1329 = vst.msk [vmem:[#allocation3 + $0xd8] sm:$0xff] %vm757_vm11, %v1284_v20  ;;  %v1298_v60 = vsel %vm1293_vm14, %v1278_v39, %v1280_v15  ;;  %2430 = vmatprep.subr.bf16.mxu0 %v1919_v1  ;;  %3619 = vmatprep.subr.bf16.mxu1 %v1919_v1  ;;  %v4625_v39 = vld [vmem:[%s6815_s2 + $0x4c] ss:$36 sps:$4 sm:$0xff]  }
 0x1fb   :  { %2431 = vmatpush1.bf16.msra.mxu0 %v1298_v60  ;;  %3620 = vmatpush1.bf16.msra.mxu1 %v1298_v60  ;;  %v4627_v1 = vld [vmem:[%s6815_s2 + $0x28c] ss:$36 sps:$4 sm:$0xff]  }
 0x1fc   :  { %1358 = vrot.lane.b32.xlu0 %v5702_v35, %s4840_s23  ;;  %1360 = vrot.lane.b32.xlu1 %v5686_v32, %s4840_s23 }
 0x200   :  { %1362 = vrot.lane.b32.xlu0 %v5717_v2, %s4840_s23  ;;  %1364 = vrot.lane.b32.xlu1 %v5704_v56, %s4840_s23 }
 0x201   :  { %v1288_v9 = vpop.permute.xlu1 %1287  ;;  %v1282_v11 = vpop.permute.xlu0 %1281  ;;  %v1921_v19 = vld [vmem:[#allocation3 + $0xd8] sm:$0xff] }
 0x202   :  { %1331 = vst.msk [vmem:[#allocation3 + $0xe8] sm:$0xff] %vm757_vm11, %v1288_v9  ;;  %v1299_v44 = vsel %vm1293_vm14, %v1282_v11, %v1284_v20  ;;  %2432 = vmatprep.subr.bf16.mxu0 %v1921_v19  ;;  %3621 = vmatprep.subr.bf16.mxu1 %v1921_v19  ;;  %v4622_v20 = vld [vmem:[%s6815_s2 + $0x240] ss:$36 sps:$4 sm:$0xff]  }
 0x203   :  { %2433 = vmatpush1.bf16.msra.mxu0 %v1299_v44  ;;  %3622 = vmatpush1.bf16.msra.mxu1 %v1299_v44 }
 0x204   :  { %1668 = vrot.lane.b32.xlu0 %v5737_v8, %s4841_s24  ;;  %1670 = vrot.lane.b32.xlu1 %v5739_v28, %s4841_s24 }
 0x208   :  { %1672 = vrot.lane.b32.xlu0 %v5751_v6, %s4841_s24  ;;  %1674 = vrot.lane.b32.xlu1 %v5756_v23, %s4841_s24 }
 0x209   :  { %v1292_v34 = vpop.permute.xlu1 %1291  ;;  %v1286_v43 = vpop.permute.xlu0 %1285  ;;  %v1923_v59 = vld [vmem:[#allocation3 + $0xe8] sm:$0xff] }
 0x20a   :  { %1333 = vst.msk [vmem:[#allocation3 + $0xf8] sm:$0xff] %vm757_vm11, %v1292_v34  ;;  %v1300_v37 = vsel %vm1293_vm14, %v1286_v43, %v1288_v9  ;;  %2434 = vmatprep.subr.bf16.mxu0 %v1923_v59  ;;  %3623 = vmatprep.subr.bf16.mxu1 %v1923_v59  ;;  %v4630_v43 = vld [vmem:[%s6815_s2 + $0x288] ss:$36 sps:$4 sm:$0xff]  }
 0x20b   :  { %2435 = vmatpush1.bf16.msra.mxu0 %v1300_v37  ;;  %3624 = vmatpush1.bf16.msra.mxu1 %v1300_v37 }
 0x20c   :  { %1676 = vrot.lane.b32.xlu0 %v5765_v29, %s4841_s24  ;;  %1678 = vrot.lane.b32.xlu1 %v5770_v46, %s4841_s24 }
 0x210   :  { %1680 = vrot.lane.b32.xlu0 %v5779_v55, %s4841_s24  ;;  %1682 = vrot.lane.b32.xlu1 %v5784_v0, %s4841_s24 }
 0x211   :  { %v1290_v15 = vpop.permute.xlu0 %1289  ;;  %v1925_v18 = vld [vmem:[#allocation3 + $0xf8] sm:$0xff] }
 0x212   :  { %v1301_v31 = vsel %vm1293_vm14, %v1290_v15, %v1292_v34  ;;  %2436 = vmatprep.subr.bf16.mxu0 %v1925_v18  ;;  %3625 = vmatprep.subr.bf16.mxu1 %v1925_v18  ;;  %v4629_v34 = vld [vmem:[%s6815_s2 + $0x48] ss:$36 sps:$4 sm:$0xff]  }
 0x213   :  { %2437 = vmatpush1.bf16.msra.mxu0 %v1301_v31  ;;  %3626 = vmatpush1.bf16.msra.mxu1 %v1301_v31  ;;  %v4631_v31 = vld [vmem:[%s6815_s2 + $0x94] ss:$36 sps:$4 sm:$0xff]  }
 0x214   :  { %1684 = vrot.lane.b32.xlu0 %v5793_v51, %s4841_s24  ;;  %1686 = vrot.lane.b32.xlu1 %v5798_v4, %s4841_s24 }
 0x216   :  { %v1598_v60 = vpop.permute.xlu1 %1597  ;;  %v1596_v9 = vpop.permute.xlu0 %1595  ;;  %2439 = vmatmul.mubr.bf16.vlgmr.msra.gmra.mrb[0].mxu0 %v4619_v30  ;;  %3628 = vmatmul.mubr.bf16.vlgmr.msra.gmra.mrb[0].mxu1 %v4622_v20  ;;  %v4633_v30 = vld [vmem:[%s6815_s2 + $0x2d4] ss:$36 sps:$4 sm:$0xff]  }
 0x217   :  { %1653 = vst.msk [vmem:[#allocation3 + $0x108] sm:$0xff] %vm757_vm11, %v1598_v60  ;;  %v1628_v11 = vsel %vm1627_vm15, %v1596_v9, %v1598_v60  ;;  %2448 = vmatprep.mubr.bf16.mxu0 %v4625_v39  ;;  %3637 = vmatprep.mubr.bf16.mxu1 %v4627_v1  ;;  %v4635_v9 = vld [vmem:[%s6815_s2 + $0x90] ss:$36 sps:$4 sm:$0xff]  }
 0x218   :  { %1688 = vrot.lane.b32.xlu0 %v5806_v12, %s4841_s24  ;;  %1690 = vrot.lane.b32.xlu1 %v5811_v50, %s4841_s24 }
 0x21a   :  { %v1602_v19 = vpop.permute.xlu1 %1601  ;;  %v1600_v44 = vpop.permute.xlu0 %1599 }
 0x21b   :  { %1655 = vst.msk [vmem:[#allocation3 + $0x118] sm:$0xff] %vm757_vm11, %v1602_v19  ;;  %v1629_v59 = vsel %vm1627_vm15, %v1600_v44, %v1602_v19  ;;  %v4636_v19 = vld [vmem:[%s6815_s2 + $0x2d0] ss:$36 sps:$4 sm:$0xff]  }
 0x21c   :  { %1692 = vrot.lane.b32.xlu0 %v5819_v63, %s4841_s24  ;;  %1694 = vrot.lane.b32.xlu1 %v5823_v27, %s4841_s24 }
 0x21e   :  { %v1606_v37 = vpop.permute.xlu1 %1605  ;;  %v1604_v15 = vpop.permute.xlu0 %1603  ;;  %v1927_v18 = vld [vmem:[#allocation3 + $0x108] sm:$0xff]  ;;  %2449 = vmatmul.mubr.bf16.gmra.mrb[4].mxu0 %v4629_v34  ;;  %3638 = vmatmul.mubr.bf16.gmra.mrb[4].mxu1 %v4630_v43 }
 0x21f   :  { %1657 = vst.msk [vmem:[#allocation3 + $0x128] sm:$0xff] %vm757_vm11, %v1606_v37  ;;  %v1630_v20 = vsel %vm1627_vm15, %v1604_v15, %v1606_v37  ;;  %2519 = vmatprep.subr.bf16.mxu0 %v1927_v18  ;;  %3708 = vmatprep.subr.bf16.mxu1 %v1927_v18  ;;  %v4637_v37 = vld [vmem:[%s6815_s2 + $0xdc] ss:$36 sps:$4 sm:$0xff]  }
 0x220   :  { %1696 = vrot.lane.b32.xlu0 %v5832_v40, %s4841_s24  ;;  %1698 = vrot.lane.b32.xlu1 %v5834_v54, %s4841_s24  ;;  %v4639_v15 = vld [vmem:[%s6815_s2 + $0x31c] ss:$36 sps:$4 sm:$0xff]  }
 0x221   :  { %2520 = vmatpush1.bf16.msra.mxu0 %v1628_v11  ;;  %3709 = vmatpush1.bf16.msra.mxu1 %v1628_v11 }
 0x222   :  { %v1610_v39 = vpop.permute.xlu1 %1609  ;;  %v1608_v1 = vpop.permute.xlu0 %1607  ;;  %v1929_v60 = vld [vmem:[#allocation3 + $0x118] sm:$0xff]  ;;  %2458 = vmatprep.mubr.bf16.mxu0 %v4631_v31  ;;  %3647 = vmatprep.mubr.bf16.mxu1 %v4633_v30 }
 0x223   :  { %1659 = vst.msk [vmem:[#allocation3 + $0x138] sm:$0xff] %vm757_vm11, %v1610_v39  ;;  %v1631_v44 = vsel %vm1627_vm15, %v1608_v1, %v1610_v39  ;;  %2521 = vmatprep.subr.bf16.mxu0 %v1929_v60  ;;  %3710 = vmatprep.subr.bf16.mxu1 %v1929_v60  ;;  %v4641_v31 = vld [vmem:[%s6815_s2 + $0xd8] ss:$36 sps:$4 sm:$0xff]   ;;  %v4643_v1 = vld [vmem:[%s6815_s2 + $0x124] ss:$36 sps:$4 sm:$0xff]  }
 0x224   :  { %846 = vrot.lane.b32.xlu0 %v5454_v41, %s4842_s14  ;;  %848 = vrot.lane.b32.xlu1 %v5423_v45, %s4842_s14  ;;  %v4642_v30 = vld [vmem:[%s6815_s2 + $0x318] ss:$36 sps:$4 sm:$0xff]   ;;  %v4645_v60 = vld [vmem:[%s6815_s2 + $0x364] ss:$36 sps:$4 sm:$0xff]  }
 0x225   :  { %2522 = vmatpush1.bf16.msra.mxu0 %v1629_v59  ;;  %3711 = vmatpush1.bf16.msra.mxu1 %v1629_v59 }
 0x226   :  { %v1614_v11 = vpop.permute.xlu1 %1613  ;;  %v1612_v34 = vpop.permute.xlu0 %1611  ;;  %v1931_v43 = vld [vmem:[#allocation3 + $0x128] sm:$0xff]  ;;  %2459 = vmatmul.mubr.bf16.gmra.mrb[8].mxu0 %v4635_v9  ;;  %3648 = vmatmul.mubr.bf16.gmra.mrb[8].mxu1 %v4636_v19 }
 0x227   :  { %1661 = vst.msk [vmem:[#allocation3 + $0x148] sm:$0xff] %vm757_vm11, %v1614_v11  ;;  %v1632_v41 = vsel %vm1627_vm15, %v1612_v34, %v1614_v11  ;;  %2523 = vmatprep.subr.bf16.mxu0 %v1931_v43  ;;  %3712 = vmatprep.subr.bf16.mxu1 %v1931_v43  ;;  %v4648_v11 = vld [vmem:[%s6815_s2 + $0x360] ss:$36 sps:$4 sm:$0xff]  }
 0x228   :  { %852 = vrot.lane.b32.xlu1 %v5440_v38, %s4842_s14  ;;  %850 = vrot.lane.b32.xlu0 %v5475_v25, %s4842_s14 }
 0x229   :  { %2524 = vmatpush1.bf16.msra.mxu0 %v1630_v20  ;;  %3713 = vmatpush1.bf16.msra.mxu1 %v1630_v20 }
 0x22a   :  { %v1618_v45 = vpop.permute.xlu1 %1617  ;;  %v1616_v59 = vpop.permute.xlu0 %1615  ;;  %v1933_v18 = vld [vmem:[#allocation3 + $0x138] sm:$0xff]  ;;  %2468 = vmatprep.mubr.bf16.mxu0 %v4637_v37  ;;  %3657 = vmatprep.mubr.bf16.mxu1 %v4639_v15  ;;  %v4649_v37 = vld [vmem:[%s6815_s2 + $0x16c] ss:$36 sps:$4 sm:$0xff]  }
 0x22b   :  { %1663 = vst.msk [vmem:[#allocation3 + $0x158] sm:$0xff] %vm757_vm11, %v1618_v45  ;;  %v1633_v38 = vsel %vm1627_vm15, %v1616_v59, %v1618_v45  ;;  %2525 = vmatprep.subr.bf16.mxu0 %v1933_v18  ;;  %3714 = vmatprep.subr.bf16.mxu1 %v1933_v18  ;;  %v4651_v15 = vld [vmem:[%s6815_s2 + $0x3ac] ss:$36 sps:$4 sm:$0xff]  }
 0x22c   :  { %856 = vrot.lane.b32.xlu1 %v5459_v16, %s4842_s14  ;;  %854 = vrot.lane.b32.xlu0 %v5495_v62, %s4842_s14  ;;  %v4653_v59 = vld [vmem:[%s6815_s2 + $0x168] ss:$36 sps:$4 sm:$0xff]  }
 0x22d   :  { %2526 = vmatpush1.bf16.msra.mxu0 %v1631_v44  ;;  %3715 = vmatpush1.bf16.msra.mxu1 %v1631_v44  ;;  %v4647_v44 = vld [vmem:[%s6815_s2 + $0x120] ss:$36 sps:$4 sm:$0xff]   ;;  %v4654_v18 = vld [vmem:[%s6815_s2 + $0x3a8] ss:$36 sps:$4 sm:$0xff]  }
 0x22e   :  { %v1622_v25 = vpop.permute.xlu1 %1621  ;;  %v1620_v20 = vpop.permute.xlu0 %1619  ;;  %v1935_v39 = vld [vmem:[#allocation3 + $0x148] sm:$0xff]  ;;  %2469 = vmatmul.mubr.bf16.gmra.mrb[12].mxu0 %v4641_v31  ;;  %3658 = vmatmul.mubr.bf16.gmra.mrb[12].mxu1 %v4642_v30 }
 0x22f   :  { %1665 = vst.msk [vmem:[#allocation3 + $0x168] sm:$0xff] %vm757_vm11, %v1622_v25  ;;  %v1634_v16 = vsel %vm1627_vm15, %v1620_v20, %v1622_v25  ;;  %2527 = vmatprep.subr.bf16.mxu0 %v1935_v39  ;;  %3716 = vmatprep.subr.bf16.mxu1 %v1935_v39  ;;  %v4657_v25 = vld [vmem:[%s6815_s2 + $0x3f4] ss:$36 sps:$4 sm:$0xff]  }
 0x230   :  { %860 = vrot.lane.b32.xlu1 %v5480_v48, %s4842_s14  ;;  %858 = vrot.lane.b32.xlu0 %v5511_v13, %s4842_s14 }
 0x231   :  { %2528 = vmatpush1.bf16.msra.mxu0 %v1632_v41  ;;  %3717 = vmatpush1.bf16.msra.mxu1 %v1632_v41 }
 0x232   :  { %v1626_v62 = vpop.permute.xlu1 %1625  ;;  %v1624_v9 = vpop.permute.xlu0 %1623  ;;  %v1937_v19 = vld [vmem:[#allocation3 + $0x158] sm:$0xff]  ;;  %2478 = vmatprep.mubr.bf16.mxu0 %v4643_v1  ;;  %3667 = vmatprep.mubr.bf16.mxu1 %v4645_v60  ;;  %v4659_v1 = vld [vmem:[%s6815_s2 + $0x1b0] ss:$36 sps:$4 sm:$0xff]  }
 0x233   :  { %1667 = vst.msk [vmem:[#allocation3 + $0x178] sm:$0xff] %vm757_vm11, %v1626_v62  ;;  %v1635_v48 = vsel %vm1627_vm15, %v1624_v9, %v1626_v62  ;;  %2529 = vmatprep.subr.bf16.mxu0 %v1937_v19  ;;  %3718 = vmatprep.subr.bf16.mxu1 %v1937_v19  ;;  %v4660_v60 = vld [vmem:[%s6815_s2 + $0x3f0] ss:$36 sps:$4 sm:$0xff]   ;;  %v4661_v9 = vld [vmem:[%s6815_s2 + $0x1fc] ss:$36 sps:$4 sm:$0xff]  }
 0x234   :  { %864 = vrot.lane.b32.xlu1 %v5501_v22, %s4842_s14  ;;  %862 = vrot.lane.b32.xlu0 %v5522_v10, %s4842_s14  ;;  %v4663_v19 = vld [vmem:[%s6815_s2 + $0x43c] ss:$36 sps:$4 sm:$0xff]  }
 0x235   :  { %2530 = vmatpush1.bf16.msra.mxu0 %v1633_v38  ;;  %3719 = vmatpush1.bf16.msra.mxu1 %v1633_v38  ;;  %v4655_v38 = vld [vmem:[%s6815_s2 + $0x1b4] ss:$36 sps:$4 sm:$0xff]  }
 0x236   :  { %v776_v13 = vpop.permute.xlu1 %775  ;;  %v774_v34 = vpop.permute.xlu0 %773  ;;  %v1939_v43 = vld [vmem:[#allocation3 + $0x168] sm:$0xff]  ;;  %2479 = vmatmul.mubr.bf16.gmra.mrb[16].mxu0 %v4647_v44  ;;  %3668 = vmatmul.mubr.bf16.gmra.mrb[16].mxu1 %v4648_v11 }
 0x237   :  { %831 = vst.msk [vmem:[#allocation3 + $0x188] sm:$0xff] %vm757_vm11, %v776_v13  ;;  %v806_v22 = vsel %vm805_vm0, %v774_v34, %v776_v13  ;;  %2531 = vmatprep.subr.bf16.mxu0 %v1939_v43  ;;  %3720 = vmatprep.subr.bf16.mxu1 %v1939_v43  ;;  %v4666_v13 = vld [vmem:[%s6815_s2 + $0x438] ss:$36 sps:$4 sm:$0xff]  }
 0x238   :  { %868 = vrot.lane.b32.xlu1 %v5515_v36, %s4842_s14  ;;  %866 = vrot.lane.b32.xlu0 %v5531_v42, %s4842_s14 }
 0x239   :  { %2532 = vmatpush1.bf16.msra.mxu0 %v1634_v16  ;;  %3721 = vmatpush1.bf16.msra.mxu1 %v1634_v16 }
 0x23a   :  { %v780_v10 = vpop.permute.xlu1 %779  ;;  %v778_v41 = vpop.permute.xlu0 %777  ;;  %v1941_v45 = vld [vmem:[#allocation3 + $0x178] sm:$0xff]  ;;  %2488 = vmatprep.mubr.bf16.mxu0 %v4649_v37  ;;  %3677 = vmatprep.mubr.bf16.mxu1 %v4651_v15  ;;  %v4669_v37 = vld [vmem:[%s6815_s2 + $0xc] ss:$36 sps:$4 sm:$0xff]  }
 0x23b   :  { %833 = vst.msk [vmem:[#allocation3 + $0x198] sm:$0xff] %vm757_vm11, %v780_v10  ;;  %v807_v36 = vsel %vm805_vm0, %v778_v41, %v780_v10  ;;  %2533 = vmatprep.subr.bf16.mxu0 %v1941_v45  ;;  %3722 = vmatprep.subr.bf16.mxu1 %v1941_v45  ;;  %v4672_v15 = vld [vmem:[%s6815_s2 + $0x24c] ss:$36 sps:$4 sm:$0xff]  }
 0x23c   :  { %872 = vrot.lane.b32.xlu1 %v5539_v61, %s4842_s14  ;;  %870 = vrot.lane.b32.xlu0 %v5549_v14, %s4842_s14 }
 0x23d   :  { %2534 = vmatpush1.bf16.msra.mxu0 %v1635_v48  ;;  %3723 = vmatpush1.bf16.msra.mxu1 %v1635_v48  ;;  %v4665_v48 = vld [vmem:[%s6815_s2 + $0x1f8] ss:$36 sps:$4 sm:$0xff]  }
 0x23e   :  { %v784_v42 = vpop.permute.xlu1 %783  ;;  %v782_v31 = vpop.permute.xlu0 %781  ;;  %v1943_v30 = vld [vmem:[#allocation3 + $0x188] sm:$0xff]  ;;  %2489 = vmatmul.mubr.bf16.gmra.mrb[20].mxu0 %v4653_v59  ;;  %3678 = vmatmul.mubr.bf16.gmra.mrb[20].mxu1 %v4654_v18 }
 0x23f   :  { %835 = vst.msk [vmem:[#allocation3 + $0x1a8] sm:$0xff] %vm757_vm11, %v784_v42  ;;  %v808_v61 = vsel %vm805_vm0, %v782_v31, %v784_v42  ;;  %2535 = vmatprep.subr.bf16.mxu0 %v1943_v30  ;;  %3724 = vmatprep.subr.bf16.mxu1 %v1943_v30 }
 0x240   :  { %876 = vrot.lane.b32.xlu1 %v5557_v57, %s4842_s14  ;;  %874 = vrot.lane.b32.xlu0 %v5567_v52, %s4842_s14  ;;  %s4843_s14 = smov 83  }
 0x241   :  { %2536 = vmatpush1.bf16.msra.mxu0 %v806_v22  ;;  %3725 = vmatpush1.bf16.msra.mxu1 %v806_v22 }
 0x242   :  { %v788_v14 = vpop.permute.xlu1 %787  ;;  %v786_v20 = vpop.permute.xlu0 %785  ;;  %v1945_v39 = vld [vmem:[#allocation3 + $0x198] sm:$0xff]  ;;  %2498 = vmatprep.mubr.bf16.mxu0 %v4655_v38  ;;  %3687 = vmatprep.mubr.bf16.mxu1 %v4657_v25 }
 0x243   :  { %837 = vst.msk [vmem:[#allocation3 + $0x1b8] sm:$0xff] %vm757_vm11, %v788_v14  ;;  %v809_v57 = vsel %vm805_vm0, %v786_v20, %v788_v14  ;;  %2537 = vmatprep.subr.bf16.mxu0 %v1945_v39  ;;  %3726 = vmatprep.subr.bf16.mxu1 %v1945_v39  ;;  %v4675_v38 = vld [vmem:[%s6815_s2 + $0x294] ss:$36 sps:$4 sm:$0xff]  }
 0x244   :  { %1409 = vrot.lane.b32.xlu1 %v6820_v26, %s4843_s14  ;;  %1407 = vrot.lane.b32.xlu0 %v5594_v5, %s4843_s14 }
 0x245   :  { %2538 = vmatpush1.bf16.msra.mxu0 %v807_v36  ;;  %3727 = vmatpush1.bf16.msra.mxu1 %v807_v36 }
 0x246   :  { %v792_v52 = vpop.permute.xlu1 %791  ;;  %v790_v16 = vpop.permute.xlu0 %789  ;;  %v1947_v62 = vld [vmem:[#allocation3 + $0x1a8] sm:$0xff]  ;;  %2499 = vmatmul.mubr.bf16.gmra.mrb[24].mxu0 %v4659_v1  ;;  %3688 = vmatmul.mubr.bf16.gmra.mrb[24].mxu1 %v4660_v60 }
 0x247   :  { %839 = vst.msk [vmem:[#allocation3 + $0x1c8] sm:$0xff] %vm757_vm11, %v792_v52  ;;  %v810_v26 = vsel %vm805_vm0, %v790_v16, %v792_v52  ;;  %2539 = vmatprep.subr.bf16.mxu0 %v1947_v62  ;;  %3728 = vmatprep.subr.bf16.mxu1 %v1947_v62 }
 0x248   :  { %1413 = vrot.lane.b32.xlu1 %v5596_v24, %s4843_s14  ;;  %1411 = vrot.lane.b32.xlu0 %v5612_v58, %s4843_s14 }
 0x249   :  { %2540 = vmatpush1.bf16.msra.mxu0 %v808_v61  ;;  %3729 = vmatpush1.bf16.msra.mxu1 %v808_v61 }
 0x24a   :  { %v796_v5 = vpop.permute.xlu1 %795  ;;  %v794_v44 = vpop.permute.xlu0 %793  ;;  %v1949_v11 = vld [vmem:[#allocation3 + $0x1b8] sm:$0xff]  ;;  %2508 = vmatprep.mubr.bf16.mxu0 %v4661_v9  ;;  %3697 = vmatprep.mubr.bf16.mxu1 %v4663_v19 }
 0x24b   :  { %841 = vst.msk [vmem:[#allocation3 + $0x1d8] sm:$0xff] %vm757_vm11, %v796_v5  ;;  %v811_v24 = vsel %vm805_vm0, %v794_v44, %v796_v5  ;;  %2541 = vmatprep.subr.bf16.mxu0 %v1949_v11  ;;  %3730 = vmatprep.subr.bf16.mxu1 %v1949_v11 }
 0x24c   :  { %1417 = vrot.lane.b32.xlu1 %v5614_v21, %s4843_s14  ;;  %1415 = vrot.lane.b32.xlu0 %v5630_v17, %s4843_s14 }
 0x24d   :  { %2542 = vmatpush1.bf16.msra.mxu0 %v809_v57  ;;  %3731 = vmatpush1.bf16.msra.mxu1 %v809_v57 }
 0x24e   :  { %v800_v58 = vpop.permute.xlu1 %799  ;;  %v798_v34 = vpop.permute.xlu0 %797  ;;  %v1951_v43 = vld [vmem:[#allocation3 + $0x1c8] sm:$0xff]  ;;  %2509 = vmatmul.mubr.bf16.gmra.mrb[28].mxu0 %v4665_v48  ;;  %3698 = vmatmul.mubr.bf16.gmra.mrb[28].mxu1 %v4666_v13 }
 0x24f   :  { %843 = vst.msk [vmem:[#allocation3 + $0x1e8] sm:$0xff] %vm757_vm11, %v800_v58  ;;  %v812_v21 = vsel %vm805_vm0, %v798_v34, %v800_v58  ;;  %2543 = vmatprep.subr.bf16.mxu0 %v1951_v43  ;;  %3732 = vmatprep.subr.bf16.mxu1 %v1951_v43 }
 0x250   :  { %1421 = vrot.lane.b32.xlu1 %v5632_v33, %s4843_s14  ;;  %1419 = vrot.lane.b32.xlu0 %v5648_v47, %s4843_s14 }
 0x251   :  { %2544 = vmatpush1.bf16.msra.mxu0 %v810_v26  ;;  %3733 = vmatpush1.bf16.msra.mxu1 %v810_v26 }
 0x252   :  { %v804_v17 = vpop.permute.xlu1 %803  ;;  %v802_v22 = vpop.permute.xlu0 %801  ;;  %v1953_v10 = vld [vmem:[#allocation3 + $0x1d8] sm:$0xff]  ;;  %2551 = vmatprep.mubr.bf16.mxu0 %v4669_v37  ;;  %3740 = vmatprep.mubr.bf16.mxu1 %v4672_v15 }
 0x253   :  { %845 = vst.msk [vmem:[#allocation3 + $0x1f8] sm:$0xff] %vm757_vm11, %v804_v17  ;;  %v813_v41 = vsel %vm805_vm0, %v802_v22, %v804_v17  ;;  %2545 = vmatprep.subr.bf16.mxu0 %v1953_v10  ;;  %3734 = vmatprep.subr.bf16.mxu1 %v1953_v10 }
 0x254   :  { %1425 = vrot.lane.b32.xlu1 %v5650_v49, %s4843_s14  ;;  %1423 = vrot.lane.b32.xlu0 %v5666_v7, %s4843_s14 }
 0x255   :  { %2546 = vmatpush1.bf16.msra.mxu0 %v811_v24  ;;  %3735 = vmatpush1.bf16.msra.mxu1 %v811_v24 }
 0x256   :  { %v1337_v33 = vpop.permute.xlu1 %1336  ;;  %v1335_v47 = vpop.permute.xlu0 %1334  ;;  %v1955_v45 = vld [vmem:[#allocation3 + $0x1e8] sm:$0xff] }
 0x257   :  { %1392 = vst.msk [vmem:[#allocation3 + $0x208] sm:$0xff] %vm757_vm11, %v1337_v33  ;;  %v1367_v59 = vsel %vm1366_vm1, %v1335_v47, %v1337_v33  ;;  %2547 = vmatprep.subr.bf16.mxu0 %v1955_v45  ;;  %3736 = vmatprep.subr.bf16.mxu1 %v1955_v45 }
 0x258   :  { %1429 = vrot.lane.b32.xlu1 %v5668_v3, %s4843_s14  ;;  %1427 = vrot.lane.b32.xlu0 %v5684_v53, %s4843_s14  ;;  %v4667_v3 = vld [vmem:[%s6815_s2 + $0x8] ss:$36 sps:$4 sm:$0xff]  }
 0x259   :  { %2548 = vmatpush1.bf16.msra.mxu0 %v812_v21  ;;  %3737 = vmatpush1.bf16.msra.mxu1 %v812_v21  ;;  %v4670_v53 = vld [vmem:[%s6815_s2 + $0x248] ss:$36 sps:$4 sm:$0xff]  }
 0x25a   :  { %v1341_v49 = vpop.permute.xlu1 %1340  ;;  %v1339_v7 = vpop.permute.xlu0 %1338  ;;  %v1957_v18 = vld [vmem:[#allocation3 + $0x1f8] sm:$0xff] }
 0x25b   :  { %1394 = vst.msk [vmem:[#allocation3 + $0x218] sm:$0xff] %vm757_vm11, %v1341_v49  ;;  %v1368_v36 = vsel %vm1366_vm1, %v1339_v7, %v1341_v49  ;;  %2549 = vmatprep.subr.bf16.mxu0 %v1957_v18  ;;  %3738 = vmatprep.subr.bf16.mxu1 %v1957_v18  ;;  %v4703_v18 = vld [vmem:[%s6815_s2 + $0x1bc] ss:$36 sps:$4 sm:$0xff]  }
 0x25c   :  { %1433 = vrot.lane.b32.xlu1 %v5686_v32, %s4843_s14  ;;  %1431 = vrot.lane.b32.xlu0 %v5702_v35, %s4843_s14  ;;  %v4673_v35 = vld [vmem:[%s6815_s2 + $0x54] ss:$36 sps:$4 sm:$0xff]  }
 0x25d   :  { %2550 = vmatpush1.bf16.msra.mxu0 %v813_v41  ;;  %3739 = vmatpush1.bf16.msra.mxu1 %v813_v41 }
 0x25e   :  { %v1345_v42 = vpop.permute.xlu1 %1344  ;;  %v1343_v31 = vpop.permute.xlu0 %1342  ;;  %v1959_v30 = vld [vmem:[#allocation3 + $0x208] sm:$0xff] }
 0x25f   :  { %1396 = vst.msk [vmem:[#allocation3 + $0x228] sm:$0xff] %vm757_vm11, %v1345_v42  ;;  %v1369_v32 = vsel %vm1366_vm1, %v1343_v31, %v1345_v42  ;;  %2632 = vmatprep.subr.bf16.mxu0 %v1959_v30  ;;  %3821 = vmatprep.subr.bf16.mxu1 %v1959_v30 }
 0x260   :  { %2552 = vmatmul.mubr.bf16.vlgmr.msra.gmra.mrb[0].mxu0 %v4667_v3  ;;  %3741 = vmatmul.mubr.bf16.vlgmr.msra.gmra.mrb[0].mxu1 %v4670_v53 }
 0x261   :  { %1437 = vrot.lane.b32.xlu1 %v5704_v56, %s4843_s14  ;;  %1435 = vrot.lane.b32.xlu0 %v5717_v2, %s4843_s14  ;;  %v4677_v56 = vld [vmem:[%s6815_s2 + $0x50] ss:$36 sps:$4 sm:$0xff]  }
 0x262   :  { %2633 = vmatpush1.bf16.msra.mxu0 %v1367_v59  ;;  %3822 = vmatpush1.bf16.msra.mxu1 %v1367_v59  ;;  %v1349_v25 = vpop.permute.xlu1 %1348  ;;  %v1347_v61 = vpop.permute.xlu0 %1346  ;;  %v1961_v14 = vld [vmem:[#allocation3 + $0x218] sm:$0xff]  ;;  %v4678_v2 = vld [vmem:[%s6815_s2 + $0x290] ss:$36 sps:$4 sm:$0xff]  }
 0x263   :  { %1398 = vst.msk [vmem:[#allocation3 + $0x238] sm:$0xff] %vm757_vm11, %v1349_v25  ;;  %v1370_v20 = vsel %vm1366_vm1, %v1347_v61, %v1349_v25  ;;  %2634 = vmatprep.subr.bf16.mxu0 %v1961_v14  ;;  %3823 = vmatprep.subr.bf16.mxu1 %v1961_v14  ;;  %v4707_v25 = vld [vmem:[%s6815_s2 + $0x1b8] ss:$36 sps:$4 sm:$0xff]   ;;  %v4709_v14 = vld [vmem:[%s6815_s2 + $0x204] ss:$36 sps:$4 sm:$0xff]  }
 0x264   :  { %2561 = vmatprep.mubr.bf16.mxu0 %v4673_v35  ;;  %3750 = vmatprep.mubr.bf16.mxu1 %v4675_v38  ;;  %v4708_v61 = vld [vmem:[%s6815_s2 + $0x3f8] ss:$36 sps:$4 sm:$0xff]  }
 0x265   :  { %1743 = vrot.lane.b32.xlu1 %v5739_v28, %s4844_s15  ;;  %1741 = vrot.lane.b32.xlu0 %v5737_v8, %s4844_s15  ;;  %v4679_v28 = vld [vmem:[%s6815_s2 + $0x9c] ss:$36 sps:$4 sm:$0xff]  }
 0x266   :  { %2635 = vmatpush1.bf16.msra.mxu0 %v1368_v36  ;;  %3824 = vmatpush1.bf16.msra.mxu1 %v1368_v36  ;;  %v1353_v39 = vpop.permute.xlu1 %1352  ;;  %v1351_v1 = vpop.permute.xlu0 %1350  ;;  %v1963_v60 = vld [vmem:[#allocation3 + $0x228] sm:$0xff]  ;;  %v4681_v8 = vld [vmem:[%s6815_s2 + $0x2dc] ss:$36 sps:$4 sm:$0xff]  }
 0x267   :  { %1400 = vst.msk [vmem:[#allocation3 + $0x248] sm:$0xff] %vm757_vm11, %v1353_v39  ;;  %v1371_v57 = vsel %vm1366_vm1, %v1351_v1, %v1353_v39  ;;  %2636 = vmatprep.subr.bf16.mxu0 %v1963_v60  ;;  %3825 = vmatprep.subr.bf16.mxu1 %v1963_v60  ;;  %v4705_v36 = vld [vmem:[%s6815_s2 + $0x3fc] ss:$36 sps:$4 sm:$0xff]  }
 0x268   :  { %2562 = vmatmul.mubr.bf16.gmra.mrb[4].mxu0 %v4677_v56  ;;  %3751 = vmatmul.mubr.bf16.gmra.mrb[4].mxu1 %v4678_v2 }
 0x269   :  { %1747 = vrot.lane.b32.xlu1 %v5756_v23, %s4844_s15  ;;  %1745 = vrot.lane.b32.xlu0 %v5751_v6, %s4844_s15  ;;  %v4683_v23 = vld [vmem:[%s6815_s2 + $0x98] ss:$36 sps:$4 sm:$0xff]  }
 0x26a   :  { %2637 = vmatpush1.bf16.msra.mxu0 %v1369_v32  ;;  %3826 = vmatpush1.bf16.msra.mxu1 %v1369_v32  ;;  %v1357_v52 = vpop.permute.xlu1 %1356  ;;  %v1355_v16 = vpop.permute.xlu0 %1354  ;;  %v1965_v62 = vld [vmem:[#allocation3 + $0x238] sm:$0xff] }
 0x26b   :  { %1402 = vst.msk [vmem:[#allocation3 + $0x258] sm:$0xff] %vm757_vm11, %v1357_v52  ;;  %v1372_v9 = vsel %vm1366_vm1, %v1355_v16, %v1357_v52  ;;  %2638 = vmatprep.subr.bf16.mxu0 %v1965_v62  ;;  %3827 = vmatprep.subr.bf16.mxu1 %v1965_v62  ;;  %v4684_v6 = vld [vmem:[%s6815_s2 + $0x2d8] ss:$36 sps:$4 sm:$0xff]   ;;  %v4713_v52 = vld [vmem:[%s6815_s2 + $0x200] ss:$36 sps:$4 sm:$0xff]  }
 0x26c   :  { %2571 = vmatprep.mubr.bf16.mxu0 %v4679_v28  ;;  %3760 = vmatprep.mubr.bf16.mxu1 %v4681_v8  ;;  %v4714_v16 = vld [vmem:[%s6815_s2 + $0x440] ss:$36 sps:$4 sm:$0xff]   ;;  %v4717_v62 = vld [vmem:[%s6815_s2 + $0x14] ss:$36 sps:$4 sm:$0xff]  }
 0x26d   :  { %1751 = vrot.lane.b32.xlu1 %v5770_v46, %s4844_s15  ;;  %1749 = vrot.lane.b32.xlu0 %v5765_v29, %s4844_s15  ;;  %v4685_v46 = vld [vmem:[%s6815_s2 + $0xe4] ss:$36 sps:$4 sm:$0xff]  }
 0x26e   :  { %2639 = vmatpush1.bf16.msra.mxu0 %v1370_v20  ;;  %3828 = vmatpush1.bf16.msra.mxu1 %v1370_v20  ;;  %v1361_v19 = vpop.permute.xlu1 %1360  ;;  %v1359_v26 = vpop.permute.xlu0 %1358  ;;  %v1967_v5 = vld [vmem:[#allocation3 + $0x248] sm:$0xff] }
 0x26f   :  { %1404 = vst.msk [vmem:[#allocation3 + $0x268] sm:$0xff] %vm757_vm11, %v1361_v19  ;;  %v1373_v44 = vsel %vm1366_vm1, %v1359_v26, %v1361_v19  ;;  %2640 = vmatprep.subr.bf16.mxu0 %v1967_v5  ;;  %3829 = vmatprep.subr.bf16.mxu1 %v1967_v5  ;;  %v4687_v29 = vld [vmem:[%s6815_s2 + $0x324] ss:$36 sps:$4 sm:$0xff]  }
 0x270   :  { %2572 = vmatmul.mubr.bf16.gmra.mrb[8].mxu0 %v4683_v23  ;;  %3761 = vmatmul.mubr.bf16.gmra.mrb[8].mxu1 %v4684_v6  ;;  %v4711_v20 = vld [vmem:[%s6815_s2 + $0x444] ss:$36 sps:$4 sm:$0xff]  }
 0x271   :  { %1755 = vrot.lane.b32.xlu1 %v5784_v0, %s4844_s15  ;;  %1753 = vrot.lane.b32.xlu0 %v5779_v55, %s4844_s15  ;;  %v4689_v0 = vld [vmem:[%s6815_s2 + $0xe0] ss:$36 sps:$4 sm:$0xff]  }
 0x272   :  { %2641 = vmatpush1.bf16.msra.mxu0 %v1371_v57  ;;  %3830 = vmatpush1.bf16.msra.mxu1 %v1371_v57  ;;  %v1365_v11 = vpop.permute.xlu1 %1364  ;;  %v1363_v48 = vpop.permute.xlu0 %1362  ;;  %v1969_v13 = vld [vmem:[#allocation3 + $0x258] sm:$0xff]  ;;  %v4690_v55 = vld [vmem:[%s6815_s2 + $0x320] ss:$36 sps:$4 sm:$0xff]  }
 0x273   :  { %1406 = vst.msk [vmem:[#allocation3 + $0x278] sm:$0xff] %vm757_vm11, %v1365_v11  ;;  %v1374_v24 = vsel %vm1366_vm1, %v1363_v48, %v1365_v11  ;;  %2642 = vmatprep.subr.bf16.mxu0 %v1969_v13  ;;  %3831 = vmatprep.subr.bf16.mxu1 %v1969_v13  ;;  %v4715_v11 = vld [vmem:[%s6815_s2 + $0x10] ss:$36 sps:$4 sm:$0xff]  }
 0x274   :  { %2581 = vmatprep.mubr.bf16.mxu0 %v4685_v46  ;;  %3770 = vmatprep.mubr.bf16.mxu1 %v4687_v29  ;;  %v4718_v48 = vld [vmem:[%s6815_s2 + $0x250] ss:$36 sps:$4 sm:$0xff]  }
 0x275   :  { %1759 = vrot.lane.b32.xlu1 %v5798_v4, %s4844_s15  ;;  %1757 = vrot.lane.b32.xlu0 %v5793_v51, %s4844_s15  ;;  %v4691_v4 = vld [vmem:[%s6815_s2 + $0x12c] ss:$36 sps:$4 sm:$0xff]  }
 0x276   :  { %2643 = vmatpush1.bf16.msra.mxu0 %v1372_v9  ;;  %3832 = vmatpush1.bf16.msra.mxu1 %v1372_v9  ;;  %v1671_v58 = vpop.permute.xlu1 %1670  ;;  %v1669_v34 = vpop.permute.xlu0 %1668  ;;  %v1971_v43 = vld [vmem:[#allocation3 + $0x268] sm:$0xff]  ;;  %v4720_v9 = vld [vmem:[%s6815_s2 + $0x254] ss:$36 sps:$4 sm:$0xff]  }
 0x277   :  { %1726 = vst.msk [vmem:[#allocation3 + $0x288] sm:$0xff] %vm757_vm11, %v1671_v58  ;;  %v1701_v37 = vsel %vm1700_vm2, %v1669_v34, %v1671_v58  ;;  %2644 = vmatprep.subr.bf16.mxu0 %v1971_v43  ;;  %3833 = vmatprep.subr.bf16.mxu1 %v1971_v43  ;;  %v4693_v51 = vld [vmem:[%s6815_s2 + $0x36c] ss:$36 sps:$4 sm:$0xff]   ;;  %v4721_v58 = vld [vmem:[%s6815_s2 + $0x5c] ss:$36 sps:$4 sm:$0xff]  }
 0x278   :  { %2582 = vmatmul.mubr.bf16.gmra.mrb[12].mxu0 %v4689_v0  ;;  %3771 = vmatmul.mubr.bf16.gmra.mrb[12].mxu1 %v4690_v55  ;;  %v4723_v34 = vld [vmem:[%s6815_s2 + $0x29c] ss:$36 sps:$4 sm:$0xff]  }
 0x279   :  { %1763 = vrot.lane.b32.xlu1 %v5811_v50, %s4844_s15  ;;  %1761 = vrot.lane.b32.xlu0 %v5806_v12, %s4844_s15  ;;  %v4695_v50 = vld [vmem:[%s6815_s2 + $0x128] ss:$36 sps:$4 sm:$0xff]  }
 0x27a   :  { %2645 = vmatpush1.bf16.msra.mxu0 %v1373_v44  ;;  %3834 = vmatpush1.bf16.msra.mxu1 %v1373_v44  ;;  %v1675_v15 = vpop.permute.xlu1 %1674  ;;  %v1673_v21 = vpop.permute.xlu0 %1672  ;;  %v1973_v17 = vld [vmem:[#allocation3 + $0x278] sm:$0xff]  ;;  %v4696_v12 = vld [vmem:[%s6815_s2 + $0x368] ss:$36 sps:$4 sm:$0xff]  }
 0x27b   :  { %1728 = vst.msk [vmem:[#allocation3 + $0x298] sm:$0xff] %vm757_vm11, %v1675_v15  ;;  %v1702_v22 = vsel %vm1700_vm2, %v1673_v21, %v1675_v15  ;;  %2646 = vmatprep.subr.bf16.mxu0 %v1973_v17  ;;  %3835 = vmatprep.subr.bf16.mxu1 %v1973_v17  ;;  %v4725_v15 = vld [vmem:[%s6815_s2 + $0x58] ss:$36 sps:$4 sm:$0xff]  }
 0x27c   :  { %2591 = vmatprep.mubr.bf16.mxu0 %v4691_v4  ;;  %3780 = vmatprep.mubr.bf16.mxu1 %v4693_v51  ;;  %v4726_v21 = vld [vmem:[%s6815_s2 + $0x298] ss:$36 sps:$4 sm:$0xff]  }
 0x27d   :  { %1767 = vrot.lane.b32.xlu1 %v5823_v27, %s4844_s15  ;;  %1765 = vrot.lane.b32.xlu0 %v5819_v63, %s4844_s15  ;;  %v4697_v27 = vld [vmem:[%s6815_s2 + $0x174] ss:$36 sps:$4 sm:$0xff]  }
 0x27e   :  { %2647 = vmatpush1.bf16.msra.mxu0 %v1374_v24  ;;  %3836 = vmatpush1.bf16.msra.mxu1 %v1374_v24  ;;  %v1679_v10 = vpop.permute.xlu1 %1678  ;;  %v1677_v41 = vpop.permute.xlu0 %1676  ;;  %v1975_v33 = vld [vmem:[#allocation3 + $0x288] sm:$0xff]  ;;  %v4699_v63 = vld [vmem:[%s6815_s2 + $0x3b4] ss:$36 sps:$4 sm:$0xff]  }
 0x27f   :  { %1730 = vst.msk [vmem:[#allocation3 + $0x2a8] sm:$0xff] %vm757_vm11, %v1679_v10  ;;  %v1703_v47 = vsel %vm1700_vm2, %v1677_v41, %v1679_v10  ;;  %2648 = vmatprep.subr.bf16.mxu0 %v1975_v33  ;;  %3837 = vmatprep.subr.bf16.mxu1 %v1975_v33  ;;  %v4727_v10 = vld [vmem:[%s6815_s2 + $0xa4] ss:$36 sps:$4 sm:$0xff]  }
 0x280   :  { %2592 = vmatmul.mubr.bf16.gmra.mrb[16].mxu0 %v4695_v50  ;;  %3781 = vmatmul.mubr.bf16.gmra.mrb[16].mxu1 %v4696_v12  ;;  %v4729_v41 = vld [vmem:[%s6815_s2 + $0x2e4] ss:$36 sps:$4 sm:$0xff]  }
 0x281   :  { %1771 = vrot.lane.b32.xlu1 %v5834_v54, %s4844_s15  ;;  %1769 = vrot.lane.b32.xlu0 %v5832_v40, %s4844_s15  ;;  %v4701_v54 = vld [vmem:[%s6815_s2 + $0x170] ss:$36 sps:$4 sm:$0xff]  }
 0x282   :  { %2649 = vmatpush1.bf16.msra.mxu0 %v1701_v37  ;;  %3838 = vmatpush1.bf16.msra.mxu1 %v1701_v37  ;;  %v1683_v45 = vpop.permute.xlu1 %1682  ;;  %v1681_v59 = vpop.permute.xlu0 %1680  ;;  %v1977_v49 = vld [vmem:[#allocation3 + $0x298] sm:$0xff]  ;;  %v4702_v40 = vld [vmem:[%s6815_s2 + $0x3b0] ss:$36 sps:$4 sm:$0xff]  }
 0x283   :  { %1732 = vst.msk [vmem:[#allocation3 + $0x2b8] sm:$0xff] %vm757_vm11, %v1683_v45  ;;  %v1704_v7 = vsel %vm1700_vm2, %v1681_v59, %v1683_v45  ;;  %2650 = vmatprep.subr.bf16.mxu0 %v1977_v49  ;;  %3839 = vmatprep.subr.bf16.mxu1 %v1977_v49  ;;  %v4731_v45 = vld [vmem:[%s6815_s2 + $0xa0] ss:$36 sps:$4 sm:$0xff]  }
 0x284   :  { %2601 = vmatprep.mubr.bf16.mxu0 %v4697_v27  ;;  %3790 = vmatprep.mubr.bf16.mxu1 %v4699_v63  ;;  %v4732_v59 = vld [vmem:[%s6815_s2 + $0x2e0] ss:$36 sps:$4 sm:$0xff]  }
 0x286   :  { %2651 = vmatpush1.bf16.msra.mxu0 %v1702_v22  ;;  %3840 = vmatpush1.bf16.msra.mxu1 %v1702_v22  ;;  %v1687_v3 = vpop.permute.xlu1 %1686  ;;  %v1685_v53 = vpop.permute.xlu0 %1684  ;;  %v1979_v42 = vld [vmem:[#allocation3 + $0x2a8] sm:$0xff] }
 0x287   :  { %1734 = vst.msk [vmem:[#allocation3 + $0x2c8] sm:$0xff] %vm757_vm11, %v1687_v3  ;;  %v1705_v31 = vsel %vm1700_vm2, %v1685_v53, %v1687_v3  ;;  %2652 = vmatprep.subr.bf16.mxu0 %v1979_v42  ;;  %3841 = vmatprep.subr.bf16.mxu1 %v1979_v42 }
 0x288   :  { %2602 = vmatmul.mubr.bf16.gmra.mrb[20].mxu0 %v4701_v54  ;;  %3791 = vmatmul.mubr.bf16.gmra.mrb[20].mxu1 %v4702_v40 }
 0x289   :  { %2611 = vmatprep.mubr.bf16.mxu0 %v4703_v18  ;;  %3800 = vmatprep.mubr.bf16.mxu1 %v4705_v36  ;;  %v4733_v18 = vld [vmem:[%s6815_s2 + $0xec] ss:$36 sps:$4 sm:$0xff]  }
 0x28a   :  { %2653 = vmatpush1.bf16.msra.mxu0 %v1703_v47  ;;  %3842 = vmatpush1.bf16.msra.mxu1 %v1703_v47  ;;  %v1691_v30 = vpop.permute.xlu1 %1690  ;;  %v1689_v32 = vpop.permute.xlu0 %1688  ;;  %v1981_v35 = vld [vmem:[#allocation3 + $0x2b8] sm:$0xff]  ;;  %v4735_v36 = vld [vmem:[%s6815_s2 + $0x32c] ss:$36 sps:$4 sm:$0xff]  }
 0x28b   :  { %1736 = vst.msk [vmem:[#allocation3 + $0x2d8] sm:$0xff] %vm757_vm11, %v1691_v30  ;;  %v1706_v38 = vsel %vm1700_vm2, %v1689_v32, %v1691_v30  ;;  %2654 = vmatprep.subr.bf16.mxu0 %v1981_v35  ;;  %3843 = vmatprep.subr.bf16.mxu1 %v1981_v35  ;;  %v4737_v30 = vld [vmem:[%s6815_s2 + $0xe8] ss:$36 sps:$4 sm:$0xff]  }
 0x28c   :  { %v4738_v32 = vld [vmem:[%s6815_s2 + $0x328] ss:$36 sps:$4 sm:$0xff]  }
 0x28e   :  { %2655 = vmatpush1.bf16.msra.mxu0 %v1704_v7  ;;  %3844 = vmatpush1.bf16.msra.mxu1 %v1704_v7  ;;  %v1695_v56 = vpop.permute.xlu1 %1694  ;;  %v1693_v2 = vpop.permute.xlu0 %1692  ;;  %v1983_v39 = vld [vmem:[#allocation3 + $0x2c8] sm:$0xff] }
 0x28f   :  { %1738 = vst.msk [vmem:[#allocation3 + $0x2e8] sm:$0xff] %vm757_vm11, %v1695_v56  ;;  %v1707_v1 = vsel %vm1700_vm2, %v1693_v2, %v1695_v56  ;;  %2656 = vmatprep.subr.bf16.mxu0 %v1983_v39  ;;  %3845 = vmatprep.subr.bf16.mxu1 %v1983_v39 }
 0x290   :  { %2612 = vmatmul.mubr.bf16.gmra.mrb[24].mxu0 %v4707_v25  ;;  %3801 = vmatmul.mubr.bf16.gmra.mrb[24].mxu1 %v4708_v61 }
 0x291   :  { %2621 = vmatprep.mubr.bf16.mxu0 %v4709_v14  ;;  %3810 = vmatprep.mubr.bf16.mxu1 %v4711_v20  ;;  %v4739_v14 = vld [vmem:[%s6815_s2 + $0x134] ss:$36 sps:$4 sm:$0xff]  }
 0x292   :  { %2657 = vmatpush1.bf16.msra.mxu0 %v1705_v31  ;;  %3846 = vmatpush1.bf16.msra.mxu1 %v1705_v31  ;;  %v1699_v60 = vpop.permute.xlu1 %1698  ;;  %v1697_v57 = vpop.permute.xlu0 %1696  ;;  %v1985_v28 = vld [vmem:[#allocation3 + $0x2d8] sm:$0xff] }
 0x293   :  { %1740 = vst.msk [vmem:[#allocation3 + $0x2f8] sm:$0xff] %vm757_vm11, %v1699_v60  ;;  %v1708_v8 = vsel %vm1700_vm2, %v1697_v57, %v1699_v60  ;;  %2658 = vmatprep.subr.bf16.mxu0 %v1985_v28  ;;  %3847 = vmatprep.subr.bf16.mxu1 %v1985_v28  ;;  %v4741_v20 = vld [vmem:[%s6815_s2 + $0x374] ss:$36 sps:$4 sm:$0xff]  }
 0x294   :  { %v4743_v60 = vld [vmem:[%s6815_s2 + $0x130] ss:$36 sps:$4 sm:$0xff]  }
 0x295   :  { %v4744_v57 = vld [vmem:[%s6815_s2 + $0x370] ss:$36 sps:$4 sm:$0xff]  }
 0x296   :  { %2659 = vmatpush1.bf16.msra.mxu0 %v1706_v38  ;;  %3848 = vmatpush1.bf16.msra.mxu1 %v1706_v38  ;;  %v849_v23 = vpop.permute.xlu1 %848  ;;  %v847_v6 = vpop.permute.xlu0 %846  ;;  %v1987_v19 = vld [vmem:[#allocation3 + $0x2e8] sm:$0xff] }
 0x297   :  { %904 = vst.msk [vmem:[#allocation3 + $0x308] sm:$0xff] %vm757_vm11, %v849_v23  ;;  %v879_v26 = vsel %vm878_vm3, %v847_v6, %v849_v23  ;;  %2660 = vmatprep.subr.bf16.mxu0 %v1987_v19  ;;  %3849 = vmatprep.subr.bf16.mxu1 %v1987_v19 }
 0x298   :  { %2622 = vmatmul.mubr.bf16.gmra.mrb[28].mxu0 %v4713_v52  ;;  %3811 = vmatmul.mubr.bf16.gmra.mrb[28].mxu1 %v4714_v16 }
 0x299   :  { %2664 = vmatprep.mubr.bf16.mxu0 %v4717_v62  ;;  %3853 = vmatprep.mubr.bf16.mxu1 %v4720_v9  ;;  %v4745_v62 = vld [vmem:[%s6815_s2 + $0x17c] ss:$36 sps:$4 sm:$0xff]  }
 0x29a   :  { %2661 = vmatpush1.bf16.msra.mxu0 %v1707_v1  ;;  %3850 = vmatpush1.bf16.msra.mxu1 %v1707_v1  ;;  %v853_v5 = vpop.permute.xlu1 %852  ;;  %v851_v44 = vpop.permute.xlu0 %850  ;;  %v1989_v46 = vld [vmem:[#allocation3 + $0x2f8] sm:$0xff] }
 0x29b   :  { %906 = vst.msk [vmem:[#allocation3 + $0x318] sm:$0xff] %vm757_vm11, %v853_v5  ;;  %v880_v29 = vsel %vm878_vm3, %v851_v44, %v853_v5  ;;  %2662 = vmatprep.subr.bf16.mxu0 %v1989_v46  ;;  %3851 = vmatprep.subr.bf16.mxu1 %v1989_v46  ;;  %v4747_v9 = vld [vmem:[%s6815_s2 + $0x3bc] ss:$36 sps:$4 sm:$0xff]  }
 0x29c   :  { %v4749_v5 = vld [vmem:[%s6815_s2 + $0x178] ss:$36 sps:$4 sm:$0xff]  }
 0x29d   :  { %v4750_v44 = vld [vmem:[%s6815_s2 + $0x3b8] ss:$36 sps:$4 sm:$0xff]  }
 0x29e   :  { %2663 = vmatpush1.bf16.msra.mxu0 %v1708_v8  ;;  %3852 = vmatpush1.bf16.msra.mxu1 %v1708_v8  ;;  %v857_v13 = vpop.permute.xlu1 %856  ;;  %v855_v24 = vpop.permute.xlu0 %854  ;;  %v1991_v0 = vld [vmem:[#allocation3 + $0x308] sm:$0xff] }
 0x29f   :  { %908 = vst.msk [vmem:[#allocation3 + $0x328] sm:$0xff] %vm757_vm11, %v857_v13  ;;  %v881_v55 = vsel %vm878_vm3, %v855_v24, %v857_v13  ;;  %2745 = vmatprep.subr.bf16.mxu0 %v1991_v0  ;;  %3934 = vmatprep.subr.bf16.mxu1 %v1991_v0  ;;  %v4751_v13 = vld [vmem:[%s6815_s2 + $0x1c4] ss:$36 sps:$4 sm:$0xff]  }
 0x2a0   :  { %v4753_v24 = vld [vmem:[%s6815_s2 + $0x404] ss:$36 sps:$4 sm:$0xff]  }
 0x2a1   :  { %2665 = vmatmul.mubr.bf16.vlgmr.msra.gmra.mrb[0].mxu0 %v4715_v11  ;;  %3854 = vmatmul.mubr.bf16.vlgmr.msra.gmra.mrb[0].mxu1 %v4718_v48 }
 0x2a2   :  { %2746 = vmatpush1.bf16.msra.mxu0 %v879_v26  ;;  %3935 = vmatpush1.bf16.msra.mxu1 %v879_v26  ;;  %v861_v43 = vpop.permute.xlu1 %860  ;;  %v859_v37 = vpop.permute.xlu0 %858  ;;  %v1993_v4 = vld [vmem:[#allocation3 + $0x318] sm:$0xff] }
 0x2a3   :  { %910 = vst.msk [vmem:[#allocation3 + $0x338] sm:$0xff] %vm757_vm11, %v861_v43  ;;  %v882_v51 = vsel %vm878_vm3, %v859_v37, %v861_v43  ;;  %2747 = vmatprep.subr.bf16.mxu0 %v1993_v4  ;;  %3936 = vmatprep.subr.bf16.mxu1 %v1993_v4  ;;  %v4755_v43 = vld [vmem:[%s6815_s2 + $0x1c0] ss:$36 sps:$4 sm:$0xff]  }
 0x2a4   :  { %2674 = vmatprep.mubr.bf16.mxu0 %v4721_v58  ;;  %3863 = vmatprep.mubr.bf16.mxu1 %v4723_v34  ;;  %v4756_v37 = vld [vmem:[%s6815_s2 + $0x400] ss:$36 sps:$4 sm:$0xff]  }
 0x2a6   :  { %2748 = vmatpush1.bf16.msra.mxu0 %v880_v29  ;;  %3937 = vmatpush1.bf16.msra.mxu1 %v880_v29  ;;  %v865_v17 = vpop.permute.xlu1 %864  ;;  %v863_v22 = vpop.permute.xlu0 %862  ;;  %v1995_v50 = vld [vmem:[#allocation3 + $0x328] sm:$0xff] }
 0x2a7   :  { %912 = vst.msk [vmem:[#allocation3 + $0x348] sm:$0xff] %vm757_vm11, %v865_v17  ;;  %v883_v12 = vsel %vm878_vm3, %v863_v22, %v865_v17  ;;  %2749 = vmatprep.subr.bf16.mxu0 %v1995_v50  ;;  %3938 = vmatprep.subr.bf16.mxu1 %v1995_v50  ;;  %v4757_v17 = vld [vmem:[%s6815_s2 + $0x20c] ss:$36 sps:$4 sm:$0xff]  }
 0x2a8   :  { %v4759_v22 = vld [vmem:[%s6815_s2 + $0x44c] ss:$36 sps:$4 sm:$0xff]  }
 0x2a9   :  { %2675 = vmatmul.mubr.bf16.gmra.mrb[4].mxu0 %v4725_v15  ;;  %3864 = vmatmul.mubr.bf16.gmra.mrb[4].mxu1 %v4726_v21 }
 0x2aa   :  { %2750 = vmatpush1.bf16.msra.mxu0 %v881_v55  ;;  %3939 = vmatpush1.bf16.msra.mxu1 %v881_v55  ;;  %v869_v33 = vpop.permute.xlu1 %868  ;;  %v867_v47 = vpop.permute.xlu0 %866  ;;  %v1997_v27 = vld [vmem:[#allocation3 + $0x338] sm:$0xff] }
 0x2ab   :  { %914 = vst.msk [vmem:[#allocation3 + $0x358] sm:$0xff] %vm757_vm11, %v869_v33  ;;  %v884_v63 = vsel %vm878_vm3, %v867_v47, %v869_v33  ;;  %2751 = vmatprep.subr.bf16.mxu0 %v1997_v27  ;;  %3940 = vmatprep.subr.bf16.mxu1 %v1997_v27  ;;  %v4761_v33 = vld [vmem:[%s6815_s2 + $0x208] ss:$36 sps:$4 sm:$0xff]  }
 0x2ac   :  { %2684 = vmatprep.mubr.bf16.mxu0 %v4727_v10  ;;  %3873 = vmatprep.mubr.bf16.mxu1 %v4729_v41  ;;  %v4762_v47 = vld [vmem:[%s6815_s2 + $0x448] ss:$36 sps:$4 sm:$0xff]  }
 0x2ae   :  { %2752 = vmatpush1.bf16.msra.mxu0 %v882_v51  ;;  %3941 = vmatpush1.bf16.msra.mxu1 %v882_v51  ;;  %v873_v49 = vpop.permute.xlu1 %872  ;;  %v871_v7 = vpop.permute.xlu0 %870  ;;  %v1999_v54 = vld [vmem:[#allocation3 + $0x348] sm:$0xff] }
 0x2af   :  { %916 = vst.msk [vmem:[#allocation3 + $0x368] sm:$0xff] %vm757_vm11, %v873_v49  ;;  %v885_v40 = vsel %vm878_vm3, %v871_v7, %v873_v49  ;;  %2753 = vmatprep.subr.bf16.mxu0 %v1999_v54  ;;  %3942 = vmatprep.subr.bf16.mxu1 %v1999_v54  ;;  %v4768_v49 = vld [vmem:[%s6815_s2 + $0x25c] ss:$36 sps:$4 sm:$0xff]  }
 0x2b1   :  { %2685 = vmatmul.mubr.bf16.gmra.mrb[8].mxu0 %v4731_v45  ;;  %3874 = vmatmul.mubr.bf16.gmra.mrb[8].mxu1 %v4732_v59  ;;  %v4765_v59 = vld [vmem:[%s6815_s2 + $0x1c] ss:$36 sps:$4 sm:$0xff]  }
 0x2b2   :  { %2754 = vmatpush1.bf16.msra.mxu0 %v883_v12  ;;  %3943 = vmatpush1.bf16.msra.mxu1 %v883_v12  ;;  %v877_v3 = vpop.permute.xlu1 %876  ;;  %v875_v53 = vpop.permute.xlu0 %874  ;;  %v2001_v42 = vld [vmem:[#allocation3 + $0x358] sm:$0xff] }
 0x2b3   :  { %918 = vst.msk [vmem:[#allocation3 + $0x378] sm:$0xff] %vm757_vm11, %v877_v3  ;;  %v886_v31 = vsel %vm878_vm3, %v875_v53, %v877_v3  ;;  %2755 = vmatprep.subr.bf16.mxu0 %v2001_v42  ;;  %3944 = vmatprep.subr.bf16.mxu1 %v2001_v42  ;;  %v4763_v3 = vld [vmem:[%s6815_s2 + $0x18] ss:$36 sps:$4 sm:$0xff]  }
 0x2b4   :  { %2694 = vmatprep.mubr.bf16.mxu0 %v4733_v18  ;;  %3883 = vmatprep.mubr.bf16.mxu1 %v4735_v36  ;;  %v4766_v53 = vld [vmem:[%s6815_s2 + $0x258] ss:$36 sps:$4 sm:$0xff]  }
 0x2b6   :  { %2756 = vmatpush1.bf16.msra.mxu0 %v884_v63  ;;  %3945 = vmatpush1.bf16.msra.mxu1 %v884_v63  ;;  %v1410_v35 = vpop.permute.xlu1 %1409  ;;  %v1408_v38 = vpop.permute.xlu0 %1407  ;;  %v2003_v25 = vld [vmem:[#allocation3 + $0x368] sm:$0xff] }
 0x2b7   :  { %1465 = vst.msk [vmem:[#allocation3 + $0x388] sm:$0xff] %vm757_vm11, %v1410_v35  ;;  %v1440_v61 = vsel %vm1439_vm4, %v1408_v38, %v1410_v35  ;;  %2757 = vmatprep.subr.bf16.mxu0 %v2003_v25  ;;  %3946 = vmatprep.subr.bf16.mxu1 %v2003_v25  ;;  %v4771_v35 = vld [vmem:[%s6815_s2 + $0x2a4] ss:$36 sps:$4 sm:$0xff]  }
 0x2b9   :  { %2695 = vmatmul.mubr.bf16.gmra.mrb[12].mxu0 %v4737_v30  ;;  %3884 = vmatmul.mubr.bf16.gmra.mrb[12].mxu1 %v4738_v32  ;;  %v4769_v32 = vld [vmem:[%s6815_s2 + $0x64] ss:$36 sps:$4 sm:$0xff]  }
 0x2ba   :  { %2758 = vmatpush1.bf16.msra.mxu0 %v885_v40  ;;  %3947 = vmatpush1.bf16.msra.mxu1 %v885_v40  ;;  %v1414_v56 = vpop.permute.xlu1 %1413  ;;  %v1412_v2 = vpop.permute.xlu0 %1411  ;;  %v2005_v39 = vld [vmem:[#allocation3 + $0x378] sm:$0xff] }
 0x2bb   :  { %1467 = vst.msk [vmem:[#allocation3 + $0x398] sm:$0xff] %vm757_vm11, %v1414_v56  ;;  %v1441_v1 = vsel %vm1439_vm4, %v1412_v2, %v1414_v56  ;;  %2759 = vmatprep.subr.bf16.mxu0 %v2005_v39  ;;  %3948 = vmatprep.subr.bf16.mxu1 %v2005_v39  ;;  %v4773_v56 = vld [vmem:[%s6815_s2 + $0x60] ss:$36 sps:$4 sm:$0xff]  }
 0x2bc   :  { %2704 = vmatprep.mubr.bf16.mxu0 %v4739_v14  ;;  %3893 = vmatprep.mubr.bf16.mxu1 %v4741_v20  ;;  %v4774_v2 = vld [vmem:[%s6815_s2 + $0x2a0] ss:$36 sps:$4 sm:$0xff]  }
 0x2be   :  { %2760 = vmatpush1.bf16.msra.mxu0 %v886_v31  ;;  %3949 = vmatpush1.bf16.msra.mxu1 %v886_v31  ;;  %v1418_v28 = vpop.permute.xlu1 %1417  ;;  %v1416_v8 = vpop.permute.xlu0 %1415  ;;  %v2007_v52 = vld [vmem:[#allocation3 + $0x388] sm:$0xff] }
 0x2bf   :  { %1469 = vst.msk [vmem:[#allocation3 + $0x3a8] sm:$0xff] %vm757_vm11, %v1418_v28  ;;  %v1442_v16 = vsel %vm1439_vm4, %v1416_v8, %v1418_v28  ;;  %2761 = vmatprep.subr.bf16.mxu0 %v2007_v52  ;;  %3950 = vmatprep.subr.bf16.mxu1 %v2007_v52  ;;  %v4777_v28 = vld [vmem:[%s6815_s2 + $0x2ec] ss:$36 sps:$4 sm:$0xff]  }
 0x2c1   :  { %2705 = vmatmul.mubr.bf16.gmra.mrb[16].mxu0 %v4743_v60  ;;  %3894 = vmatmul.mubr.bf16.gmra.mrb[16].mxu1 %v4744_v57  ;;  %v4775_v57 = vld [vmem:[%s6815_s2 + $0xac] ss:$36 sps:$4 sm:$0xff]  }
 0x2c2   :  { %2762 = vmatpush1.bf16.msra.mxu0 %v1440_v61  ;;  %3951 = vmatpush1.bf16.msra.mxu1 %v1440_v61  ;;  %v1422_v23 = vpop.permute.xlu1 %1421  ;;  %v1420_v6 = vpop.permute.xlu0 %1419  ;;  %v2009_v19 = vld [vmem:[#allocation3 + $0x398] sm:$0xff] }
 0x2c3   :  { %1471 = vst.msk [vmem:[#allocation3 + $0x3b8] sm:$0xff] %vm757_vm11, %v1422_v23  ;;  %v1443_v26 = vsel %vm1439_vm4, %v1420_v6, %v1422_v23  ;;  %2763 = vmatprep.subr.bf16.mxu0 %v2009_v19  ;;  %3952 = vmatprep.subr.bf16.mxu1 %v2009_v19  ;;  %v4779_v23 = vld [vmem:[%s6815_s2 + $0xa8] ss:$36 sps:$4 sm:$0xff]  }
 0x2c4   :  { %2714 = vmatprep.mubr.bf16.mxu0 %v4745_v62  ;;  %3903 = vmatprep.mubr.bf16.mxu1 %v4747_v9  ;;  %v4780_v6 = vld [vmem:[%s6815_s2 + $0x2e8] ss:$36 sps:$4 sm:$0xff]  }
 0x2c6   :  { %2764 = vmatpush1.bf16.msra.mxu0 %v1441_v1  ;;  %3953 = vmatpush1.bf16.msra.mxu1 %v1441_v1  ;;  %v1426_v46 = vpop.permute.xlu1 %1425  ;;  %v1424_v29 = vpop.permute.xlu0 %1423  ;;  %v2011_v11 = vld [vmem:[#allocation3 + $0x3a8] sm:$0xff] }
 0x2c7   :  { %1473 = vst.msk [vmem:[#allocation3 + $0x3c8] sm:$0xff] %vm757_vm11, %v1426_v46  ;;  %v1444_v48 = vsel %vm1439_vm4, %v1424_v29, %v1426_v46  ;;  %2765 = vmatprep.subr.bf16.mxu0 %v2011_v11  ;;  %3954 = vmatprep.subr.bf16.mxu1 %v2011_v11  ;;  %v4783_v46 = vld [vmem:[%s6815_s2 + $0x334] ss:$36 sps:$4 sm:$0xff]  }
 0x2c9   :  { %2715 = vmatmul.mubr.bf16.gmra.mrb[20].mxu0 %v4749_v5  ;;  %3904 = vmatmul.mubr.bf16.gmra.mrb[20].mxu1 %v4750_v44  ;;  %v4781_v44 = vld [vmem:[%s6815_s2 + $0xf4] ss:$36 sps:$4 sm:$0xff]  }
 0x2ca   :  { %2766 = vmatpush1.bf16.msra.mxu0 %v1442_v16  ;;  %3955 = vmatpush1.bf16.msra.mxu1 %v1442_v16  ;;  %v1430_v0 = vpop.permute.xlu1 %1429  ;;  %v1428_v55 = vpop.permute.xlu0 %1427  ;;  %v2013_v58 = vld [vmem:[#allocation3 + $0x3b8] sm:$0xff] }
 0x2cb   :  { %1475 = vst.msk [vmem:[#allocation3 + $0x3d8] sm:$0xff] %vm757_vm11, %v1430_v0  ;;  %v1445_v34 = vsel %vm1439_vm4, %v1428_v55, %v1430_v0  ;;  %2767 = vmatprep.subr.bf16.mxu0 %v2013_v58  ;;  %3956 = vmatprep.subr.bf16.mxu1 %v2013_v58  ;;  %v4785_v0 = vld [vmem:[%s6815_s2 + $0xf0] ss:$36 sps:$4 sm:$0xff]  }
 0x2cc   :  { %2724 = vmatprep.mubr.bf16.mxu0 %v4751_v13  ;;  %3913 = vmatprep.mubr.bf16.mxu1 %v4753_v24  ;;  %v4786_v55 = vld [vmem:[%s6815_s2 + $0x330] ss:$36 sps:$4 sm:$0xff]  }
 0x2ce   :  { %2768 = vmatpush1.bf16.msra.mxu0 %v1443_v26  ;;  %3957 = vmatpush1.bf16.msra.mxu1 %v1443_v26  ;;  %v1434_v4 = vpop.permute.xlu1 %1433  ;;  %v1432_v51 = vpop.permute.xlu0 %1431  ;;  %v2015_v15 = vld [vmem:[#allocation3 + $0x3c8] sm:$0xff] }
 0x2cf   :  { %1477 = vst.msk [vmem:[#allocation3 + $0x3e8] sm:$0xff] %vm757_vm11, %v1434_v4  ;;  %v1446_v21 = vsel %vm1439_vm4, %v1432_v51, %v1434_v4  ;;  %2769 = vmatprep.subr.bf16.mxu0 %v2015_v15  ;;  %3958 = vmatprep.subr.bf16.mxu1 %v2015_v15  ;;  %v4791_v4 = vld [vmem:[%s6815_s2 + $0x138] ss:$36 sps:$4 sm:$0xff]   ;;  %v4793_v15 = vld [vmem:[%s6815_s2 + $0x184] ss:$36 sps:$4 sm:$0xff]  }
 0x2d0   :  { %v4792_v51 = vld [vmem:[%s6815_s2 + $0x378] ss:$36 sps:$4 sm:$0xff]  }
 0x2d1   :  { %2725 = vmatmul.mubr.bf16.gmra.mrb[24].mxu0 %v4755_v43  ;;  %3914 = vmatmul.mubr.bf16.gmra.mrb[24].mxu1 %v4756_v37  ;;  %v4789_v43 = vld [vmem:[%s6815_s2 + $0x37c] ss:$36 sps:$4 sm:$0xff]  }
 0x2d2   :  { %2770 = vmatpush1.bf16.msra.mxu0 %v1444_v48  ;;  %3959 = vmatpush1.bf16.msra.mxu1 %v1444_v48  ;;  %v2017_v50 = vld [vmem:[#allocation3 + $0x3d8] sm:$0xff] }
 0x2d3   :  { %v1438_v12 = vpop.permute.xlu1 %1437  ;;  %v1436_v10 = vpop.permute.xlu0 %1435  ;;  %2771 = vmatprep.subr.bf16.mxu0 %v2017_v50  ;;  %3960 = vmatprep.subr.bf16.mxu1 %v2017_v50  ;;  %v4799_v50 = vld [vmem:[%s6815_s2 + $0x1cc] ss:$36 sps:$4 sm:$0xff]  }
 0x2d4   :  { %1479 = vst.msk [vmem:[#allocation3 + $0x3f8] sm:$0xff] %vm757_vm11, %v1438_v12  ;;  %v1447_v41 = vsel %vm1439_vm4, %v1436_v10, %v1438_v12  ;;  %2734 = vmatprep.mubr.bf16.mxu0 %v4757_v17  ;;  %3923 = vmatprep.mubr.bf16.mxu1 %v4759_v22  ;;  %v4797_v17 = vld [vmem:[%s6815_s2 + $0x180] ss:$36 sps:$4 sm:$0xff]   ;;  %v4801_v12 = vld [vmem:[%s6815_s2 + $0x40c] ss:$36 sps:$4 sm:$0xff]  }
 0x2d5   :  { %v4798_v22 = vld [vmem:[%s6815_s2 + $0x3c0] ss:$36 sps:$4 sm:$0xff]   ;;  %v4803_v10 = vld [vmem:[%s6815_s2 + $0x1c8] ss:$36 sps:$4 sm:$0xff]  }
 0x2d6   :  { %2772 = vmatpush1.bf16.msra.mxu0 %v1445_v34  ;;  %3961 = vmatpush1.bf16.msra.mxu1 %v1445_v34  ;;  %v2019_v27 = vld [vmem:[#allocation3 + $0x3e8] sm:$0xff]  ;;  %v4787_v34 = vld [vmem:[%s6815_s2 + $0x13c] ss:$36 sps:$4 sm:$0xff]  }
 0x2d7   :  { %v1744_v63 = vpop.permute.xlu1 %1743  ;;  %v1742_v45 = vpop.permute.xlu0 %1741  ;;  %2773 = vmatprep.subr.bf16.mxu0 %v2019_v27  ;;  %3962 = vmatprep.subr.bf16.mxu1 %v2019_v27  ;;  %v4809_v27 = vld [vmem:[%s6815_s2 + $0x210] ss:$36 sps:$4 sm:$0xff]  }
 0x2d8   :  { %1799 = vst.msk [vmem:[#allocation3 + $0x408] sm:$0xff] %vm757_vm11, %v1744_v63  ;;  %v1774_v7 = vsel %vm1773_vm5, %v1742_v45, %v1744_v63  ;;  %v4810_v63 = vld [vmem:[%s6815_s2 + $0x450] ss:$36 sps:$4 sm:$0xff]   ;;  %v4845_v45 = vmov 0  }
 0x2d9   :  { %2735 = vmatmul.mubr.bf16.gmra.mrb[28].mxu0 %v4761_v33  ;;  %3924 = vmatmul.mubr.bf16.gmra.mrb[28].mxu1 %v4762_v47  ;;  %v4805_v33 = vld [vmem:[%s6815_s2 + $0x214] ss:$36 sps:$4 sm:$0xff]  }
 0x2da   :  { %2774 = vmatpush1.bf16.msra.mxu0 %v1446_v21  ;;  %3963 = vmatpush1.bf16.msra.mxu1 %v1446_v21  ;;  %v4795_v21 = vld [vmem:[%s6815_s2 + $0x3c4] ss:$36 sps:$4 sm:$0xff]   ;;  %v4807_v47 = vld [vmem:[%s6815_s2 + $0x454] ss:$36 sps:$4 sm:$0xff]  }
 0x2db   :  { %v1748_v54 = vpop.permute.xlu1 %1747  ;;  %v1746_v40 = vpop.permute.xlu0 %1745  ;;  %v2021_v18 = vld [vmem:[#allocation3 + $0x3f8] sm:$0xff]  ;;  %2777 = vmatprep.mubr.bf16.mxu0 %v4765_v59  ;;  %3966 = vmatprep.mubr.bf16.mxu1 %v4768_v49  ;;  %v4811_v59 = vld [vmem:[%s6815_s2 + $0x20] ss:$36 sps:$4 sm:$0xff]  }
 0x2dc   :  { %1801 = vst.msk [vmem:[#allocation3 + $0x418] sm:$0xff] %vm757_vm11, %v1748_v54  ;;  %v1775_v36 = vsel %vm1773_vm5, %v1746_v40, %v1748_v54  ;;  %2775 = vmatprep.subr.bf16.mxu0 %v2021_v18  ;;  %3964 = vmatprep.subr.bf16.mxu1 %v2021_v18  ;;  %v4812_v49 = vld [vmem:[%s6815_s2 + $0x260] ss:$36 sps:$4 sm:$0xff]   ;;  %v4814_v54 = vld [vmem:[%s6815_s2 + $0x2a8] ss:$36 sps:$4 sm:$0xff]  }
 0x2dd   :  { %v4815_v40 = vld [vmem:[%s6815_s2 + $0xb0] ss:$36 sps:$4 sm:$0xff]  }
 0x2de   :  { %2776 = vmatpush1.bf16.msra.mxu0 %v1447_v41  ;;  %3965 = vmatpush1.bf16.msra.mxu1 %v1447_v41  ;;  %v4804_v41 = vld [vmem:[%s6815_s2 + $0x408] ss:$36 sps:$4 sm:$0xff]   ;;  %v4816_v18 = vld [vmem:[%s6815_s2 + $0x2f0] ss:$36 sps:$4 sm:$0xff]  }
 0x2df   :  { %v1752_v42 = vpop.permute.xlu1 %1751  ;;  %v1750_v31 = vpop.permute.xlu0 %1749  ;;  %v2023_v30 = vld [vmem:[#allocation3 + $0x408] sm:$0xff] }
 0x2e0   :  { %1803 = vst.msk [vmem:[#allocation3 + $0x428] sm:$0xff] %vm757_vm11, %v1752_v42  ;;  %v1776_v38 = vsel %vm1773_vm5, %v1750_v31, %v1752_v42  ;;  %2858 = vmatprep.subr.bf16.mxu0 %v2023_v30  ;;  %4047 = vmatprep.subr.bf16.mxu1 %v2023_v30  ;;  %v4820_v42 = vld [vmem:[%s6815_s2 + $0x380] ss:$36 sps:$4 sm:$0xff]   ;;  %v4821_v31 = vld [vmem:[%s6815_s2 + $0x188] ss:$36 sps:$4 sm:$0xff]  }
 0x2e1   :  { %2778 = vmatmul.mubr.bf16.vlgmr.msra.gmra.mrb[0].mxu0 %v4763_v3  ;;  %3967 = vmatmul.mubr.bf16.vlgmr.msra.gmra.mrb[0].mxu1 %v4766_v53  ;;  %v4818_v3 = vld [vmem:[%s6815_s2 + $0x338] ss:$36 sps:$4 sm:$0xff]   ;;  %v4819_v53 = vld [vmem:[%s6815_s2 + $0x140] ss:$36 sps:$4 sm:$0xff]   ;;  %v4822_v30 = vld [vmem:[%s6815_s2 + $0x3c8] ss:$36 sps:$4 sm:$0xff]  }
 0x2e2   :  { %2859 = vmatpush1.bf16.msra.mxu0 %v1774_v7  ;;  %4048 = vmatpush1.bf16.msra.mxu1 %v1774_v7  ;;  %v4813_v7 = vld [vmem:[%s6815_s2 + $0x68] ss:$36 sps:$4 sm:$0xff]  }
 0x2e3   :  { %v1756_v25 = vpop.permute.xlu1 %1755  ;;  %v1754_v61 = vpop.permute.xlu0 %1753  ;;  %v2025_v14 = vld [vmem:[#allocation3 + $0x418] sm:$0xff]  ;;  %2787 = vmatprep.mubr.bf16.mxu0 %v4769_v32  ;;  %3976 = vmatprep.mubr.bf16.mxu1 %v4771_v35  ;;  %v4823_v32 = vld [vmem:[%s6815_s2 + $0x1d0] ss:$36 sps:$4 sm:$0xff]  }
 0x2e4   :  { %1805 = vst.msk [vmem:[#allocation3 + $0x438] sm:$0xff] %vm757_vm11, %v1756_v25  ;;  %v1777_v20 = vsel %vm1773_vm5, %v1754_v61, %v1756_v25  ;;  %2860 = vmatprep.subr.bf16.mxu0 %v2025_v14  ;;  %4049 = vmatprep.subr.bf16.mxu1 %v2025_v14  ;;  %v4824_v35 = vld [vmem:[%s6815_s2 + $0x410] ss:$36 sps:$4 sm:$0xff]   ;;  %v4826_v25 = vld [vmem:[%s6815_s2 + $0x458] ss:$36 sps:$4 sm:$0xff]  }
 0x2e6   :  { %2861 = vmatpush1.bf16.msra.mxu0 %v1775_v36  ;;  %4050 = vmatpush1.bf16.msra.mxu1 %v1775_v36  ;;  %v4817_v36 = vld [vmem:[%s6815_s2 + $0xf8] ss:$36 sps:$4 sm:$0xff]  }
 0x2e7   :  { %v1760_v39 = vpop.permute.xlu1 %1759  ;;  %v1758_v1 = vpop.permute.xlu0 %1757  ;;  %v2027_v60 = vld [vmem:[#allocation3 + $0x428] sm:$0xff] }
 0x2e8   :  { %1807 = vst.msk [vmem:[#allocation3 + $0x448] sm:$0xff] %vm757_vm11, %v1760_v39  ;;  %v1778_v8 = vsel %vm1773_vm5, %v1758_v1, %v1760_v39  ;;  %2862 = vmatprep.subr.bf16.mxu0 %v2027_v60  ;;  %4051 = vmatprep.subr.bf16.mxu1 %v2027_v60 }
 0x2e9   :  { %2788 = vmatmul.mubr.bf16.gmra.mrb[4].mxu0 %v4773_v56  ;;  %3977 = vmatmul.mubr.bf16.gmra.mrb[4].mxu1 %v4774_v2 }
 0x2ea   :  { %2863 = vmatpush1.bf16.msra.mxu0 %v1776_v38  ;;  %4052 = vmatpush1.bf16.msra.mxu1 %v1776_v38  ;;  %v4825_v38 = vld [vmem:[%s6815_s2 + $0x218] ss:$36 sps:$4 sm:$0xff]  }
 0x2eb   :  { %v1764_v52 = vpop.permute.xlu1 %1763  ;;  %v1762_v16 = vpop.permute.xlu0 %1761  ;;  %v2029_v62 = vld [vmem:[#allocation3 + $0x438] sm:$0xff]  ;;  %2797 = vmatprep.mubr.bf16.mxu0 %v4775_v57  ;;  %3986 = vmatprep.mubr.bf16.mxu1 %v4777_v28 }
 0x2ec   :  { %1809 = vst.msk [vmem:[#allocation3 + $0x458] sm:$0xff] %vm757_vm11, %v1764_v52  ;;  %v1779_v9 = vsel %vm1773_vm5, %v1762_v16, %v1764_v52  ;;  %2864 = vmatprep.subr.bf16.mxu0 %v2029_v62  ;;  %4053 = vmatprep.subr.bf16.mxu1 %v2029_v62 }
 0x2ee   :  { %2865 = vmatpush1.bf16.msra.mxu0 %v1777_v20  ;;  %4054 = vmatpush1.bf16.msra.mxu1 %v1777_v20 }
 0x2ef   :  { %v1768_v19 = vpop.permute.xlu1 %1767  ;;  %v1766_v26 = vpop.permute.xlu0 %1765  ;;  %v2031_v5 = vld [vmem:[#allocation3 + $0x448] sm:$0xff] }
 0x2f0   :  { %1811 = vst.msk [vmem:[#allocation3 + $0x468] sm:$0xff] %vm757_vm11, %v1768_v19  ;;  %v1780_v29 = vsel %vm1773_vm5, %v1766_v26, %v1768_v19  ;;  %2866 = vmatprep.subr.bf16.mxu0 %v2031_v5  ;;  %4055 = vmatprep.subr.bf16.mxu1 %v2031_v5 }
 0x2f1   :  { %2798 = vmatmul.mubr.bf16.gmra.mrb[8].mxu0 %v4779_v23  ;;  %3987 = vmatmul.mubr.bf16.gmra.mrb[8].mxu1 %v4780_v6 }
 0x2f2   :  { %2867 = vmatpush1.bf16.msra.mxu0 %v1778_v8  ;;  %4056 = vmatpush1.bf16.msra.mxu1 %v1778_v8 }
 0x2f3   :  { %v1772_v11 = vpop.permute.xlu1 %1771  ;;  %v1770_v48 = vpop.permute.xlu0 %1769  ;;  %v2033_v13 = vld [vmem:[#allocation3 + $0x458] sm:$0xff]  ;;  %2807 = vmatprep.mubr.bf16.mxu0 %v4781_v44  ;;  %3996 = vmatprep.mubr.bf16.mxu1 %v4783_v46 }
 0x2f4   :  { %1813 = vst.msk [vmem:[#allocation3 + $0x478] sm:$0xff] %vm757_vm11, %v1772_v11  ;;  %v1781_v24 = vsel %vm1773_vm5, %v1770_v48, %v1772_v11  ;;  %2868 = vmatprep.subr.bf16.mxu0 %v2033_v13  ;;  %4057 = vmatprep.subr.bf16.mxu1 %v2033_v13 }
 0x2f6   :  { %2869 = vmatpush1.bf16.msra.mxu0 %v1779_v9  ;;  %4058 = vmatpush1.bf16.msra.mxu1 %v1779_v9 }
 0x2f7   :  { %v2035_v58 = vld [vmem:[#allocation3 + $0x468] sm:$0xff] }
 0x2f8   :  { %2870 = vmatprep.subr.bf16.mxu0 %v2035_v58  ;;  %4059 = vmatprep.subr.bf16.mxu1 %v2035_v58 }
 0x2f9   :  { %2808 = vmatmul.mubr.bf16.gmra.mrb[12].mxu0 %v4785_v0  ;;  %3997 = vmatmul.mubr.bf16.gmra.mrb[12].mxu1 %v4786_v55 }
 0x2fa   :  { %2871 = vmatpush1.bf16.msra.mxu0 %v1780_v29  ;;  %4060 = vmatpush1.bf16.msra.mxu1 %v1780_v29 }
 0x2fb   :  { %v2037_v37 = vld [vmem:[#allocation3 + $0x478] sm:$0xff]  ;;  %2817 = vmatprep.mubr.bf16.mxu0 %v4787_v34  ;;  %4006 = vmatprep.mubr.bf16.mxu1 %v4789_v43 }
 0x2fc   :  { %2872 = vmatprep.subr.bf16.mxu0 %v2037_v37  ;;  %4061 = vmatprep.subr.bf16.mxu1 %v2037_v37 }
 0x2fe   :  { %2873 = vmatpush1.bf16.msra.mxu0 %v1781_v24  ;;  %4062 = vmatpush1.bf16.msra.mxu1 %v1781_v24 }
 0x301   :  { %2818 = vmatmul.mubr.bf16.gmra.mrb[16].mxu0 %v4791_v4  ;;  %4007 = vmatmul.mubr.bf16.gmra.mrb[16].mxu1 %v4792_v51 }
 0x302   :  { %2827 = vmatprep.mubr.bf16.mxu0 %v4793_v15  ;;  %4016 = vmatprep.mubr.bf16.mxu1 %v4795_v21 }
 0x309   :  { %2828 = vmatmul.mubr.bf16.gmra.mrb[20].mxu0 %v4797_v17  ;;  %4017 = vmatmul.mubr.bf16.gmra.mrb[20].mxu1 %v4798_v22 }
 0x30a   :  { %2837 = vmatprep.mubr.bf16.mxu0 %v4799_v50  ;;  %4026 = vmatprep.mubr.bf16.mxu1 %v4801_v12 }
 0x311   :  { %2838 = vmatmul.mubr.bf16.gmra.mrb[24].mxu0 %v4803_v10  ;;  %4027 = vmatmul.mubr.bf16.gmra.mrb[24].mxu1 %v4804_v41 }
 0x312   :  { %2847 = vmatprep.mubr.bf16.mxu0 %v4805_v33  ;;  %4036 = vmatprep.mubr.bf16.mxu1 %v4807_v47 }
 0x319   :  { %2848 = vmatmul.mubr.bf16.gmra.mrb[28].mxu0 %v4809_v27  ;;  %4037 = vmatmul.mubr.bf16.gmra.mrb[28].mxu1 %v4810_v63 }
 0x31a   :  { %2890 = vmatprep.mubr.bf16.mxu0 %v4845_v45  ;;  %4079 = vmatprep.mubr.bf16.mxu1 %v4845_v45 }
 0x321   :  { %2891 = vmatmul.mubr.bf16.vlgmr.msra.gmra.mrb[0].mxu0 %v4811_v59  ;;  %4080 = vmatmul.mubr.bf16.vlgmr.msra.gmra.mrb[0].mxu1 %v4812_v49 }
 0x322   :  { %2900 = vmatprep.mubr.bf16.mxu0 %v4845_v45  ;;  %4089 = vmatprep.mubr.bf16.mxu1 %v4845_v45 }
 0x329   :  { %2901 = vmatmul.mubr.bf16.gmra.mrb[4].mxu0 %v4813_v7  ;;  %4090 = vmatmul.mubr.bf16.gmra.mrb[4].mxu1 %v4814_v54 }
 0x32a   :  { %2910 = vmatprep.mubr.bf16.mxu0 %v4845_v45  ;;  %4099 = vmatprep.mubr.bf16.mxu1 %v4845_v45 }
 0x331   :  { %2911 = vmatmul.mubr.bf16.gmra.mrb[8].mxu0 %v4815_v40  ;;  %4100 = vmatmul.mubr.bf16.gmra.mrb[8].mxu1 %v4816_v18 }
 0x332   :  { %2920 = vmatprep.mubr.bf16.mxu0 %v4845_v45  ;;  %4109 = vmatprep.mubr.bf16.mxu1 %v4845_v45 }
 0x339   :  { %2921 = vmatmul.mubr.bf16.gmra.mrb[12].mxu0 %v4817_v36  ;;  %4110 = vmatmul.mubr.bf16.gmra.mrb[12].mxu1 %v4818_v3 }
 0x33a   :  { %2930 = vmatprep.mubr.bf16.mxu0 %v4845_v45  ;;  %4119 = vmatprep.mubr.bf16.mxu1 %v4845_v45 }
 0x341   :  { %2931 = vmatmul.mubr.bf16.gmra.mrb[16].mxu0 %v4819_v53  ;;  %4120 = vmatmul.mubr.bf16.gmra.mrb[16].mxu1 %v4820_v42 }
 0x342   :  { %2940 = vmatprep.mubr.bf16.mxu0 %v4845_v45  ;;  %4129 = vmatprep.mubr.bf16.mxu1 %v4845_v45 }
 0x349   :  { %2941 = vmatmul.mubr.bf16.gmra.mrb[20].mxu0 %v4821_v31  ;;  %4130 = vmatmul.mubr.bf16.gmra.mrb[20].mxu1 %v4822_v30 }
 0x34a   :  { %2950 = vmatprep.mubr.bf16.mxu0 %v4845_v45  ;;  %4139 = vmatprep.mubr.bf16.mxu1 %v4845_v45 }
 0x351   :  { %2951 = vmatmul.mubr.bf16.gmra.mrb[24].mxu0 %v4823_v32  ;;  %4140 = vmatmul.mubr.bf16.gmra.mrb[24].mxu1 %v4824_v35 }
 0x352   :  { %2960 = vmatprep.mubr.bf16.mxu0 %v4845_v45  ;;  %4149 = vmatprep.mubr.bf16.mxu1 %v4845_v45 }
 0x359   :  { %2961 = vmatmul.mubr.bf16.gmra.mrb[28].mxu0 %v4825_v38  ;;  %4150 = vmatmul.mubr.bf16.gmra.mrb[28].mxu1 %v4826_v25 }
 0x3f4   :  { %v2892_v61 = vpop.f32.mrb[0].mxu0  ;;  %v4081_v14 = vpop.f32.mrb[0].mxu1 }
 0x3f5   :  { %2971 = vst [vmem:[%s6816_s3] sm:$0xff] %v2892_v61  ;;  %4160 = vst [vmem:[%s6816_s3 + $0x100] sm:$0xff] %v4081_v14  ;;  %v2894_v20 = vpop.f32.mrb[1].mxu0  ;;  %v4083_v56 = vpop.f32.mrb[1].mxu1 }
 0x3f6   :  { %2972 = vst.msk [vmem:[%s6816_s3 + $0x8] sm:$0xff] %vm757_vm11, %v2894_v20  ;;  %4161 = vst.msk [vmem:[%s6816_s3 + $0x108] sm:$0xff] %vm757_vm11, %v4083_v56  ;;  %v2896_v2 = vpop.f32.mrb[2].mxu0  ;;  %v4085_v39 = vpop.f32.mrb[2].mxu1 }
 0x3f7   :  { %2973 = vst [vmem:[%s6816_s3 + $0x10] sm:$0xff] %v2896_v2  ;;  %4162 = vst [vmem:[%s6816_s3 + $0x110] sm:$0xff] %v4085_v39  ;;  %v2898_v1 = vpop.f32.mrb[3].mxu0  ;;  %v4087_v60 = vpop.f32.mrb[3].mxu1 }
 0x3f8   :  { %2974 = vst.msk [vmem:[%s6816_s3 + $0x18] sm:$0xff] %vm757_vm11, %v2898_v1  ;;  %4163 = vst.msk [vmem:[%s6816_s3 + $0x118] sm:$0xff] %vm757_vm11, %v4087_v60 }
 0x3fc   :  { %v2902_v57 = vpop.f32.mrb[4].mxu0  ;;  %v4091_v28 = vpop.f32.mrb[4].mxu1 }
 0x3fd   :  { %2975 = vst [vmem:[%s6816_s3 + $0x20] sm:$0xff] %v2902_v57  ;;  %4164 = vst [vmem:[%s6816_s3 + $0x120] sm:$0xff] %v4091_v28  ;;  %v2904_v8 = vpop.f32.mrb[5].mxu0  ;;  %v4093_v52 = vpop.f32.mrb[5].mxu1 }
 0x3fe   :  { %2976 = vst.msk [vmem:[%s6816_s3 + $0x28] sm:$0xff] %vm757_vm11, %v2904_v8  ;;  %4165 = vst.msk [vmem:[%s6816_s3 + $0x128] sm:$0xff] %vm757_vm11, %v4093_v52  ;;  %v2906_v16 = vpop.f32.mrb[6].mxu0  ;;  %v4095_v62 = vpop.f32.mrb[6].mxu1 }
 0x3ff   :  { %2977 = vst [vmem:[%s6816_s3 + $0x30] sm:$0xff] %v2906_v16  ;;  %4166 = vst [vmem:[%s6816_s3 + $0x130] sm:$0xff] %v4095_v62  ;;  %v2908_v9 = vpop.f32.mrb[7].mxu0  ;;  %v4097_v23 = vpop.f32.mrb[7].mxu1 }
 0x400   :  { %2978 = vst.msk [vmem:[%s6816_s3 + $0x38] sm:$0xff] %vm757_vm11, %v2908_v9  ;;  %4167 = vst.msk [vmem:[%s6816_s3 + $0x138] sm:$0xff] %vm757_vm11, %v4097_v23 }
 0x404   :  { %v2912_v6 = vpop.f32.mrb[8].mxu0  ;;  %v4101_v19 = vpop.f32.mrb[8].mxu1 }
 0x405   :  { %2979 = vst [vmem:[%s6816_s3 + $0x40] sm:$0xff] %v2912_v6  ;;  %4168 = vst [vmem:[%s6816_s3 + $0x140] sm:$0xff] %v4101_v19  ;;  %v2914_v26 = vpop.f32.mrb[9].mxu0  ;;  %v4103_v5 = vpop.f32.mrb[9].mxu1 }
 0x406   :  { %2980 = vst.msk [vmem:[%s6816_s3 + $0x48] sm:$0xff] %vm757_vm11, %v2914_v26  ;;  %4169 = vst.msk [vmem:[%s6816_s3 + $0x148] sm:$0xff] %vm757_vm11, %v4103_v5  ;;  %v2916_v44 = vpop.f32.mrb[10].mxu0  ;;  %v4105_v46 = vpop.f32.mrb[10].mxu1 }
 0x407   :  { %2981 = vst [vmem:[%s6816_s3 + $0x50] sm:$0xff] %v2916_v44  ;;  %4170 = vst [vmem:[%s6816_s3 + $0x150] sm:$0xff] %v4105_v46  ;;  %v2918_v29 = vpop.f32.mrb[11].mxu0  ;;  %v4107_v11 = vpop.f32.mrb[11].mxu1 }
 0x408   :  { %2982 = vst.msk [vmem:[%s6816_s3 + $0x58] sm:$0xff] %vm757_vm11, %v2918_v29  ;;  %4171 = vst.msk [vmem:[%s6816_s3 + $0x158] sm:$0xff] %vm757_vm11, %v4107_v11 }
 0x40c   :  { %v2922_v48 = vpop.f32.mrb[12].mxu0  ;;  %v4111_v13 = vpop.f32.mrb[12].mxu1 }
 0x40d   :  { %2983 = vst [vmem:[%s6816_s3 + $0x60] sm:$0xff] %v2922_v48  ;;  %4172 = vst [vmem:[%s6816_s3 + $0x160] sm:$0xff] %v4111_v13  ;;  %v2924_v24 = vpop.f32.mrb[13].mxu0  ;;  %v4113_v0 = vpop.f32.mrb[13].mxu1 }
 0x40e   :  { %2984 = vst.msk [vmem:[%s6816_s3 + $0x68] sm:$0xff] %vm757_vm11, %v2924_v24  ;;  %4173 = vst.msk [vmem:[%s6816_s3 + $0x168] sm:$0xff] %vm757_vm11, %v4113_v0  ;;  %v2926_v55 = vpop.f32.mrb[14].mxu0  ;;  %v4115_v58 = vpop.f32.mrb[14].mxu1 }
 0x40f   :  { %2985 = vst [vmem:[%s6816_s3 + $0x70] sm:$0xff] %v2926_v55  ;;  %4174 = vst [vmem:[%s6816_s3 + $0x170] sm:$0xff] %v4115_v58  ;;  %v2928_v34 = vpop.f32.mrb[15].mxu0  ;;  %v4117_v43 = vpop.f32.mrb[15].mxu1 }
 0x410   :  { %2986 = vst.msk [vmem:[%s6816_s3 + $0x78] sm:$0xff] %vm757_vm11, %v2928_v34  ;;  %4175 = vst.msk [vmem:[%s6816_s3 + $0x178] sm:$0xff] %vm757_vm11, %v4117_v43 }
 0x414   :  { %v2932_v37 = vpop.f32.mrb[16].mxu0  ;;  %v4121_v4 = vpop.f32.mrb[16].mxu1 }
 0x415   :  { %2987 = vst [vmem:[%s6816_s3 + $0x80] sm:$0xff] %v2932_v37  ;;  %4176 = vst [vmem:[%s6816_s3 + $0x180] sm:$0xff] %v4121_v4  ;;  %v2934_v51 = vpop.f32.mrb[17].mxu0  ;;  %v4123_v15 = vpop.f32.mrb[17].mxu1 }
 0x416   :  { %2988 = vst.msk [vmem:[%s6816_s3 + $0x88] sm:$0xff] %vm757_vm11, %v2934_v51  ;;  %4177 = vst.msk [vmem:[%s6816_s3 + $0x188] sm:$0xff] %vm757_vm11, %v4123_v15  ;;  %v2936_v21 = vpop.f32.mrb[18].mxu0  ;;  %v4125_v17 = vpop.f32.mrb[18].mxu1 }
 0x417   :  { %2989 = vst [vmem:[%s6816_s3 + $0x90] sm:$0xff] %v2936_v21  ;;  %4178 = vst [vmem:[%s6816_s3 + $0x190] sm:$0xff] %v4125_v17  ;;  %v2938_v22 = vpop.f32.mrb[19].mxu0  ;;  %v4127_v50 = vpop.f32.mrb[19].mxu1 }
 0x418   :  { %2990 = vst.msk [vmem:[%s6816_s3 + $0x98] sm:$0xff] %vm757_vm11, %v2938_v22  ;;  %4179 = vst.msk [vmem:[%s6816_s3 + $0x198] sm:$0xff] %vm757_vm11, %v4127_v50 }
 0x41c   :  { %v2942_v12 = vpop.f32.mrb[20].mxu0  ;;  %v4131_v10 = vpop.f32.mrb[20].mxu1 }
 0x41d   :  { %2991 = vst [vmem:[%s6816_s3 + $0xa0] sm:$0xff] %v2942_v12  ;;  %4180 = vst [vmem:[%s6816_s3 + $0x1a0] sm:$0xff] %v4131_v10  ;;  %v2944_v41 = vpop.f32.mrb[21].mxu0  ;;  %v4133_v33 = vpop.f32.mrb[21].mxu1 }
 0x41e   :  { %2992 = vst.msk [vmem:[%s6816_s3 + $0xa8] sm:$0xff] %vm757_vm11, %v2944_v41  ;;  %4181 = vst.msk [vmem:[%s6816_s3 + $0x1a8] sm:$0xff] %vm757_vm11, %v4133_v33  ;;  %v2946_v47 = vpop.f32.mrb[22].mxu0  ;;  %v4135_v27 = vpop.f32.mrb[22].mxu1 }
 0x41f   :  { %2993 = vst [vmem:[%s6816_s3 + $0xb0] sm:$0xff] %v2946_v47  ;;  %4182 = vst [vmem:[%s6816_s3 + $0x1b0] sm:$0xff] %v4135_v27  ;;  %v2948_v63 = vpop.f32.mrb[23].mxu0  ;;  %v4137_v45 = vpop.f32.mrb[23].mxu1 }
 0x420   :  { %2994 = vst.msk [vmem:[%s6816_s3 + $0xb8] sm:$0xff] %vm757_vm11, %v2948_v63  ;;  %4183 = vst.msk [vmem:[%s6816_s3 + $0x1b8] sm:$0xff] %vm757_vm11, %v4137_v45 }
 0x424   :  { %v2952_v59 = vpop.f32.mrb[24].mxu0  ;;  %v4141_v49 = vpop.f32.mrb[24].mxu1 }
 0x425   :  { %2995 = vst [vmem:[%s6816_s3 + $0xc0] sm:$0xff] %v2952_v59  ;;  %4184 = vst [vmem:[%s6816_s3 + $0x1c0] sm:$0xff] %v4141_v49  ;;  %v2954_v7 = vpop.f32.mrb[25].mxu0  ;;  %v4143_v54 = vpop.f32.mrb[25].mxu1 }
 0x426   :  { %2996 = vst.msk [vmem:[%s6816_s3 + $0xc8] sm:$0xff] %vm757_vm11, %v2954_v7  ;;  %4185 = vst.msk [vmem:[%s6816_s3 + $0x1c8] sm:$0xff] %vm757_vm11, %v4143_v54  ;;  %v2956_v40 = vpop.f32.mrb[26].mxu0  ;;  %v4145_v18 = vpop.f32.mrb[26].mxu1 }
 0x427   :  { %2997 = vst [vmem:[%s6816_s3 + $0xd0] sm:$0xff] %v2956_v40  ;;  %4186 = vst [vmem:[%s6816_s3 + $0x1d0] sm:$0xff] %v4145_v18  ;;  %v2958_v36 = vpop.f32.mrb[27].mxu0  ;;  %v4147_v3 = vpop.f32.mrb[27].mxu1 }
 0x428   :  { %2998 = vst.msk [vmem:[%s6816_s3 + $0xd8] sm:$0xff] %vm757_vm11, %v2958_v36  ;;  %4187 = vst.msk [vmem:[%s6816_s3 + $0x1d8] sm:$0xff] %vm757_vm11, %v4147_v3 }
 0x42c   :  { %v2962_v53 = vpop.f32.mrb[28].mxu0  ;;  %v4151_v42 = vpop.f32.mrb[28].mxu1 }
 0x42d   :  { %2999 = vst [vmem:[%s6816_s3 + $0xe0] sm:$0xff] %v2962_v53  ;;  %4188 = vst [vmem:[%s6816_s3 + $0x1e0] sm:$0xff] %v4151_v42  ;;  %v2964_v31 = vpop.f32.mrb[29].mxu0  ;;  %v4153_v30 = vpop.f32.mrb[29].mxu1 }
 0x42e   :  { %3000 = vst.msk [vmem:[%s6816_s3 + $0xe8] sm:$0xff] %vm757_vm11, %v2964_v31  ;;  %4189 = vst.msk [vmem:[%s6816_s3 + $0x1e8] sm:$0xff] %vm757_vm11, %v4153_v30  ;;  %v2966_v32 = vpop.f32.mrb[30].mxu0  ;;  %v4155_v35 = vpop.f32.mrb[30].mxu1 }
 0x42f   :  { %3001 = vst [vmem:[%s6816_s3 + $0xf0] sm:$0xff] %v2966_v32  ;;  %4190 = vst [vmem:[%s6816_s3 + $0x1f0] sm:$0xff] %v4155_v35  ;;  %v2968_v38 = vpop.f32.mrb[31].mxu0  ;;  %v4157_v25 = vpop.f32.mrb[31].mxu1 }
 0x430   :  { %3002 = vst.msk [vmem:[%s6816_s3 + $0xf8] sm:$0xff] %vm757_vm11, %v2968_v38  ;;  %4191 = vst.msk [vmem:[%s6816_s3 + $0x1f8] sm:$0xff] %vm757_vm11, %v4157_v25 }

</bundles_post_ra>
